<compile_context>
chip_gen: v6e
topology: v6e:2x2x1
jax: 0.10.0
libtpu: 0.0.40
codegen_flags: <defaults>
</compile_context>

<pallas_src>
import functools
import math
from typing import NamedTuple

import jax
import jax.numpy as jnp
import numpy as np
from jax import lax
from jax.experimental import pallas as pl
from jax.experimental.pallas import tpu as pltpu

_VMEM_LIMIT = 48 * 1024 * 1024          # above all default scoped limits, < v7x physical
_NEG_INF = -1e9                         # neighborhood mask value (safe in fp32/bf16)


def _pick_row_tile(n):
    for cand in (512, 256, 128, 64, 32, 16, 8):
        if n % cand == 0:
            return cand
    # TODO(synk): pad N = B*H*W up to a multiple of 8 and add a remainder tile.
    raise ValueError(f"N={n} must be a multiple of 8")


# ----------------------- fused LayerNorm + GEMM kernels -----------------------

def _ln_qkv_kernel(x_ref, g_ref, beta_ref, w_ref, b_ref, q_ref, kv_ref, *,
                   eps, q_scale):
    x = x_ref[...].astype(jnp.float32)
    mu = jnp.mean(x, axis=-1, keepdims=True)
    var = jnp.mean(jnp.square(x - mu), axis=-1, keepdims=True)
    xn = (x - mu) * lax.rsqrt(var + eps)
    xn = xn * g_ref[...].astype(jnp.float32) + beta_ref[...].astype(jnp.float32)
    acc = jnp.dot(xn.astype(w_ref.dtype), w_ref[...],
                  preferred_element_type=jnp.float32)
    acc = acc + b_ref[...].astype(jnp.float32)
    c = q_ref.shape[-1]
    # qk scale folded into the q producer (saves a per-tile fp32 scale in attention)
    q_ref[...] = (acc[:, :c] * q_scale).astype(q_ref.dtype)
    kv_ref[...] = acc[:, c:].astype(kv_ref.dtype)


def _ln_gemm_kernel(x_ref, g_ref, beta_ref, w_ref, b_ref, o_ref, *, eps, act):
    x = x_ref[...].astype(jnp.float32)
    mu = jnp.mean(x, axis=-1, keepdims=True)
    var = jnp.mean(jnp.square(x - mu), axis=-1, keepdims=True)
    xn = (x - mu) * lax.rsqrt(var + eps)
    xn = xn * g_ref[...].astype(jnp.float32) + beta_ref[...].astype(jnp.float32)
    acc = jnp.dot(xn.astype(w_ref.dtype), w_ref[...],
                  preferred_element_type=jnp.float32)
    acc = acc + b_ref[...].astype(jnp.float32)
    if act == "gelu":
        # exact (erf) GELU, matching torch.nn.GELU default, in fp32
        acc = 0.5 * acc * (1.0 + lax.erf(acc * (1.0 / math.sqrt(2.0))))
    o_ref[...] = acc.astype(o_ref.dtype)


def _gemm_residual_kernel(x_ref, w_ref, b_ref, res_ref, o_ref):
    acc = jnp.dot(x_ref[...], w_ref[...], preferred_element_type=jnp.float32)
    acc = acc + b_ref[...].astype(jnp.float32) + res_ref[...].astype(jnp.float32)
    o_ref[...] = acc.astype(o_ref.dtype)


def ln_qkv(x2d, gamma, beta, w, b, q_scale, eps=1e-5):
    n, cin = x2d.shape
    c3 = w.shape[1]
    c = c3 // 3
    tn = _pick_row_tile(n)
    return pl.pallas_call(
        functools.partial(_ln_qkv_kernel, eps=eps, q_scale=q_scale),
        out_shape=(jax.ShapeDtypeStruct((n, c), jnp.bfloat16),
                   jax.ShapeDtypeStruct((n, 2 * c), jnp.bfloat16)),
        grid_spec=pltpu.PrefetchScalarGridSpec(
            num_scalar_prefetch=0,
            grid=(n // tn,),
            in_specs=[pl.BlockSpec((tn, cin), lambda i: (i, 0)),
                      pl.BlockSpec((1, cin), lambda i: (0, 0)),
                      pl.BlockSpec((1, cin), lambda i: (0, 0)),
                      pl.BlockSpec((cin, c3), lambda i: (0, 0)),
                      pl.BlockSpec((1, c3), lambda i: (0, 0))],
            out_specs=(pl.BlockSpec((tn, c), lambda i: (i, 0)),
                       pl.BlockSpec((tn, 2 * c), lambda i: (i, 0)))),
        compiler_params=pltpu.CompilerParams(
            dimension_semantics=("parallel",), vmem_limit_bytes=_VMEM_LIMIT),
    )(x2d, gamma.reshape(1, -1), beta.reshape(1, -1), w, b.reshape(1, -1))


def ln_gemm(x2d, gamma, beta, w, b, out_dtype, act="none", eps=1e-5):
    n, cin = x2d.shape
    cout = w.shape[1]
    tn = _pick_row_tile(n)
    return pl.pallas_call(
        functools.partial(_ln_gemm_kernel, eps=eps, act=act),
        out_shape=jax.ShapeDtypeStruct((n, cout), out_dtype),
        grid_spec=pltpu.PrefetchScalarGridSpec(
            num_scalar_prefetch=0,
            grid=(n // tn,),
            in_specs=[pl.BlockSpec((tn, cin), lambda i: (i, 0)),
                      pl.BlockSpec((1, cin), lambda i: (0, 0)),
                      pl.BlockSpec((1, cin), lambda i: (0, 0)),
                      pl.BlockSpec((cin, cout), lambda i: (0, 0)),
                      pl.BlockSpec((1, cout), lambda i: (0, 0))],
            out_specs=pl.BlockSpec((tn, cout), lambda i: (i, 0))),
        compiler_params=pltpu.CompilerParams(
            dimension_semantics=("parallel",), vmem_limit_bytes=_VMEM_LIMIT),
    )(x2d, gamma.reshape(1, -1), beta.reshape(1, -1), w, b.reshape(1, -1))


def gemm_residual(x2d, w, b, res2d, out_dtype):
    n, cin = x2d.shape
    cout = w.shape[1]
    tn = _pick_row_tile(n)
    return pl.pallas_call(
        _gemm_residual_kernel,
        out_shape=jax.ShapeDtypeStruct((n, cout), out_dtype),
        grid_spec=pltpu.PrefetchScalarGridSpec(
            num_scalar_prefetch=0,
            grid=(n // tn,),
            in_specs=[pl.BlockSpec((tn, cin), lambda i: (i, 0)),
                      pl.BlockSpec((cin, cout), lambda i: (0, 0)),
                      pl.BlockSpec((1, cout), lambda i: (0, 0)),
                      pl.BlockSpec((tn, cout), lambda i: (i, 0))],
            out_specs=pl.BlockSpec((tn, cout), lambda i: (i, 0))),
        compiler_params=pltpu.CompilerParams(
            dimension_semantics=("parallel",), vmem_limit_bytes=_VMEM_LIMIT),
    )(x2d, w, b.reshape(1, -1), res2d)


# --------------------- NATTEN neighborhood index tables ----------------------
# Exact NATTEN semantics: windows clamp/shift at borders so every query sees
# exactly kernel_size**2 keys; rpb indexed with get_pb_start offsets.

def _natten_indices(H, W, K, dilation):
    nb = K // 2

    def window_start(idx, L):
        if dilation <= 1:
            ws = max(idx - nb, 0)
            if idx + nb >= L:
                ws += L - idx - nb - 1
            return ws
        ni = idx - nb * dilation
        if ni < 0:
            return idx % dilation
        if idx + nb * dilation >= L:
            imodd = idx % dilation
            a = (L // dilation) * dilation
            b = L - a
            if imodd < b:
                return L - b + imodd - 2 * nb * dilation
            return a + imodd - K * dilation
        return ni

    def pb_start(idx, L):
        if dilation <= 1:
            pi = nb
            if idx < nb:
                pi += nb - idx
            if idx + nb >= L:
                pi += L - idx - 1 - nb
            return pi
        if idx - nb * dilation < 0:
            return K - 1 - (idx // dilation)
        if idx + nb * dilation >= L:
            return (L - idx - 1) // dilation
        return nb

    nbr = np.zeros((H * W, K * K), dtype=np.int32)
    pb = np.zeros((H * W, K * K, 2), dtype=np.int32)
    for i in range(H):
        wi, pi = window_start(i, H), pb_start(i, H)
        for j in range(W):
            wj, pj = window_start(j, W), pb_start(j, W)
            for ki in range(K):
                for kj in range(K):
                    nbr[i * W + j, ki * K + kj] = (wi + ki * dilation) * W + (wj + kj * dilation)
                    pb[i * W + j, ki * K + kj, 0] = pi + ki
                    pb[i * W + j, ki * K + kj, 1] = pj + kj
    return nbr, pb


class _BandMeta(NamedTuple):
    H: int
    W: int
    TR: int        # image rows per query tile
    TQ: int        # queries per tile (= TR * W)
    T: int         # number of query tiles (= H // TR)
    BAND: int      # K/V band rows per tile
    BANDW: int     # K/V band pixels per tile (= BAND * W)
    KDIST: int     # (K - 1) * dilation
    mask: np.ndarray   # (T, TQ, BANDW) bool, True at real neighborhood positions
    aidx: np.ndarray   # (T, TQ, BANDW) int32, rpb row index
    bidx: np.ndarray   # (T, TQ, BANDW) int32, rpb col index


@functools.lru_cache(maxsize=None)
def _natten_band_meta(H, W, K, dilation, tq_target=512):
    nbr, pb = _natten_indices(H, W, K, dilation)
    kdist = (K - 1) * dilation

    TR = 1
    for r in range(H, 0, -1):
        if H % r == 0 and r * W <= tq_target:
            TR = r
            break
    TQ = TR * W
    # TODO(synk): pad the query tile to a multiple of 8 rows for odd W.
    assert TQ % 8 == 0, "query tile must be a multiple of 8 rows"
    T = H // TR
    BAND = min(H, TR + 2 * kdist)
    BANDW = BAND * W
    band_start = np.clip(np.arange(T) * TR - kdist, 0, H - BAND).astype(np.int64)

    KK = K * K
    nbr_t = nbr.reshape(T, TQ, KK)
    pb_t = pb.reshape(T, TQ, KK, 2)
    bandpos = nbr_t - band_start[:, None, None] * W
    assert bandpos.min() >= 0 and bandpos.max() < BANDW, "band does not cover window"

    mask = np.zeros((T, TQ, BANDW), dtype=bool)
    aidx = np.zeros((T, TQ, BANDW), dtype=np.int32)
    bidx = np.zeros((T, TQ, BANDW), dtype=np.int32)
    ti = np.arange(T)[:, None, None]
    qi = np.arange(TQ)[None, :, None]
    mask[ti, qi, bandpos] = True
    aidx[ti, qi, bandpos] = pb_t[..., 0]
    bidx[ti, qi, bandpos] = pb_t[..., 1]
    return _BandMeta(H=H, W=W, TR=TR, TQ=TQ, T=T, BAND=BAND, BANDW=BANDW,
                     KDIST=kdist, mask=mask, aidx=aidx, bidx=bidx)


def _band_bias(rpb, meta):
    """Relative-positional bias laid out in band coords, -1e9 at masked spots."""
    a = jnp.asarray(meta.aidx)
    b = jnp.asarray(meta.bidx)
    m = jnp.asarray(meta.mask)
    gathered = rpb[:, a, b]                                   # (nh, T, TQ, BANDW)
    bias = jnp.where(m[None], gathered, jnp.float32(_NEG_INF))
    return bias.transpose(1, 0, 2, 3).astype(jnp.float32)     # (T, nh, TQ, BANDW)


# ----------------------- Neighborhood attention kernel -----------------------

def _natten_band_kernel(q_ref, kv_hbm, bias_ref, o_ref, kv_vmem, sem, *,
                        num_heads, img_h, img_w, tile_rows, band_rows, kdist):
    t = pl.program_id(0)
    b = pl.program_id(1)
    n_batch = pl.num_programs(1)
    tq, c = q_ref.shape
    hd = c // num_heads
    bandw = band_rows * img_w

    # Contiguous K/V row band covering every neighborhood of this query-row tile.
    # The start row depends only on t, so the band for (t, b+1) uses the same rows
    # of the next image and can be prefetched while (t, b) is being computed.
    row0 = t * tile_rows
    b0 = jnp.clip(row0 - kdist, 0, img_h - band_rows)
    start = b0 * img_w
    slot = b & 1

    def band_copy(batch_idx, slot_idx):
        return pltpu.make_async_copy(
            kv_hbm.at[batch_idx, pl.ds(start, bandw), :],
            kv_vmem.at[slot_idx], sem.at[slot_idx])

    @pl.when(b == 0)                      # prime the double buffer per tile
    def _():
        band_copy(b, slot).start()

    @pl.when(b + 1 < n_batch)             # prefetch next image's band
    def _():
        band_copy(b + 1, 1 - slot).start()

    band_copy(b, slot).wait()

    q = q_ref[...]                        # (TQ, C) bf16, qk scale pre-folded
    kv = kv_vmem[slot]                    # (BANDW, 2C) bf16

    heads_out = []
    for h in range(num_heads):
        qh = q[:, h * hd:(h + 1) * hd]
        kh = kv[:, h * hd:(h + 1) * hd]
        vh = kv[:, c + h * hd:c + (h + 1) * hd]
        # MXU: (TQ, hd) x (BANDW, hd)^T -> (TQ, BANDW), fp32 accumulation
        logits = lax.dot_general(qh, kh, (((1,), (1,)), ((), ())),
                                 preferred_element_type=jnp.float32)
        logits = logits + bias_ref[h]     # rpb at neighbors, -1e9 elsewhere
        m = jnp.max(logits, axis=-1, keepdims=True)
        p = jnp.exp(logits - m)
        p = p * pl.reciprocal(jnp.sum(p, axis=-1, keepdims=True), approx=True)
        # MXU: (TQ, BANDW) x (BANDW, hd) -> (TQ, hd); masked positions contribute 0
        heads_out.append(jnp.dot(p.astype(kv.dtype), vh,
                                 preferred_element_type=jnp.float32))
    # lane-dense (TQ, C) store with all heads packed
    o_ref[...] = jnp.concatenate(heads_out, axis=-1).astype(o_ref.dtype)


def natten_band_attention(q, kv, bias, meta, *, num_heads):
    B, HW, C = q.shape
    kernel = functools.partial(
        _natten_band_kernel, num_heads=num_heads,
        img_h=meta.H, img_w=meta.W, tile_rows=meta.TR,
        band_rows=meta.BAND, kdist=meta.KDIST)
    return pl.pallas_call(
        kernel,
        out_shape=jax.ShapeDtypeStruct((B, HW, C), q.dtype),
        grid_spec=pltpu.PrefetchScalarGridSpec(
            num_scalar_prefetch=0,
            # Tile axis outer (megacore-parallel), batch axis inner: the bias block
            # only depends on t so it stays VMEM-resident across the whole batch,
            # and the in-kernel band prefetch runs along the inner batch axis.
            grid=(meta.T, B),
            in_specs=[
                pl.BlockSpec((None, meta.TQ, C), lambda t, b: (b, t, 0)),
                pl.BlockSpec(memory_space=pl.ANY),   # kv stays in HBM, banded DMA
                pl.BlockSpec((None, num_heads, meta.TQ, meta.BANDW),
                             lambda t, b: (t, 0, 0, 0)),
            ],
            out_specs=pl.BlockSpec((None, meta.TQ, C), lambda t, b: (b, t, 0)),
            scratch_shapes=[pltpu.VMEM((2, meta.BANDW, 2 * C), kv.dtype),
                            pltpu.SemaphoreType.DMA((2,))]),
        compiler_params=pltpu.CompilerParams(
            # batch axis must stay "arbitrary": the manual double-buffer primes at
            # b == 0 and carries DMA state across consecutive batch steps.
            dimension_semantics=("parallel", "arbitrary"),
            vmem_limit_bytes=_VMEM_LIMIT),
    )(q, kv, bias)


# ----------------------------- Full layer forward -----------------------------

def na_transformer_layer(x, params, *, num_heads, kernel_size, dilation):
    B, H, W, C = x.shape
    N = B * H * W
    assert C % num_heads == 0
    hd = C // num_heads
    scale = hd ** -0.5            # qk_scale default
    bf16 = jnp.bfloat16

    x2d = x.reshape(N, C)

    # norm1 fused into qkv projection; producer splits q / kv (no transpose, no take)
    # and folds the qk scale into q.
    q2d, kv2d = ln_qkv(x2d, params["g1"], params["b1"],
                       params["qkv_w"].astype(bf16), params["qkv_b"],
                       q_scale=scale)

    meta = _natten_band_meta(H, W, kernel_size, dilation)
    bias = _band_bias(params["rpb"], meta)

    attn = natten_band_attention(q2d.reshape(B, H * W, C),
                                 kv2d.reshape(B, H * W, 2 * C),
                                 bias, meta, num_heads=num_heads)

    # output projection with the residual add fused into the epilogue
    x1 = gemm_residual(attn.reshape(N, C), params["proj_w"].astype(bf16),
                       params["proj_b"], x2d, out_dtype=x.dtype)

    # norm2 fused into fc1 (+ exact-erf GELU); fc2 fused with the residual add
    h1 = ln_gemm(x1, params["g2"], params["b2"], params["fc1_w"].astype(bf16),
                 params["fc1_b"], out_dtype=bf16, act="gelu")
    x2 = gemm_residual(h1, params["fc2_w"].astype(bf16), params["fc2_b"],
                       x1, out_dtype=x.dtype)

    # TODO(synk): dropout / attn-dropout / DropPath (p=0.0 defaults) are identity
    # in eval mode and are not implemented for training-mode parity.
    return x2.reshape(B, H, W, C)


# -------------------------------- Param init ----------------------------------

def init_params(key, dim, num_heads, kernel_size, mlp_ratio):
    hidden = int(dim * mlp_ratio)
    ks = jax.random.split(key, 5)

    def w(k, shape):
        return jax.random.normal(k, shape, jnp.float32) * 0.02

    return dict(
        g1=jnp.ones((dim,), jnp.float32), b1=jnp.zeros((dim,), jnp.float32),
        qkv_w=w(ks[0], (dim, 3 * dim)), qkv_b=jnp.zeros((3 * dim,), jnp.float32),
        rpb=w(ks[1], (num_heads, 2 * kernel_size - 1, 2 * kernel_size - 1)),
        proj_w=w(ks[2], (dim, dim)), proj_b=jnp.zeros((dim,), jnp.float32),
        g2=jnp.ones((dim,), jnp.float32), b2=jnp.zeros((dim,), jnp.float32),
        fc1_w=w(ks[3], (dim, hidden)), fc1_b=jnp.zeros((hidden,), jnp.float32),
        fc2_w=w(ks[4], (hidden, dim)), fc2_b=jnp.zeros((dim,), jnp.float32),
    )


if __name__ == "__main__":
    B, H, W, dim = 2, 8, 8, 32
    num_heads, kernel_size, dilation, mlp_ratio = 4, 3, 1, 4.0

    key = jax.random.PRNGKey(0)
    kx, kp = jax.random.split(key)
    x = jax.random.normal(kx, (B, H, W, dim), jnp.float32)
    params = init_params(kp, dim, num_heads, kernel_size, mlp_ratio)

    fwd = jax.jit(functools.partial(na_transformer_layer, num_heads=num_heads,
                                    kernel_size=kernel_size, dilation=dilation))
    out = jax.block_until_ready(fwd(x, params))
    assert out.shape == x.shape
    assert bool(jnp.all(jnp.isfinite(out)))
    print("KERNEL_OK")
</pallas_src>

<mosaic_0001>
module attributes {stable_mosaic.version = 11 : i64} {
  func.func @_ln_qkv_kernel(%arg0: i32, %arg1: memref<128x32xf32, #tpu.memory_space<vmem>>, %arg2: memref<1x32xf32, #tpu.memory_space<vmem>>, %arg3: memref<1x32xf32, #tpu.memory_space<vmem>>, %arg4: memref<32x96xbf16, #tpu.memory_space<vmem>>, %arg5: memref<1x96xf32, #tpu.memory_space<vmem>>, %arg6: memref<128x32xbf16, #tpu.memory_space<vmem>>, %arg7: memref<128x64xbf16, #tpu.memory_space<vmem>>) attributes {dimension_semantics = [#tpu.dimension_semantics<parallel>], iteration_bounds = array<i64: 1>, scalar_prefetch = 0 : i64, scratch_operands = 0 : i64, tpu.core_type = #tpu.core_type<tc>, window_params = [{transform_indices = @transform_0, window_bounds = array<i64: 128, 32>}, {pipeline_mode = #tpu.pipeline_mode<synchronous>, transform_indices = @transform_1, window_bounds = array<i64: 1, 32>}, {pipeline_mode = #tpu.pipeline_mode<synchronous>, transform_indices = @transform_2, window_bounds = array<i64: 1, 32>}, {pipeline_mode = #tpu.pipeline_mode<synchronous>, transform_indices = @transform_3, window_bounds = array<i64: 32, 96>}, {pipeline_mode = #tpu.pipeline_mode<synchronous>, transform_indices = @transform_4, window_bounds = array<i64: 1, 96>}, {transform_indices = @transform_5, window_bounds = array<i64: 128, 32>}, {transform_indices = @transform_6, window_bounds = array<i64: 128, 64>}]} {
    %c0 = arith.constant 0 : index
    %c0_0 = arith.constant 0 : index
    %0 = vector.load %arg1[%c0, %c0_0] : memref<128x32xf32, #tpu.memory_space<vmem>>, vector<128x32xf32>
    %cst = arith.constant dense<0.000000e+00> : vector<128xf32>
    %1 = vector.multi_reduction <add>, %0, %cst [1] : vector<128x32xf32> to vector<128xf32>
    %2 = vector.shape_cast %1 : vector<128xf32> to vector<128x1xf32>
    %cst_1 = arith.constant 3.200000e+01 : f32
    %3 = vector.broadcast %cst_1 : f32 to vector<128x1xf32>
    %4 = arith.divf %2, %3 : vector<128x1xf32>
    %5 = vector.broadcast %4 : vector<128x1xf32> to vector<128x32xf32>
    %6 = arith.subf %0, %5 : vector<128x32xf32>
    %7 = arith.mulf %6, %6 : vector<128x32xf32>
    %cst_2 = arith.constant dense<0.000000e+00> : vector<128xf32>
    %8 = vector.multi_reduction <add>, %7, %cst_2 [1] : vector<128x32xf32> to vector<128xf32>
    %9 = vector.shape_cast %8 : vector<128xf32> to vector<128x1xf32>
    %cst_3 = arith.constant 3.200000e+01 : f32
    %10 = vector.broadcast %cst_3 : f32 to vector<128x1xf32>
    %11 = arith.divf %9, %10 : vector<128x1xf32>
    %12 = vector.broadcast %4 : vector<128x1xf32> to vector<128x32xf32>
    %13 = arith.subf %0, %12 : vector<128x32xf32>
    %cst_4 = arith.constant 9.99999974E-6 : f32
    %14 = vector.broadcast %cst_4 : f32 to vector<128x1xf32>
    %15 = arith.addf %11, %14 : vector<128x1xf32>
    %16 = math.rsqrt %15 : vector<128x1xf32>
    %17 = vector.broadcast %16 : vector<128x1xf32> to vector<128x32xf32>
    %18 = arith.mulf %13, %17 : vector<128x32xf32>
    %c0_5 = arith.constant 0 : index
    %c0_6 = arith.constant 0 : index
    %19 = vector.load %arg2[%c0_5, %c0_6] : memref<1x32xf32, #tpu.memory_space<vmem>>, vector<1x32xf32>
    %20 = vector.broadcast %19 : vector<1x32xf32> to vector<128x32xf32>
    %21 = arith.mulf %18, %20 : vector<128x32xf32>
    %c0_7 = arith.constant 0 : index
    %c0_8 = arith.constant 0 : index
    %22 = vector.load %arg3[%c0_7, %c0_8] : memref<1x32xf32, #tpu.memory_space<vmem>>, vector<1x32xf32>
    %23 = vector.broadcast %22 : vector<1x32xf32> to vector<128x32xf32>
    %24 = arith.addf %21, %23 : vector<128x32xf32>
    %25 = arith.truncf %24 : vector<128x32xf32> to vector<128x32xbf16>
    %c0_9 = arith.constant 0 : index
    %c0_10 = arith.constant 0 : index
    %26 = vector.load %arg4[%c0_9, %c0_10] : memref<32x96xbf16, #tpu.memory_space<vmem>>, vector<32x96xbf16>
    %cst_11 = arith.constant dense<0.000000e+00> : vector<128x96xf32>
    %27 = tpu.matmul %25, %26, %cst_11 {dimension_numbers = #tpu.dot_dimension_numbers<[1], [0], [0], [1], [0, 0, 1, 1], [], []>} : vector<128x32xbf16>, vector<32x96xbf16>, vector<128x96xf32> -> vector<128x96xf32>
    %c0_12 = arith.constant 0 : index
    %c0_13 = arith.constant 0 : index
    %28 = vector.load %arg5[%c0_12, %c0_13] : memref<1x96xf32, #tpu.memory_space<vmem>>, vector<1x96xf32>
    %29 = vector.broadcast %28 : vector<1x96xf32> to vector<128x96xf32>
    %30 = arith.addf %27, %29 : vector<128x96xf32>
    %31 = vector.extract_strided_slice %30 {offsets = [0, 0], sizes = [128, 32], strides = [1, 1]} : vector<128x96xf32> to vector<128x32xf32>
    %cst_14 = arith.constant 0.353553385 : f32
    %32 = vector.broadcast %cst_14 : f32 to vector<128x32xf32>
    %33 = arith.mulf %31, %32 : vector<128x32xf32>
    %34 = arith.truncf %33 : vector<128x32xf32> to vector<128x32xbf16>
    %c0_15 = arith.constant 0 : index
    %c0_16 = arith.constant 0 : index
    %35 = vector.load %arg6[%c0_15, %c0_16] : memref<128x32xbf16, #tpu.memory_space<vmem>>, vector<128x32xbf16>
    tpu.vector_store %arg6[%c0_15, %c0_16], %34 {strides = array<i32>} : memref<128x32xbf16, #tpu.memory_space<vmem>>, vector<128x32xbf16>,
    %36 = vector.extract_strided_slice %30 {offsets = [0, 32], sizes = [128, 64], strides = [1, 1]} : vector<128x96xf32> to vector<128x64xf32>
    %37 = arith.truncf %36 : vector<128x64xf32> to vector<128x64xbf16>
    %c0_17 = arith.constant 0 : index
    %c0_18 = arith.constant 0 : index
    %38 = vector.load %arg7[%c0_17, %c0_18] : memref<128x64xbf16, #tpu.memory_space<vmem>>, vector<128x64xbf16>
    tpu.vector_store %arg7[%c0_17, %c0_18], %37 {strides = array<i32>} : memref<128x64xbf16, #tpu.memory_space<vmem>>, vector<128x64xbf16>,
    return
  }
  func.func @transform_0(%arg0: i32) -> (i32, i32) {
    %c0_i32 = arith.constant 0 : i32
    %c0_i32_0 = arith.constant 0 : i32
    return %arg0, %c0_i32 : i32, i32
  }
  func.func @transform_1(%arg0: i32) -> (i32, i32) {
    %c0_i32 = arith.constant 0 : i32
    %c0_i32_0 = arith.constant 0 : i32
    %c0_i32_1 = arith.constant 0 : i32
    return %c0_i32, %c0_i32_0 : i32, i32
  }
  func.func @transform_2(%arg0: i32) -> (i32, i32) {
    %c0_i32 = arith.constant 0 : i32
    %c0_i32_0 = arith.constant 0 : i32
    %c0_i32_1 = arith.constant 0 : i32
    return %c0_i32, %c0_i32_0 : i32, i32
  }
  func.func @transform_3(%arg0: i32) -> (i32, i32) {
    %c0_i32 = arith.constant 0 : i32
    %c0_i32_0 = arith.constant 0 : i32
    %c0_i32_1 = arith.constant 0 : i32
    return %c0_i32, %c0_i32_0 : i32, i32
  }
  func.func @transform_4(%arg0: i32) -> (i32, i32) {
    %c0_i32 = arith.constant 0 : i32
    %c0_i32_0 = arith.constant 0 : i32
    %c0_i32_1 = arith.constant 0 : i32
    return %c0_i32, %c0_i32_0 : i32, i32
  }
  func.func @transform_5(%arg0: i32) -> (i32, i32) {
    %c0_i32 = arith.constant 0 : i32
    %c0_i32_0 = arith.constant 0 : i32
    return %arg0, %c0_i32 : i32, i32
  }
  func.func @transform_6(%arg0: i32) -> (i32, i32) {
    %c0_i32 = arith.constant 0 : i32
    %c0_i32_0 = arith.constant 0 : i32
    return %arg0, %c0_i32 : i32, i32
  }
}

module attributes {stable_mosaic.version = 11 : i64} {
  func.func @_natten_band_kernel(%arg0: i32, %arg1: i32, %arg2: memref<1x64x32xbf16, #tpu.memory_space<vmem>>, %arg3: memref<2x64x64xbf16, #tpu.memory_space<any>>, %arg4: memref<1x4x64x64xf32, #tpu.memory_space<vmem>>, %arg5: memref<1x64x32xbf16, #tpu.memory_space<vmem>>, %arg6: memref<2x64x64xbf16, #tpu.memory_space<vmem>>, %arg7: memref<2x!tpu.dma_semaphore, #tpu.memory_space<semaphore_mem>>) attributes {dimension_semantics = [#tpu.dimension_semantics<parallel>, #tpu.dimension_semantics<arbitrary>], iteration_bounds = array<i64: 1, 2>, scalar_prefetch = 0 : i64, scratch_operands = 2 : i64, tpu.core_type = #tpu.core_type<tc>, window_params = [{transform_indices = @transform_0, window_bounds = array<i64: 1, 64, 32>}, {}, {transform_indices = @transform_2, window_bounds = array<i64: 1, 4, 64, 64>}, {transform_indices = @transform_3, window_bounds = array<i64: 1, 64, 32>}]} {
    %c8_i32 = arith.constant 8 : i32
    %0 = arith.muli %arg0, %c8_i32 : i32
    %c2_i32 = arith.constant 2 : i32
    %1 = arith.subi %0, %c2_i32 : i32
    %c0_i32 = arith.constant 0 : i32
    %c0_i32_0 = arith.constant 0 : i32
    %2 = arith.maxsi %c0_i32, %1 : i32
    %3 = arith.minsi %c0_i32_0, %2 : i32
    %c8_i32_1 = arith.constant 8 : i32
    %4 = arith.muli %3, %c8_i32_1 : i32
    %c1_i32 = arith.constant 1 : i32
    %5 = arith.andi %arg1, %c1_i32 : i32
    %c0_i32_2 = arith.constant 0 : i32
    %6 = arith.cmpi eq, %arg1, %c0_i32_2 : i32
    %7 = arith.extui %6 : i1 to i32
    %c0_i32_3 = arith.constant 0 : i32
    %8 = arith.cmpi ne, %7, %c0_i32_3 : i32
    scf.if %8 {
      %c0_i32_45 = arith.constant 0 : i32
      %105 = tpu.memref_slice %arg3[%arg1, %4, %c0_i32_45] : memref<2x64x64xbf16, #tpu.memory_space<any>> -> memref<1x64x64xbf16, #tpu.memory_space<any>>
      %106 = tpu.memref_squeeze %105 : memref<1x64x64xbf16, #tpu.memory_space<any>> -> memref<64x64xbf16, #tpu.memory_space<any>>
      %c0_i32_46 = arith.constant 0 : i32
      %c0_i32_47 = arith.constant 0 : i32
      %107 = tpu.memref_slice %arg6[%5, %c0_i32_46, %c0_i32_47] : memref<2x64x64xbf16, #tpu.memory_space<vmem>> -> memref<1x64x64xbf16, #tpu.memory_space<vmem>>
      %108 = tpu.memref_squeeze %107 : memref<1x64x64xbf16, #tpu.memory_space<vmem>> -> memref<64x64xbf16, #tpu.memory_space<vmem>>
      %109 = tpu.memref_slice %arg7[%5] : memref<2x!tpu.dma_semaphore, #tpu.memory_space<semaphore_mem>> -> memref<1x!tpu.dma_semaphore, #tpu.memory_space<semaphore_mem>>
      %110 = tpu.memref_squeeze %109 : memref<1x!tpu.dma_semaphore, #tpu.memory_space<semaphore_mem>> -> memref<!tpu.dma_semaphore, #tpu.memory_space<semaphore_mem>>
      tpu.enqueue_dma source(%106 : memref<64x64xbf16, #tpu.memory_space<any>>) target(%108 : memref<64x64xbf16, #tpu.memory_space<vmem>>) target_semaphore(%110 : memref<!tpu.dma_semaphore, #tpu.memory_space<semaphore_mem>>)
    } else {
    }
    %c1_i32_4 = arith.constant 1 : i32
    %9 = arith.addi %arg1, %c1_i32_4 : i32
    %c2_i32_5 = arith.constant 2 : i32
    %10 = arith.cmpi slt, %9, %c2_i32_5 : i32
    %11 = arith.extui %10 : i1 to i32
    %c0_i32_6 = arith.constant 0 : i32
    %12 = arith.cmpi ne, %11, %c0_i32_6 : i32
    scf.if %12 {
      %c1_i32_45 = arith.constant 1 : i32
      %105 = arith.addi %arg1, %c1_i32_45 : i32
      %c1_i32_46 = arith.constant 1 : i32
      %106 = arith.subi %c1_i32_46, %5 : i32
      %c0_i32_47 = arith.constant 0 : i32
      %107 = tpu.memref_slice %arg3[%105, %4, %c0_i32_47] : memref<2x64x64xbf16, #tpu.memory_space<any>> -> memref<1x64x64xbf16, #tpu.memory_space<any>>
      %108 = tpu.memref_squeeze %107 : memref<1x64x64xbf16, #tpu.memory_space<any>> -> memref<64x64xbf16, #tpu.memory_space<any>>
      %c0_i32_48 = arith.constant 0 : i32
      %c0_i32_49 = arith.constant 0 : i32
      %109 = tpu.memref_slice %arg6[%106, %c0_i32_48, %c0_i32_49] : memref<2x64x64xbf16, #tpu.memory_space<vmem>> -> memref<1x64x64xbf16, #tpu.memory_space<vmem>>
      %110 = tpu.memref_squeeze %109 : memref<1x64x64xbf16, #tpu.memory_space<vmem>> -> memref<64x64xbf16, #tpu.memory_space<vmem>>
      %111 = tpu.memref_slice %arg7[%106] : memref<2x!tpu.dma_semaphore, #tpu.memory_space<semaphore_mem>> -> memref<1x!tpu.dma_semaphore, #tpu.memory_space<semaphore_mem>>
      %112 = tpu.memref_squeeze %111 : memref<1x!tpu.dma_semaphore, #tpu.memory_space<semaphore_mem>> -> memref<!tpu.dma_semaphore, #tpu.memory_space<semaphore_mem>>
      tpu.enqueue_dma source(%108 : memref<64x64xbf16, #tpu.memory_space<any>>) target(%110 : memref<64x64xbf16, #tpu.memory_space<vmem>>) target_semaphore(%112 : memref<!tpu.dma_semaphore, #tpu.memory_space<semaphore_mem>>)
    } else {
    }
    %c0_i32_7 = arith.constant 0 : i32
    %13 = tpu.memref_slice %arg3[%arg1, %4, %c0_i32_7] : memref<2x64x64xbf16, #tpu.memory_space<any>> -> memref<1x64x64xbf16, #tpu.memory_space<any>>
    %14 = tpu.memref_squeeze %13 : memref<1x64x64xbf16, #tpu.memory_space<any>> -> memref<64x64xbf16, #tpu.memory_space<any>>
    %c0_i32_8 = arith.constant 0 : i32
    %c0_i32_9 = arith.constant 0 : i32
    %15 = tpu.memref_slice %arg6[%5, %c0_i32_8, %c0_i32_9] : memref<2x64x64xbf16, #tpu.memory_space<vmem>> -> memref<1x64x64xbf16, #tpu.memory_space<vmem>>
    %16 = tpu.memref_squeeze %15 : memref<1x64x64xbf16, #tpu.memory_space<vmem>> -> memref<64x64xbf16, #tpu.memory_space<vmem>>
    %17 = tpu.memref_slice %arg7[%5] : memref<2x!tpu.dma_semaphore, #tpu.memory_space<semaphore_mem>> -> memref<1x!tpu.dma_semaphore, #tpu.memory_space<semaphore_mem>>
    %18 = tpu.memref_squeeze %17 : memref<1x!tpu.dma_semaphore, #tpu.memory_space<semaphore_mem>> -> memref<!tpu.dma_semaphore, #tpu.memory_space<semaphore_mem>>
    tpu.wait_dma2 semaphore(%18 : memref<!tpu.dma_semaphore, #tpu.memory_space<semaphore_mem>>) src(%14 : memref<64x64xbf16, #tpu.memory_space<any>>) dst(%16 : memref<64x64xbf16, #tpu.memory_space<vmem>>)
    %c0 = arith.constant 0 : index
    %c0_10 = arith.constant 0 : index
    %c0_11 = arith.constant 0 : index
    %19 = vector.load %arg2[%c0, %c0_10, %c0_11] : memref<1x64x32xbf16, #tpu.memory_space<vmem>>, vector<1x64x32xbf16>
    %20 = vector.shape_cast %19 : vector<1x64x32xbf16> to vector<64x32xbf16>
    %21 = arith.index_cast %5 : i32 to index
    %c0_12 = arith.constant 0 : index
    %c0_13 = arith.constant 0 : index
    %22 = vector.load %arg6[%21, %c0_12, %c0_13] : memref<2x64x64xbf16, #tpu.memory_space<vmem>>, vector<1x64x64xbf16>
    %23 = vector.shape_cast %22 : vector<1x64x64xbf16> to vector<64x64xbf16>
    %24 = vector.extract_strided_slice %20 {offsets = [0, 0], sizes = [64, 8], strides = [1, 1]} : vector<64x32xbf16> to vector<64x8xbf16>
    %25 = vector.extract_strided_slice %23 {offsets = [0, 0], sizes = [64, 8], strides = [1, 1]} : vector<64x64xbf16> to vector<64x8xbf16>
    %26 = vector.extract_strided_slice %23 {offsets = [0, 32], sizes = [64, 8], strides = [1, 1]} : vector<64x64xbf16> to vector<64x8xbf16>
    %cst = arith.constant dense<0.000000e+00> : vector<64x64xf32>
    %27 = tpu.matmul %24, %25, %cst {dimension_numbers = #tpu.dot_dimension_numbers<[1], [1], [0], [0], [0, 0, 1, 0], [], []>} : vector<64x8xbf16>, vector<64x8xbf16>, vector<64x64xf32> -> vector<64x64xf32>
    %c0_14 = arith.constant 0 : index
    %c0_15 = arith.constant 0 : index
    %c0_16 = arith.constant 0 : index
    %c0_17 = arith.constant 0 : index
    %28 = vector.load %arg4[%c0_14, %c0_15, %c0_16, %c0_17] : memref<1x4x64x64xf32, #tpu.memory_space<vmem>>, vector<1x1x64x64xf32>
    %29 = vector.shape_cast %28 : vector<1x1x64x64xf32> to vector<64x64xf32>
    %30 = arith.addf %27, %29 : vector<64x64xf32>
    %cst_18 = arith.constant dense<0xFF800000> : vector<64xf32>
    %31 = vector.multi_reduction <maximumf>, %30, %cst_18 [1] : vector<64x64xf32> to vector<64xf32>
    %32 = vector.shape_cast %31 : vector<64xf32> to vector<64x1xf32>
    %33 = vector.broadcast %32 : vector<64x1xf32> to vector<64x64xf32>
    %34 = arith.subf %30, %33 : vector<64x64xf32>
    %35 = math.exp %34 : vector<64x64xf32>
    %cst_19 = arith.constant dense<0.000000e+00> : vector<64xf32>
    %36 = vector.multi_reduction <add>, %35, %cst_19 [1] : vector<64x64xf32> to vector<64xf32>
    %37 = vector.shape_cast %36 : vector<64xf32> to vector<64x1xf32>
    %38 = tpu.reciprocal %37 {approx = true} : vector<64x1xf32> -> vector<64x1xf32>
    %39 = vector.broadcast %38 : vector<64x1xf32> to vector<64x64xf32>
    %40 = arith.mulf %35, %39 : vector<64x64xf32>
    %41 = arith.truncf %40 : vector<64x64xf32> to vector<64x64xbf16>
    %cst_20 = arith.constant dense<0.000000e+00> : vector<64x8xf32>
    %42 = tpu.matmul %41, %26, %cst_20 {dimension_numbers = #tpu.dot_dimension_numbers<[1], [0], [0], [1], [0, 0, 1, 1], [], []>} : vector<64x64xbf16>, vector<64x8xbf16>, vector<64x8xf32> -> vector<64x8xf32>
    %43 = vector.extract_strided_slice %20 {offsets = [0, 8], sizes = [64, 8], strides = [1, 1]} : vector<64x32xbf16> to vector<64x8xbf16>
    %44 = vector.extract_strided_slice %23 {offsets = [0, 8], sizes = [64, 8], strides = [1, 1]} : vector<64x64xbf16> to vector<64x8xbf16>
    %45 = vector.extract_strided_slice %23 {offsets = [0, 40], sizes = [64, 8], strides = [1, 1]} : vector<64x64xbf16> to vector<64x8xbf16>
    %cst_21 = arith.constant dense<0.000000e+00> : vector<64x64xf32>
    %46 = tpu.matmul %43, %44, %cst_21 {dimension_numbers = #tpu.dot_dimension_numbers<[1], [1], [0], [0], [0, 0, 1, 0], [], []>} : vector<64x8xbf16>, vector<64x8xbf16>, vector<64x64xf32> -> vector<64x64xf32>
    %c0_22 = arith.constant 0 : index
    %c1 = arith.constant 1 : index
    %c0_23 = arith.constant 0 : index
    %c0_24 = arith.constant 0 : index
    %47 = vector.load %arg4[%c0_22, %c1, %c0_23, %c0_24] : memref<1x4x64x64xf32, #tpu.memory_space<vmem>>, vector<1x1x64x64xf32>
    %48 = vector.shape_cast %47 : vector<1x1x64x64xf32> to vector<64x64xf32>
    %49 = arith.addf %46, %48 : vector<64x64xf32>
    %cst_25 = arith.constant dense<0xFF800000> : vector<64xf32>
    %50 = vector.multi_reduction <maximumf>, %49, %cst_25 [1] : vector<64x64xf32> to vector<64xf32>
    %51 = vector.shape_cast %50 : vector<64xf32> to vector<64x1xf32>
    %52 = vector.broadcast %51 : vector<64x1xf32> to vector<64x64xf32>
    %53 = arith.subf %49, %52 : vector<64x64xf32>
    %54 = math.exp %53 : vector<64x64xf32>
    %cst_26 = arith.constant dense<0.000000e+00> : vector<64xf32>
    %55 = vector.multi_reduction <add>, %54, %cst_26 [1] : vector<64x64xf32> to vector<64xf32>
    %56 = vector.shape_cast %55 : vector<64xf32> to vector<64x1xf32>
    %57 = tpu.reciprocal %56 {approx = true} : vector<64x1xf32> -> vector<64x1xf32>
    %58 = vector.broadcast %57 : vector<64x1xf32> to vector<64x64xf32>
    %59 = arith.mulf %54, %58 : vector<64x64xf32>
    %60 = arith.truncf %59 : vector<64x64xf32> to vector<64x64xbf16>
    %cst_27 = arith.constant dense<0.000000e+00> : vector<64x8xf32>
    %61 = tpu.matmul %60, %45, %cst_27 {dimension_numbers = #tpu.dot_dimension_numbers<[1], [0], [0], [1], [0, 0, 1, 1], [], []>} : vector<64x64xbf16>, vector<64x8xbf16>, vector<64x8xf32> -> vector<64x8xf32>
    %62 = vector.extract_strided_slice %20 {offsets = [0, 16], sizes = [64, 8], strides = [1, 1]} : vector<64x32xbf16> to vector<64x8xbf16>
    %63 = vector.extract_strided_slice %23 {offsets = [0, 16], sizes = [64, 8], strides = [1, 1]} : vector<64x64xbf16> to vector<64x8xbf16>
    %64 = vector.extract_strided_slice %23 {offsets = [0, 48], sizes = [64, 8], strides = [1, 1]} : vector<64x64xbf16> to vector<64x8xbf16>
    %cst_28 = arith.constant dense<0.000000e+00> : vector<64x64xf32>
    %65 = tpu.matmul %62, %63, %cst_28 {dimension_numbers = #tpu.dot_dimension_numbers<[1], [1], [0], [0], [0, 0, 1, 0], [], []>} : vector<64x8xbf16>, vector<64x8xbf16>, vector<64x64xf32> -> vector<64x64xf32>
    %c0_29 = arith.constant 0 : index
    %c2 = arith.constant 2 : index
    %c0_30 = arith.constant 0 : index
    %c0_31 = arith.constant 0 : index
    %66 = vector.load %arg4[%c0_29, %c2, %c0_30, %c0_31] : memref<1x4x64x64xf32, #tpu.memory_space<vmem>>, vector<1x1x64x64xf32>
    %67 = vector.shape_cast %66 : vector<1x1x64x64xf32> to vector<64x64xf32>
    %68 = arith.addf %65, %67 : vector<64x64xf32>
    %cst_32 = arith.constant dense<0xFF800000> : vector<64xf32>
    %69 = vector.multi_reduction <maximumf>, %68, %cst_32 [1] : vector<64x64xf32> to vector<64xf32>
    %70 = vector.shape_cast %69 : vector<64xf32> to vector<64x1xf32>
    %71 = vector.broadcast %70 : vector<64x1xf32> to vector<64x64xf32>
    %72 = arith.subf %68, %71 : vector<64x64xf32>
    %73 = math.exp %72 : vector<64x64xf32>
    %cst_33 = arith.constant dense<0.000000e+00> : vector<64xf32>
    %74 = vector.multi_reduction <add>, %73, %cst_33 [1] : vector<64x64xf32> to vector<64xf32>
    %75 = vector.shape_cast %74 : vector<64xf32> to vector<64x1xf32>
    %76 = tpu.reciprocal %75 {approx = true} : vector<64x1xf32> -> vector<64x1xf32>
    %77 = vector.broadcast %76 : vector<64x1xf32> to vector<64x64xf32>
    %78 = arith.mulf %73, %77 : vector<64x64xf32>
    %79 = arith.truncf %78 : vector<64x64xf32> to vector<64x64xbf16>
    %cst_34 = arith.constant dense<0.000000e+00> : vector<64x8xf32>
    %80 = tpu.matmul %79, %64, %cst_34 {dimension_numbers = #tpu.dot_dimension_numbers<[1], [0], [0], [1], [0, 0, 1, 1], [], []>} : vector<64x64xbf16>, vector<64x8xbf16>, vector<64x8xf32> -> vector<64x8xf32>
    %81 = vector.extract_strided_slice %20 {offsets = [0, 24], sizes = [64, 8], strides = [1, 1]} : vector<64x32xbf16> to vector<64x8xbf16>
    %82 = vector.extract_strided_slice %23 {offsets = [0, 24], sizes = [64, 8], strides = [1, 1]} : vector<64x64xbf16> to vector<64x8xbf16>
    %83 = vector.extract_strided_slice %23 {offsets = [0, 56], sizes = [64, 8], strides = [1, 1]} : vector<64x64xbf16> to vector<64x8xbf16>
    %cst_35 = arith.constant dense<0.000000e+00> : vector<64x64xf32>
    %84 = tpu.matmul %81, %82, %cst_35 {dimension_numbers = #tpu.dot_dimension_numbers<[1], [1], [0], [0], [0, 0, 1, 0], [], []>} : vector<64x8xbf16>, vector<64x8xbf16>, vector<64x64xf32> -> vector<64x64xf32>
    %c0_36 = arith.constant 0 : index
    %c3 = arith.constant 3 : index
    %c0_37 = arith.constant 0 : index
    %c0_38 = arith.constant 0 : index
    %85 = vector.load %arg4[%c0_36, %c3, %c0_37, %c0_38] : memref<1x4x64x64xf32, #tpu.memory_space<vmem>>, vector<1x1x64x64xf32>
    %86 = vector.shape_cast %85 : vector<1x1x64x64xf32> to vector<64x64xf32>
    %87 = arith.addf %84, %86 : vector<64x64xf32>
    %cst_39 = arith.constant dense<0xFF800000> : vector<64xf32>
    %88 = vector.multi_reduction <maximumf>, %87, %cst_39 [1] : vector<64x64xf32> to vector<64xf32>
    %89 = vector.shape_cast %88 : vector<64xf32> to vector<64x1xf32>
    %90 = vector.broadcast %89 : vector<64x1xf32> to vector<64x64xf32>
    %91 = arith.subf %87, %90 : vector<64x64xf32>
    %92 = math.exp %91 : vector<64x64xf32>
    %cst_40 = arith.constant dense<0.000000e+00> : vector<64xf32>
    %93 = vector.multi_reduction <add>, %92, %cst_40 [1] : vector<64x64xf32> to vector<64xf32>
    %94 = vector.shape_cast %93 : vector<64xf32> to vector<64x1xf32>
    %95 = tpu.reciprocal %94 {approx = true} : vector<64x1xf32> -> vector<64x1xf32>
    %96 = vector.broadcast %95 : vector<64x1xf32> to vector<64x64xf32>
    %97 = arith.mulf %92, %96 : vector<64x64xf32>
    %98 = arith.truncf %97 : vector<64x64xf32> to vector<64x64xbf16>
    %cst_41 = arith.constant dense<0.000000e+00> : vector<64x8xf32>
    %99 = tpu.matmul %98, %83, %cst_41 {dimension_numbers = #tpu.dot_dimension_numbers<[1], [0], [0], [1], [0, 0, 1, 1], [], []>} : vector<64x64xbf16>, vector<64x8xbf16>, vector<64x8xf32> -> vector<64x8xf32>
    %100 = tpu.concatenate %42, %61, %80, %99 in 1 : vector<64x8xf32>, vector<64x8xf32>, vector<64x8xf32>, vector<64x8xf32> -> vector<64x32xf32>
    %101 = arith.truncf %100 : vector<64x32xf32> to vector<64x32xbf16>
    %c0_42 = arith.constant 0 : index
    %c0_43 = arith.constant 0 : index
    %c0_44 = arith.constant 0 : index
    %102 = vector.load %arg5[%c0_42, %c0_43, %c0_44] : memref<1x64x32xbf16, #tpu.memory_space<vmem>>, vector<1x64x32xbf16>
    %103 = vector.shape_cast %102 : vector<1x64x32xbf16> to vector<64x32xbf16>
    %104 = vector.shape_cast %101 : vector<64x32xbf16> to vector<1x64x32xbf16>
    tpu.vector_store %arg5[%c0_42, %c0_43, %c0_44], %104 {strides = array<i32>} : memref<1x64x32xbf16, #tpu.memory_space<vmem>>, vector<1x64x32xbf16>,
    return
  }
  func.func @transform_0(%arg0: i32, %arg1: i32) -> (i32, i32, i32) {
    %c0_i32 = arith.constant 0 : i32
    %c0_i32_0 = arith.constant 0 : i32
    return %arg1, %arg0, %c0_i32 : i32, i32, i32
  }
  func.func @transform_2(%arg0: i32, %arg1: i32) -> (i32, i32, i32, i32) {
    %c0_i32 = arith.constant 0 : i32
    %c0_i32_0 = arith.constant 0 : i32
    %c0_i32_1 = arith.constant 0 : i32
    %c0_i32_2 = arith.constant 0 : i32
    return %arg0, %c0_i32, %c0_i32_0, %c0_i32_1 : i32, i32, i32, i32
  }
  func.func @transform_3(%arg0: i32, %arg1: i32) -> (i32, i32, i32) {
    %c0_i32 = arith.constant 0 : i32
    %c0_i32_0 = arith.constant 0 : i32
    return %arg1, %arg0, %c0_i32 : i32, i32, i32
  }
}

module attributes {stable_mosaic.version = 11 : i64} {
  func.func @_gemm_residual_kernel(%arg0: i32, %arg1: memref<128x32xbf16, #tpu.memory_space<vmem>>, %arg2: memref<32x32xbf16, #tpu.memory_space<vmem>>, %arg3: memref<1x32xf32, #tpu.memory_space<vmem>>, %arg4: memref<128x32xf32, #tpu.memory_space<vmem>>, %arg5: memref<128x32xf32, #tpu.memory_space<vmem>>) attributes {dimension_semantics = [#tpu.dimension_semantics<parallel>], iteration_bounds = array<i64: 1>, scalar_prefetch = 0 : i64, scratch_operands = 0 : i64, tpu.core_type = #tpu.core_type<tc>, window_params = [{transform_indices = @transform_0, window_bounds = array<i64: 128, 32>}, {pipeline_mode = #tpu.pipeline_mode<synchronous>, transform_indices = @transform_1, window_bounds = array<i64: 32, 32>}, {pipeline_mode = #tpu.pipeline_mode<synchronous>, transform_indices = @transform_2, window_bounds = array<i64: 1, 32>}, {transform_indices = @transform_3, window_bounds = array<i64: 128, 32>}, {transform_indices = @transform_4, window_bounds = array<i64: 128, 32>}]} {
    %c0 = arith.constant 0 : index
    %c0_0 = arith.constant 0 : index
    %0 = vector.load %arg1[%c0, %c0_0] : memref<128x32xbf16, #tpu.memory_space<vmem>>, vector<128x32xbf16>
    %c0_1 = arith.constant 0 : index
    %c0_2 = arith.constant 0 : index
    %1 = vector.load %arg2[%c0_1, %c0_2] : memref<32x32xbf16, #tpu.memory_space<vmem>>, vector<32x32xbf16>
    %cst = arith.constant dense<0.000000e+00> : vector<128x32xf32>
    %2 = tpu.matmul %0, %1, %cst {dimension_numbers = #tpu.dot_dimension_numbers<[1], [0], [0], [1], [0, 0, 1, 1], [], []>} : vector<128x32xbf16>, vector<32x32xbf16>, vector<128x32xf32> -> vector<128x32xf32>
    %c0_3 = arith.constant 0 : index
    %c0_4 = arith.constant 0 : index
    %3 = vector.load %arg3[%c0_3, %c0_4] : memref<1x32xf32, #tpu.memory_space<vmem>>, vector<1x32xf32>
    %4 = vector.broadcast %3 : vector<1x32xf32> to vector<128x32xf32>
    %5 = arith.addf %2, %4 : vector<128x32xf32>
    %c0_5 = arith.constant 0 : index
    %c0_6 = arith.constant 0 : index
    %6 = vector.load %arg4[%c0_5, %c0_6] : memref<128x32xf32, #tpu.memory_space<vmem>>, vector<128x32xf32>
    %7 = arith.addf %5, %6 : vector<128x32xf32>
    %c0_7 = arith.constant 0 : index
    %c0_8 = arith.constant 0 : index
    %8 = vector.load %arg5[%c0_7, %c0_8] : memref<128x32xf32, #tpu.memory_space<vmem>>, vector<128x32xf32>
    tpu.vector_store %arg5[%c0_7, %c0_8], %7 {strides = array<i32>} : memref<128x32xf32, #tpu.memory_space<vmem>>, vector<128x32xf32>,
    return
  }
  func.func @transform_0(%arg0: i32) -> (i32, i32) {
    %c0_i32 = arith.constant 0 : i32
    %c0_i32_0 = arith.constant 0 : i32
    return %arg0, %c0_i32 : i32, i32
  }
  func.func @transform_1(%arg0: i32) -> (i32, i32) {
    %c0_i32 = arith.constant 0 : i32
    %c0_i32_0 = arith.constant 0 : i32
    %c0_i32_1 = arith.constant 0 : i32
    return %c0_i32, %c0_i32_0 : i32, i32
  }
  func.func @transform_2(%arg0: i32) -> (i32, i32) {
    %c0_i32 = arith.constant 0 : i32
    %c0_i32_0 = arith.constant 0 : i32
    %c0_i32_1 = arith.constant 0 : i32
    return %c0_i32, %c0_i32_0 : i32, i32
  }
  func.func @transform_3(%arg0: i32) -> (i32, i32) {
    %c0_i32 = arith.constant 0 : i32
    %c0_i32_0 = arith.constant 0 : i32
    return %arg0, %c0_i32 : i32, i32
  }
  func.func @transform_4(%arg0: i32) -> (i32, i32) {
    %c0_i32 = arith.constant 0 : i32
    %c0_i32_0 = arith.constant 0 : i32
    return %arg0, %c0_i32 : i32, i32
  }
}

module attributes {stable_mosaic.version = 11 : i64} {
  func.func @_gemm_residual_kernel(%arg0: i32, %arg1: memref<128x128xbf16, #tpu.memory_space<vmem>>, %arg2: memref<128x32xbf16, #tpu.memory_space<vmem>>, %arg3: memref<1x32xf32, #tpu.memory_space<vmem>>, %arg4: memref<128x32xf32, #tpu.memory_space<vmem>>, %arg5: memref<128x32xf32, #tpu.memory_space<vmem>>) attributes {dimension_semantics = [#tpu.dimension_semantics<parallel>], iteration_bounds = array<i64: 1>, scalar_prefetch = 0 : i64, scratch_operands = 0 : i64, tpu.core_type = #tpu.core_type<tc>, window_params = [{transform_indices = @transform_0, window_bounds = array<i64: 128, 128>}, {pipeline_mode = #tpu.pipeline_mode<synchronous>, transform_indices = @transform_1, window_bounds = array<i64: 128, 32>}, {pipeline_mode = #tpu.pipeline_mode<synchronous>, transform_indices = @transform_2, window_bounds = array<i64: 1, 32>}, {transform_indices = @transform_3, window_bounds = array<i64: 128, 32>}, {transform_indices = @transform_4, window_bounds = array<i64: 128, 32>}]} {
    %c0 = arith.constant 0 : index
    %c0_0 = arith.constant 0 : index
    %0 = vector.load %arg1[%c0, %c0_0] : memref<128x128xbf16, #tpu.memory_space<vmem>>, vector<128x128xbf16>
    %c0_1 = arith.constant 0 : index
    %c0_2 = arith.constant 0 : index
    %1 = vector.load %arg2[%c0_1, %c0_2] : memref<128x32xbf16, #tpu.memory_space<vmem>>, vector<128x32xbf16>
    %cst = arith.constant dense<0.000000e+00> : vector<128x32xf32>
    %2 = tpu.matmul %0, %1, %cst {dimension_numbers = #tpu.dot_dimension_numbers<[1], [0], [0], [1], [0, 0, 1, 1], [], []>} : vector<128x128xbf16>, vector<128x32xbf16>, vector<128x32xf32> -> vector<128x32xf32>
    %c0_3 = arith.constant 0 : index
    %c0_4 = arith.constant 0 : index
    %3 = vector.load %arg3[%c0_3, %c0_4] : memref<1x32xf32, #tpu.memory_space<vmem>>, vector<1x32xf32>
    %4 = vector.broadcast %3 : vector<1x32xf32> to vector<128x32xf32>
    %5 = arith.addf %2, %4 : vector<128x32xf32>
    %c0_5 = arith.constant 0 : index
    %c0_6 = arith.constant 0 : index
    %6 = vector.load %arg4[%c0_5, %c0_6] : memref<128x32xf32, #tpu.memory_space<vmem>>, vector<128x32xf32>
    %7 = arith.addf %5, %6 : vector<128x32xf32>
    %c0_7 = arith.constant 0 : index
    %c0_8 = arith.constant 0 : index
    %8 = vector.load %arg5[%c0_7, %c0_8] : memref<128x32xf32, #tpu.memory_space<vmem>>, vector<128x32xf32>
    tpu.vector_store %arg5[%c0_7, %c0_8], %7 {strides = array<i32>} : memref<128x32xf32, #tpu.memory_space<vmem>>, vector<128x32xf32>,
    return
  }
  func.func @transform_0(%arg0: i32) -> (i32, i32) {
    %c0_i32 = arith.constant 0 : i32
    %c0_i32_0 = arith.constant 0 : i32
    return %arg0, %c0_i32 : i32, i32
  }
  func.func @transform_1(%arg0: i32) -> (i32, i32) {
    %c0_i32 = arith.constant 0 : i32
    %c0_i32_0 = arith.constant 0 : i32
    %c0_i32_1 = arith.constant 0 : i32
    return %c0_i32, %c0_i32_0 : i32, i32
  }
  func.func @transform_2(%arg0: i32) -> (i32, i32) {
    %c0_i32 = arith.constant 0 : i32
    %c0_i32_0 = arith.constant 0 : i32
    %c0_i32_1 = arith.constant 0 : i32
    return %c0_i32, %c0_i32_0 : i32, i32
  }
  func.func @transform_3(%arg0: i32) -> (i32, i32) {
    %c0_i32 = arith.constant 0 : i32
    %c0_i32_0 = arith.constant 0 : i32
    return %arg0, %c0_i32 : i32, i32
  }
  func.func @transform_4(%arg0: i32) -> (i32, i32) {
    %c0_i32 = arith.constant 0 : i32
    %c0_i32_0 = arith.constant 0 : i32
    return %arg0, %c0_i32 : i32, i32
  }
}

module attributes {stable_mosaic.version = 11 : i64} {
  func.func @_ln_gemm_kernel(%arg0: i32, %arg1: memref<128x32xf32, #tpu.memory_space<vmem>>, %arg2: memref<1x32xf32, #tpu.memory_space<vmem>>, %arg3: memref<1x32xf32, #tpu.memory_space<vmem>>, %arg4: memref<32x128xbf16, #tpu.memory_space<vmem>>, %arg5: memref<1x128xf32, #tpu.memory_space<vmem>>, %arg6: memref<128x128xbf16, #tpu.memory_space<vmem>>) attributes {dimension_semantics = [#tpu.dimension_semantics<parallel>], iteration_bounds = array<i64: 1>, scalar_prefetch = 0 : i64, scratch_operands = 0 : i64, tpu.core_type = #tpu.core_type<tc>, window_params = [{transform_indices = @transform_0, window_bounds = array<i64: 128, 32>}, {pipeline_mode = #tpu.pipeline_mode<synchronous>, transform_indices = @transform_1, window_bounds = array<i64: 1, 32>}, {pipeline_mode = #tpu.pipeline_mode<synchronous>, transform_indices = @transform_2, window_bounds = array<i64: 1, 32>}, {pipeline_mode = #tpu.pipeline_mode<synchronous>, transform_indices = @transform_3, window_bounds = array<i64: 32, 128>}, {pipeline_mode = #tpu.pipeline_mode<synchronous>, transform_indices = @transform_4, window_bounds = array<i64: 1, 128>}, {transform_indices = @transform_5, window_bounds = array<i64: 128, 128>}]} {
    %c0 = arith.constant 0 : index
    %c0_0 = arith.constant 0 : index
    %0 = vector.load %arg1[%c0, %c0_0] : memref<128x32xf32, #tpu.memory_space<vmem>>, vector<128x32xf32>
    %cst = arith.constant dense<0.000000e+00> : vector<128xf32>
    %1 = vector.multi_reduction <add>, %0, %cst [1] : vector<128x32xf32> to vector<128xf32>
    %2 = vector.shape_cast %1 : vector<128xf32> to vector<128x1xf32>
    %cst_1 = arith.constant 3.200000e+01 : f32
    %3 = vector.broadcast %cst_1 : f32 to vector<128x1xf32>
    %4 = arith.divf %2, %3 : vector<128x1xf32>
    %5 = vector.broadcast %4 : vector<128x1xf32> to vector<128x32xf32>
    %6 = arith.subf %0, %5 : vector<128x32xf32>
    %7 = arith.mulf %6, %6 : vector<128x32xf32>
    %cst_2 = arith.constant dense<0.000000e+00> : vector<128xf32>
    %8 = vector.multi_reduction <add>, %7, %cst_2 [1] : vector<128x32xf32> to vector<128xf32>
    %9 = vector.shape_cast %8 : vector<128xf32> to vector<128x1xf32>
    %cst_3 = arith.constant 3.200000e+01 : f32
    %10 = vector.broadcast %cst_3 : f32 to vector<128x1xf32>
    %11 = arith.divf %9, %10 : vector<128x1xf32>
    %12 = vector.broadcast %4 : vector<128x1xf32> to vector<128x32xf32>
    %13 = arith.subf %0, %12 : vector<128x32xf32>
    %cst_4 = arith.constant 9.99999974E-6 : f32
    %14 = vector.broadcast %cst_4 : f32 to vector<128x1xf32>
    %15 = arith.addf %11, %14 : vector<128x1xf32>
    %16 = math.rsqrt %15 : vector<128x1xf32>
    %17 = vector.broadcast %16 : vector<128x1xf32> to vector<128x32xf32>
    %18 = arith.mulf %13, %17 : vector<128x32xf32>
    %c0_5 = arith.constant 0 : index
    %c0_6 = arith.constant 0 : index
    %19 = vector.load %arg2[%c0_5, %c0_6] : memref<1x32xf32, #tpu.memory_space<vmem>>, vector<1x32xf32>
    %20 = vector.broadcast %19 : vector<1x32xf32> to vector<128x32xf32>
    %21 = arith.mulf %18, %20 : vector<128x32xf32>
    %c0_7 = arith.constant 0 : index
    %c0_8 = arith.constant 0 : index
    %22 = vector.load %arg3[%c0_7, %c0_8] : memref<1x32xf32, #tpu.memory_space<vmem>>, vector<1x32xf32>
    %23 = vector.broadcast %22 : vector<1x32xf32> to vector<128x32xf32>
    %24 = arith.addf %21, %23 : vector<128x32xf32>
    %25 = arith.truncf %24 : vector<128x32xf32> to vector<128x32xbf16>
    %c0_9 = arith.constant 0 : index
    %c0_10 = arith.constant 0 : index
    %26 = vector.load %arg4[%c0_9, %c0_10] : memref<32x128xbf16, #tpu.memory_space<vmem>>, vector<32x128xbf16>
    %cst_11 = arith.constant dense<0.000000e+00> : vector<128x128xf32>
    %27 = tpu.matmul %25, %26, %cst_11 {dimension_numbers = #tpu.dot_dimension_numbers<[1], [0], [0], [1], [0, 0, 1, 1], [], []>} : vector<128x32xbf16>, vector<32x128xbf16>, vector<128x128xf32> -> vector<128x128xf32>
    %c0_12 = arith.constant 0 : index
    %c0_13 = arith.constant 0 : index
    %28 = vector.load %arg5[%c0_12, %c0_13] : memref<1x128xf32, #tpu.memory_space<vmem>>, vector<1x128xf32>
    %29 = vector.broadcast %28 : vector<1x128xf32> to vector<128x128xf32>
    %30 = arith.addf %27, %29 : vector<128x128xf32>
    %cst_14 = arith.constant 5.000000e-01 : f32
    %31 = vector.broadcast %cst_14 : f32 to vector<128x128xf32>
    %32 = arith.mulf %31, %30 : vector<128x128xf32>
    %cst_15 = arith.constant 0.707106769 : f32
    %33 = vector.broadcast %cst_15 : f32 to vector<128x128xf32>
    %34 = arith.mulf %30, %33 : vector<128x128xf32>
    %35 = math.erf %34 : vector<128x128xf32>
    %cst_16 = arith.constant 1.000000e+00 : f32
    %36 = vector.broadcast %cst_16 : f32 to vector<128x128xf32>
    %37 = arith.addf %36, %35 : vector<128x128xf32>
    %38 = arith.mulf %32, %37 : vector<128x128xf32>
    %39 = arith.truncf %38 : vector<128x128xf32> to vector<128x128xbf16>
    %c0_17 = arith.constant 0 : index
    %c0_18 = arith.constant 0 : index
    %40 = vector.load %arg6[%c0_17, %c0_18] : memref<128x128xbf16, #tpu.memory_space<vmem>>, vector<128x128xbf16>
    tpu.vector_store %arg6[%c0_17, %c0_18], %39 {strides = array<i32>} : memref<128x128xbf16, #tpu.memory_space<vmem>>, vector<128x128xbf16>,
    return
  }
  func.func @transform_0(%arg0: i32) -> (i32, i32) {
    %c0_i32 = arith.constant 0 : i32
    %c0_i32_0 = arith.constant 0 : i32
    return %arg0, %c0_i32 : i32, i32
  }
  func.func @transform_1(%arg0: i32) -> (i32, i32) {
    %c0_i32 = arith.constant 0 : i32
    %c0_i32_0 = arith.constant 0 : i32
    %c0_i32_1 = arith.constant 0 : i32
    return %c0_i32, %c0_i32_0 : i32, i32
  }
  func.func @transform_2(%arg0: i32) -> (i32, i32) {
    %c0_i32 = arith.constant 0 : i32
    %c0_i32_0 = arith.constant 0 : i32
    %c0_i32_1 = arith.constant 0 : i32
    return %c0_i32, %c0_i32_0 : i32, i32
  }
  func.func @transform_3(%arg0: i32) -> (i32, i32) {
    %c0_i32 = arith.constant 0 : i32
    %c0_i32_0 = arith.constant 0 : i32
    %c0_i32_1 = arith.constant 0 : i32
    return %c0_i32, %c0_i32_0 : i32, i32
  }
  func.func @transform_4(%arg0: i32) -> (i32, i32) {
    %c0_i32 = arith.constant 0 : i32
    %c0_i32_0 = arith.constant 0 : i32
    %c0_i32_1 = arith.constant 0 : i32
    return %c0_i32, %c0_i32_0 : i32, i32
  }
  func.func @transform_5(%arg0: i32) -> (i32, i32) {
    %c0_i32 = arith.constant 0 : i32
    %c0_i32_0 = arith.constant 0 : i32
    return %arg0, %c0_i32 : i32, i32
  }
}

</mosaic_0001>

<bundles_post_ra>
// kernel: na_transformer_layer.5
= control target key start
LH: loop header
LB: loop body
LE: loop exit
PB: predicated region body
PF: predicated region fallthrough
CT: control target
= control target key end

     0   :  { %12 = vsyncpa [#allocation3], 0  ;;  %s1373_s0 = inlined_call_operand.hbm [shape: f32[128,32], index: 0, kind: input, shape index: {}]   ;;  %s1374_s1 = inlined_call_operand.hbm [shape: f32[1,32], index: 1, kind: input, shape index: {}]   ;;  %s1375_s2 = inlined_call_operand.hbm [shape: f32[1,32], index: 2, kind: input, shape index: {}]   ;;  %s1376_s3 = inlined_call_operand.vmem [shape: bf16[32,96], index: 3, kind: input, shape index: {}]   ;;  %s1377_s4 = inlined_call_operand.hbm [shape: f32[1,96], index: 4, kind: input, shape index: {}]   ;;  %s1378_s5 = inlined_call_operand.vmem [shape: bf16[128,32], index: 5, kind: output, shape index: {0}]   ;;  %s1379_s6 = inlined_call_operand.vmem [shape: bf16[128,64], index: 6, kind: output, shape index: {1}]  }
   0x1   :  { %13 = vsyncpa [#allocation5], 0 }
   0x2   :  { %14 = vsyncpa [#allocation8], 0  ;;  %s955_s21 = smov [#allocation4]   ;;  %s956_s23 = smov [#allocation2]  }
   0x3   :  { %s33_s22 = sshll.u32 %s955_s21, 4  ;;  %s20_s24 = sshll.u32 %s956_s23, 4  ;;  %s34_s22 = int_to_ptr.vmem [resolvable:$true] %s33_s22  ;;  %s21_s24 = int_to_ptr.vmem [resolvable:$true] %s20_s24 }
   0x4   :  { %s877_s25 = scalar_lea.vmem %s34_s22, 16  ;;  %s881_s26 = scalar_lea.vmem %s34_s22, 32 }
   0x5   :  { %p878_p0 = scmp.ne.s32.totalorder %s34_s22, %s877_s25  ;;  %p882_p1 = scmp.lt.s32.totalorder %s34_s22, %s34_s22 }
   0x6   :  { %p883_p2 = scmp.lt.s32.totalorder %s881_s26, %s877_s25 }
   0x8   :  { %p884_p3 = por %p883_p2, %p882_p1 }
   0xa   :  { %p885_p4 = pnand %p884_p3, %p878_p0 }
   0xc   :  { %888 = shalt.err (!%p885_p4)
}
   0xd   :  { %36 = dma.hbm_to_vmem [thread:$0]  %s1374_s1, 16, %s34_s22, [#allocation5]  }
   0xe   :  { %s897_s29 = scalar_lea.vmem %s21_s24, 2048  ;;  %p902_p6 = scmp.lt.s32.totalorder %s21_s24, %s21_s24 }
   0xf   :  { %p898_p5 = scmp.ne.s32.totalorder %s21_s24, %s897_s29  ;;  %p903_p7 = scmp.lt.s32.totalorder %s897_s29, %s897_s29 }
  0x11   :  { %p904_p8 = por %p903_p7, %p902_p6 }
  0x13   :  { %p905_p9 = pnand %p904_p8, %p898_p5 }
  0x15   :  { %908 = shalt.err (!%p905_p9)
}
  0x16   :  { %s957_s30 = smov 128   ;;  %s958_s7 = smov 8  }
  0x17   :  { %26 = dma.hbm_to_vmem [thread:$0]  %s1373_s0, 2048, %s21_s24, [#allocation3], %s957_s30, %s957_s30, %s958_s7  }
  0x18   :  { %s959_s10 = smov [#allocation6]   ;;  %s960_s12 = smov [#allocation7]  }
  0x19   :  { %s43_s11 = sshll.u32 %s959_s10, 4  ;;  %s55_s13 = sshll.u32 %s960_s12, 4  ;;  %s44_s11 = int_to_ptr.vmem [resolvable:$true] %s43_s11  ;;  %s56_s13 = int_to_ptr.vmem [resolvable:$true] %s55_s13 }
  0x1a   :  { %s917_s1 = scalar_lea.vmem %s44_s11, 16  ;;  %s921_s14 = scalar_lea.vmem %s44_s11, 32 }
  0x1b   :  { %p918_p10 = scmp.ne.s32.totalorder %s44_s11, %s917_s1  ;;  %p922_p11 = scmp.lt.s32.totalorder %s44_s11, %s44_s11 }
  0x1c   :  { %p923_p12 = scmp.lt.s32.totalorder %s921_s14, %s917_s1 }
  0x1e   :  { %p924_p13 = por %p923_p12, %p922_p11 }
  0x20   :  { %p925_p0 = pnand %p924_p13, %p918_p10 }
  0x22   :  { %928 = shalt.err (!%p925_p0)
}
  0x23   :  { %46 = dma.hbm_to_vmem [thread:$0]  %s1375_s2, 16, %s44_s11, [#allocation5]  }
  0x24   :  { %s937_s17 = scalar_lea.vmem %s56_s13, 16  ;;  %s941_s0 = scalar_lea.vmem %s56_s13, 32 }
  0x25   :  { %p938_p1 = scmp.ne.s32.totalorder %s56_s13, %s937_s17  ;;  %p942_p2 = scmp.lt.s32.totalorder %s56_s13, %s56_s13 }
  0x26   :  { %p943_p3 = scmp.lt.s32.totalorder %s941_s0, %s937_s17 }
  0x28   :  { %p944_p4 = por %p943_p3, %p942_p2 }
  0x2a   :  { %p945_p5 = pnand %p944_p4, %p938_p1 }
  0x2c   :  { %948 = shalt.err (!%p945_p5)
}
  0x2d   :  { %58 = dma.hbm_to_vmem [thread:$0]  %s1377_s4, 16, %s56_s13, [#allocation8]  }
  0x2e   :  { %949 = dma.done.wait [#allocation3], 2048  }
  0x2f   :  { %950 = vsyncadd [#allocation3], 4294965248 }
  0x30   :  { %951 = dma.done.wait [#allocation5], 32  }
  0x31   :  { %952 = vsyncadd [#allocation5], 4294967264 }
  0x32   :  { %953 = dma.done.wait [#allocation8], 16  }
  0x33   :  { %954 = vsyncadd [#allocation8], 4294967280  ;;  %vm88_vm0 = vcmask 261120   ;;  %v72_v0 = vld [vmem:[#allocation2] sm:$0xff]  ;;  %v73_v2 = vld [vmem:[#allocation2 + $0x8] sm:$0xff]  ;;  %vm576_vm1 = vcmask 257024  }
  0x34   :  { %v80_v1 = vld [vmem:[#allocation2 + $0x40] sm:$0xff]  ;;  %v89_v3 = vsel %vm88_vm0, %v72_v0, 0.0  ;;  %v81_v5 = vld [vmem:[#allocation2 + $0x48] sm:$0xff]  ;;  %v92_v6 = vsel %vm88_vm0, %v73_v2, 0.0  ;;  %v74_v8 = vld [vmem:[#allocation2 + $0x10] sm:$0xff]  ;;  %vm689_vm2 = vcmask 519168  }
  0x35   :  { %v113_v4 = vsel %vm88_vm0, %v80_v1, 0.0  ;;  %90 = vadd.xlane.f32.xlu0 %v89_v3  ;;  %v116_v7 = vsel %vm88_vm0, %v81_v5, 0.0  ;;  %v75_v9 = vld [vmem:[#allocation2 + $0x18] sm:$0xff]  ;;  %v95_v10 = vsel %vm88_vm0, %v74_v8, 0.0  ;;  %v1015_v12 = vld [vmem:[#allocation2 + $0x50] sm:$0xff]  ;;  %v1023_v16 = vld [vmem:[#allocation2 + $0x20] sm:$0xff] }
  0x36   :  { %114 = vadd.xlane.f32.xlu1 %v113_v4  ;;  %v98_v11 = vsel %vm88_vm0, %v75_v9, 0.0  ;;  %v1017_v13 = vld [vmem:[#allocation2 + $0x58] sm:$0xff]  ;;  %v119_v14 = vsel %vm88_vm0, %v1015_v12, 0.0  ;;  %v1025_v17 = vld [vmem:[#allocation2 + $0x28] sm:$0xff]  ;;  %v101_v18 = vsel %vm88_vm0, %v1023_v16, 0.0  ;;  %v1031_v20 = vld [vmem:[#allocation2 + $0x60] sm:$0xff] }
  0x37   :  { %v122_v15 = vsel %vm88_vm0, %v1017_v13, 0.0  ;;  %v104_v19 = vsel %vm88_vm0, %v1025_v17, 0.0  ;;  %v1033_v21 = vld [vmem:[#allocation2 + $0x68] sm:$0xff]  ;;  %v125_v22 = vsel %vm88_vm0, %v1031_v20, 0.0  ;;  %v1039_v24 = vld [vmem:[#allocation2 + $0x30] sm:$0xff]  ;;  %v1041_v25 = vld [vmem:[#allocation2 + $0x38] sm:$0xff] }
  0x38   :  { %v128_v23 = vsel %vm88_vm0, %v1033_v21, 0.0  ;;  %v107_v26 = vsel %vm88_vm0, %v1039_v24, 0.0  ;;  %v110_v27 = vsel %vm88_vm0, %v1041_v25, 0.0  ;;  %v1047_v28 = vld [vmem:[#allocation2 + $0x70] sm:$0xff]  ;;  %v1049_v29 = vld [vmem:[#allocation2 + $0x78] sm:$0xff] }
  0x39   :  { %93 = vadd.xlane.f32.xlu0 %v92_v6  ;;  %v131_v30 = vsel %vm88_vm0, %v1047_v28, 0.0  ;;  %v134_v31 = vsel %vm88_vm0, %v1049_v29, 0.0 }
  0x3a   :  { %117 = vadd.xlane.f32.xlu1 %v116_v7 }
  0x3d   :  { %96 = vadd.xlane.f32.xlu0 %v95_v10 }
  0x3e   :  { %99 = vadd.xlane.f32.xlu1 %v98_v11 }
  0x41   :  { %120 = vadd.xlane.f32.xlu0 %v119_v14 }
  0x42   :  { %123 = vadd.xlane.f32.xlu1 %v122_v15 }
  0x45   :  { %102 = vadd.xlane.f32.xlu0 %v101_v18 }
  0x46   :  { %105 = vadd.xlane.f32.xlu1 %v104_v19 }
  0x49   :  { %126 = vadd.xlane.f32.xlu0 %v125_v22 }
  0x4a   :  { %129 = vadd.xlane.f32.xlu1 %v128_v23 }
  0x4d   :  { %108 = vadd.xlane.f32.xlu0 %v107_v26 }
  0x4e   :  { %111 = vadd.xlane.f32.xlu1 %v110_v27 }
  0x51   :  { %132 = vadd.xlane.f32.xlu0 %v131_v30 }
  0x52   :  { %135 = vadd.xlane.f32.xlu1 %v134_v31 }
  0xbe   :  { %v91_v32 = vpop.xlane.xlu0 %90 }
  0xbf   :  { %v115_v33 = vpop.xlane.xlu1 %114  ;;  %v138_v34 = vmul.f32 0.03125, %v91_v32 }
  0xc0   :  { %v146_v35 = vmul.f32 0.03125, %v115_v33 }
  0xc1   :  { %v1055_v36 = vsub.f32 %v72_v0, %v138_v34 }
  0xc2   :  { %v1057_v37 = vsub.f32 %v80_v1, %v146_v35  ;;  %v94_v38 = vpop.xlane.xlu0 %93 }
  0xc3   :  { %v118_v39 = vpop.xlane.xlu1 %117  ;;  %v139_v40 = vmul.f32 0.03125, %v94_v38  ;;  %v170_v42 = vmul.f32 %v1055_v36, %v1055_v36 }
  0xc4   :  { %v147_v41 = vmul.f32 0.03125, %v118_v39  ;;  %v178_v43 = vmul.f32 %v1057_v37, %v1057_v37 }
  0xc5   :  { %v1063_v44 = vsub.f32 %v73_v2, %v139_v40  ;;  %v186_v46 = vsel %vm88_vm0, %v170_v42, 0.0 }
  0xc6   :  { %v1065_v45 = vsub.f32 %v81_v5, %v147_v41  ;;  %187 = vadd.xlane.f32.xlu0 %v186_v46  ;;  %v97_v47 = vpop.xlane.xlu0 %96  ;;  %v210_v49 = vsel %vm88_vm0, %v178_v43, 0.0 }
  0xc7   :  { %v100_v48 = vpop.xlane.xlu1 %99  ;;  %v140_v50 = vmul.f32 0.03125, %v97_v47  ;;  %v171_v52 = vmul.f32 %v1063_v44, %v1063_v44 }
  0xc8   :  { %v141_v51 = vmul.f32 0.03125, %v100_v48  ;;  %v179_v53 = vmul.f32 %v1065_v45, %v1065_v45 }
  0xc9   :  { %v1073_v54 = vsub.f32 %v74_v8, %v140_v50  ;;  %v189_v56 = vsel %vm88_vm0, %v171_v52, 0.0 }
  0xca   :  { %v1075_v55 = vsub.f32 %v75_v9, %v141_v51  ;;  %211 = vadd.xlane.f32.xlu0 %v210_v49  ;;  %190 = vadd.xlane.f32.xlu1 %v189_v56  ;;  %v121_v57 = vpop.xlane.xlu0 %120  ;;  %v213_v59 = vsel %vm88_vm0, %v179_v53, 0.0  ;;  %v836_v53 = vld [vmem:[%s1376_s3] sm:$0xff]  }
  0xcb   :  { %v124_v58 = vpop.xlane.xlu1 %123  ;;  %v148_v60 = vmul.f32 0.03125, %v121_v57  ;;  %v172_v62 = vmul.f32 %v1073_v54, %v1073_v54 }
  0xcc   :  { %v149_v61 = vmul.f32 0.03125, %v124_v58  ;;  %v173_v63 = vmul.f32 %v1075_v55, %v1075_v55 }
  0xcd   :  { %v1084_v0 = vsub.f32 %v1015_v12, %v148_v60  ;;  %v192_v2 = vsel %vm88_vm0, %v172_v62, 0.0 }
  0xce   :  { %v1087_v1 = vsub.f32 %v1017_v13, %v149_v61  ;;  %214 = vadd.xlane.f32.xlu1 %v213_v59  ;;  %193 = vadd.xlane.f32.xlu0 %v192_v2  ;;  %v103_v3 = vpop.xlane.xlu0 %102  ;;  %v195_v5 = vsel %vm88_vm0, %v173_v63, 0.0 }
  0xcf   :  { %v106_v4 = vpop.xlane.xlu1 %105  ;;  %v142_v6 = vmul.f32 0.03125, %v103_v3  ;;  %v180_v8 = vmul.f32 %v1084_v0, %v1084_v0 }
  0xd0   :  { %v143_v7 = vmul.f32 0.03125, %v106_v4  ;;  %v181_v9 = vmul.f32 %v1087_v1, %v1087_v1 }
  0xd1   :  { %v1096_v10 = vsub.f32 %v1023_v16, %v142_v6  ;;  %v216_v12 = vsel %vm88_vm0, %v180_v8, 0.0 }
  0xd2   :  { %v1099_v11 = vsub.f32 %v1025_v17, %v143_v7  ;;  %196 = vadd.xlane.f32.xlu1 %v195_v5  ;;  %217 = vadd.xlane.f32.xlu0 %v216_v12  ;;  %v127_v13 = vpop.xlane.xlu0 %126  ;;  %v219_v15 = vsel %vm88_vm0, %v181_v9, 0.0 }
  0xd3   :  { %v130_v14 = vpop.xlane.xlu1 %129  ;;  %v150_v18 = vmul.f32 0.03125, %v127_v13  ;;  %v174_v22 = vmul.f32 %v1096_v10, %v1096_v10 }
  0xd4   :  { %v151_v19 = vmul.f32 0.03125, %v130_v14  ;;  %v175_v16 = vmul.f32 %v1099_v11, %v1099_v11 }
  0xd5   :  { %v1108_v23 = vsub.f32 %v1031_v20, %v150_v18  ;;  %v198_v26 = vsel %vm88_vm0, %v174_v22, 0.0 }
  0xd6   :  { %v1111_v17 = vsub.f32 %v1033_v21, %v151_v19  ;;  %220 = vadd.xlane.f32.xlu1 %v219_v15  ;;  %199 = vadd.xlane.f32.xlu0 %v198_v26  ;;  %v109_v27 = vpop.xlane.xlu0 %108  ;;  %v201_v31 = vsel %vm88_vm0, %v175_v16, 0.0 }
  0xd7   :  { %v112_v30 = vpop.xlane.xlu1 %111  ;;  %v144_v32 = vmul.f32 0.03125, %v109_v27  ;;  %v182_v34 = vmul.f32 %v1108_v23, %v1108_v23 }
  0xd8   :  { %v145_v33 = vmul.f32 0.03125, %v112_v30  ;;  %v183_v20 = vmul.f32 %v1111_v17, %v1111_v17 }
  0xd9   :  { %v1120_v35 = vsub.f32 %v1039_v24, %v144_v32  ;;  %v222_v38 = vsel %vm88_vm0, %v182_v34, 0.0 }
  0xda   :  { %v1123_v21 = vsub.f32 %v1041_v25, %v145_v33  ;;  %202 = vadd.xlane.f32.xlu1 %v201_v31  ;;  %223 = vadd.xlane.f32.xlu0 %v222_v38  ;;  %v133_v39 = vpop.xlane.xlu0 %132  ;;  %v225_v41 = vsel %vm88_vm0, %v183_v20, 0.0  ;;  %v1152_v33 = vld [vmem:[#allocation4] ss:$0 sm:$0xff] }
  0xdb   :  { %v136_v40 = vpop.xlane.xlu1 %135  ;;  %v152_v42 = vmul.f32 0.03125, %v133_v39  ;;  %v176_v46 = vmul.f32 %v1120_v35, %v1120_v35 }
  0xdc   :  { %v153_v43 = vmul.f32 0.03125, %v136_v40  ;;  %v177_v24 = vmul.f32 %v1123_v21, %v1123_v21 }
  0xdd   :  { %v1132_v47 = vsub.f32 %v1047_v28, %v152_v42  ;;  %v204_v48 = vsel %vm88_vm0, %v176_v46, 0.0 }
  0xde   :  { %v1135_v25 = vsub.f32 %v1049_v29, %v153_v43  ;;  %226 = vadd.xlane.f32.xlu1 %v225_v41  ;;  %205 = vadd.xlane.f32.xlu0 %v204_v48  ;;  %v207_v49 = vsel %vm88_vm0, %v177_v24, 0.0  ;;  %v835_v29 = vld [vmem:[%s1376_s3 + $0x8] sm:$0xff]   ;;  %v1156_v48 = vld [vmem:[#allocation6] ss:$0 sm:$0xff]  ;;  %s961_s3 = smov 96  }
  0xdf   :  { %v184_v50 = vmul.f32 %v1132_v47, %v1132_v47  ;;  %804 = vmatprep.subr.bf16.mxu0 %v835_v29  ;;  %824 = vmatprep.subr.bf16.mxu1 %v835_v29 }
  0xe0   :  { %v185_v51 = vmul.f32 %v1135_v25, %v1135_v25  ;;  %805 = vmatpush3.bf16.msra.mxu0 %v835_v29  ;;  %826 = vmatpush3.bf16.msra.mxu1 %v835_v29 }
  0xe1   :  { %v228_v52 = vsel %vm88_vm0, %v184_v50, 0.0  ;;  %806 = vmatprep.subr.bf16.mxu0 %v836_v53  ;;  %825 = vmatprep.subr.bf16.mxu1 %v836_v53 }
  0xe2   :  { %208 = vadd.xlane.f32.xlu1 %v207_v49  ;;  %229 = vadd.xlane.f32.xlu0 %v228_v52  ;;  %v231_v28 = vsel %vm88_vm0, %v185_v51, 0.0 }
  0xe4   :  { %807 = vmatpush3.bf16.msra.mxu0 %v836_v53  ;;  %827 = vmatpush3.bf16.msra.mxu1 %v836_v53 }
  0xe6   :  { %232 = vadd.xlane.f32.xlu1 %v231_v28 }
 0x14f   :  { %v188_v56 = vpop.xlane.xlu0 %187 }
 0x150   :  { %v234_v57 = vmul.f32 0.03125, %v188_v56 }
 0x152   :  { %v250_v58 = vadd.f32 1e-05, %v234_v57 }
 0x153   :  { %v191_v59 = vpop.xlane.xlu1 %190  ;;  %v212_v60 = vpop.xlane.xlu0 %211 }
 0x154   :  { %837 = vrsqrt.f32 %v250_v58  ;;  %v235_v61 = vmul.f32 0.03125, %v191_v59  ;;  %v242_v62 = vmul.f32 0.03125, %v212_v60 }
 0x156   :  { %v251_v63 = vadd.f32 1e-05, %v235_v61  ;;  %v258_v2 = vadd.f32 1e-05, %v242_v62 }
 0x157   :  { %v215_v3 = vpop.xlane.xlu1 %214  ;;  %v194_v4 = vpop.xlane.xlu0 %193 }
 0x158   :  { %839 = vrsqrt.f32 %v251_v63  ;;  %v243_v5 = vmul.f32 0.03125, %v215_v3  ;;  %v236_v6 = vmul.f32 0.03125, %v194_v4 }
 0x159   :  { %841 = vrsqrt.f32 %v258_v2 }
 0x15a   :  { %v259_v7 = vadd.f32 1e-05, %v243_v5  ;;  %v252_v8 = vadd.f32 1e-05, %v236_v6 }
 0x15b   :  { %v197_v9 = vpop.xlane.xlu1 %196  ;;  %v218_v12 = vpop.xlane.xlu0 %217 }
 0x15c   :  { %843 = vrsqrt.f32 %v259_v7  ;;  %v237_v13 = vmul.f32 0.03125, %v197_v9  ;;  %v244_v14 = vmul.f32 0.03125, %v218_v12 }
 0x15d   :  { %845 = vrsqrt.f32 %v252_v8 }
 0x15e   :  { %v253_v15 = vadd.f32 1e-05, %v237_v13  ;;  %v260_v18 = vadd.f32 1e-05, %v244_v14 }
 0x15f   :  { %v221_v19 = vpop.xlane.xlu1 %220  ;;  %v200_v22 = vpop.xlane.xlu0 %199 }
 0x160   :  { %847 = vrsqrt.f32 %v253_v15  ;;  %v245_v16 = vmul.f32 0.03125, %v221_v19  ;;  %v238_v26 = vmul.f32 0.03125, %v200_v22 }
 0x161   :  { %v838_v27 = vpop.eup %837  ;;  %849 = vrsqrt.f32 %v260_v18 }
 0x162   :  { %v261_v30 = vadd.f32 1e-05, %v245_v16  ;;  %v254_v31 = vadd.f32 1e-05, %v238_v26  ;;  %v282_v32 = vmul.f32 %v838_v27, %v1055_v36 }
 0x163   :  { %v203_v34 = vpop.xlane.xlu1 %202  ;;  %v224_v20 = vpop.xlane.xlu0 %223 }
 0x164   :  { %851 = vrsqrt.f32 %v261_v30  ;;  %v239_v38 = vmul.f32 0.03125, %v203_v34  ;;  %v246_v39 = vmul.f32 0.03125, %v224_v20  ;;  %v305_v41 = vmul.f32 %v1152_v33, %v282_v32 }
 0x165   :  { %v840_v40 = vpop.eup %839  ;;  %853 = vrsqrt.f32 %v254_v31 }
 0x166   :  { %v842_v42 = vpop.eup %841  ;;  %v255_v43 = vadd.f32 1e-05, %v239_v38  ;;  %v262_v46 = vadd.f32 1e-05, %v246_v39  ;;  %v283_v24 = vmul.f32 %v840_v40, %v1063_v44  ;;  %v328_v53 = vadd.f32 %v1156_v48, %v305_v41 }
 0x167   :  { %v227_v49 = vpop.xlane.xlu1 %226  ;;  %v206_v36 = vpop.xlane.xlu0 %205  ;;  %v290_v50 = vmul.f32 %v842_v42, %v1057_v37 }
 0x168   :  { %855 = vrsqrt.f32 %v255_v43  ;;  %v247_v51 = vmul.f32 0.03125, %v227_v49  ;;  %v240_v52 = vmul.f32 0.03125, %v206_v36  ;;  %v306_v28 = vmul.f32 %v1152_v33, %v283_v24 }
 0x169   :  { %v844_v29 = vpop.eup %843  ;;  %857 = vrsqrt.f32 %v262_v46  ;;  %v313_v37 = vmul.f32 %v1152_v33, %v290_v50 }
 0x16a   :  { %v846_v56 = vpop.eup %845  ;;  %v263_v57 = vadd.f32 1e-05, %v247_v51  ;;  %v256_v58 = vadd.f32 1e-05, %v240_v52  ;;  %v329_v44 = vadd.f32 %v1156_v48, %v306_v28  ;;  %v291_v59 = vmul.f32 %v844_v29, %v1065_v45 }
 0x16b   :  { %v209_v60 = vpop.xlane.xlu1 %208  ;;  %v230_v61 = vpop.xlane.xlu0 %229  ;;  %v284_v62 = vmul.f32 %v846_v56, %v1073_v54  ;;  %v336_v54 = vadd.f32 %v1156_v48, %v313_v37 }
 0x16c   :  { %859 = vrsqrt.f32 %v263_v57  ;;  %v241_v63 = vmul.f32 0.03125, %v209_v60  ;;  %v248_v2 = vmul.f32 0.03125, %v230_v61  ;;  %v344_v3 = vpack.c.bf16 %v329_v44, %v328_v53 }
 0x16d   :  { %v848_v4 = vpop.eup %847  ;;  %861 = vrsqrt.f32 %v256_v58  ;;  %v314_v5 = vmul.f32 %v1152_v33, %v291_v59  ;;  %v307_v6 = vmul.f32 %v1152_v33, %v284_v62 }
 0x16e   :  { %v850_v7 = vpop.eup %849  ;;  %v257_v8 = vadd.f32 1e-05, %v241_v63  ;;  %v264_v9 = vadd.f32 1e-05, %v248_v2  ;;  %808 = vmatprep.mubr.msk.bf16.mxu0 %vm88_vm0, %v344_v3  ;;  %v285_v45 = vmul.f32 %v848_v4, %v1075_v55  ;;  %v1211_v4 = vld [vmem:[#allocation7] ss:$0 sm:$0xff] }
 0x16f   :  { %v233_v12 = vpop.xlane.xlu1 %232  ;;  %v337_v13 = vadd.f32 %v1156_v48, %v314_v5  ;;  %v292_v14 = vmul.f32 %v850_v7, %v1084_v0  ;;  %v330_v16 = vadd.f32 %v1156_v48, %v307_v6 }
 0x170   :  { %863 = vrsqrt.f32 %v257_v8  ;;  %v249_v15 = vmul.f32 0.03125, %v233_v12  ;;  %v308_v18 = vmul.f32 %v1152_v33, %v285_v45 }
 0x171   :  { %v852_v19 = vpop.eup %851  ;;  %865 = vrsqrt.f32 %v264_v9  ;;  %v348_v22 = vpack.c.bf16 %v337_v13, %v336_v54  ;;  %v315_v31 = vmul.f32 %v1152_v33, %v292_v14 }
 0x172   :  { %v854_v26 = vpop.eup %853  ;;  %v265_v27 = vadd.f32 1e-05, %v249_v15  ;;  %v331_v55 = vadd.f32 %v1156_v48, %v308_v18  ;;  %v293_v30 = vmul.f32 %v852_v19, %v1087_v1 }
 0x173   :  { %816 = vmatprep.mubr.msk.bf16.mxu1 %vm88_vm0, %v348_v22  ;;  %v286_v0 = vmul.f32 %v854_v26, %v1096_v10  ;;  %v338_v39 = vadd.f32 %v1156_v48, %v315_v31 }
 0x174   :  { %867 = vrsqrt.f32 %v265_v27  ;;  %v345_v32 = vpack.c.bf16 %v331_v55, %v330_v16  ;;  %v316_v34 = vmul.f32 %v1152_v33, %v293_v30 }
 0x175   :  { %v856_v20 = vpop.eup %855  ;;  %v309_v41 = vmul.f32 %v1152_v33, %v286_v0 }
 0x176   :  { %v858_v38 = vpop.eup %857  ;;  %809 = vmatmul.mubr.msk.bf16.vlgmr.msra.gmra.mxu0 %vm88_vm0, %v345_v32  ;;  %v339_v40 = vadd.f32 %v1156_v48, %v316_v34  ;;  %v287_v1 = vmul.f32 %v856_v20, %v1099_v11 }
 0x177   :  { %v294_v42 = vmul.f32 %v858_v38, %v1108_v23  ;;  %v332_v49 = vadd.f32 %v1156_v48, %v309_v41 }
 0x178   :  { %v349_v43 = vpack.c.bf16 %v339_v40, %v338_v39  ;;  %v310_v10 = vmul.f32 %v1152_v33, %v287_v1 }
 0x179   :  { %v860_v46 = vpop.eup %859  ;;  %v317_v51 = vmul.f32 %v1152_v33, %v294_v42 }
 0x17a   :  { %v862_v24 = vpop.eup %861  ;;  %817 = vmatmul.mubr.msk.bf16.vlgmr.msra.gmra.mxu1 %vm88_vm0, %v349_v43  ;;  %v333_v36 = vadd.f32 %v1156_v48, %v310_v10  ;;  %v295_v50 = vmul.f32 %v860_v46, %v1111_v17 }
 0x17b   :  { %v288_v11 = vmul.f32 %v862_v24, %v1120_v35  ;;  %v340_v53 = vadd.f32 %v1156_v48, %v317_v51 }
 0x17c   :  { %v346_v52 = vpack.c.bf16 %v333_v36, %v332_v49  ;;  %v318_v23 = vmul.f32 %v1152_v33, %v295_v50 }
 0x17d   :  { %v864_v28 = vpop.eup %863  ;;  %v311_v58 = vmul.f32 %v1152_v33, %v288_v11 }
 0x17e   :  { %v866_v29 = vpop.eup %865  ;;  %812 = vmatprep.mubr.msk.bf16.mxu0 %vm88_vm0, %v346_v52  ;;  %v341_v56 = vadd.f32 %v1156_v48, %v318_v23  ;;  %v289_v57 = vmul.f32 %v864_v28, %v1123_v21 }
 0x17f   :  { %v296_v17 = vmul.f32 %v866_v29, %v1132_v47  ;;  %v334_v60 = vadd.f32 %v1156_v48, %v311_v58 }
 0x180   :  { %v350_v44 = vpack.c.bf16 %v341_v56, %v340_v53  ;;  %v312_v35 = vmul.f32 %v1152_v33, %v289_v57 }
 0x181   :  { %v868_v59 = vpop.eup %867  ;;  %v319_v62 = vmul.f32 %v1152_v33, %v296_v17 }
 0x182   :  { %820 = vmatprep.mubr.msk.bf16.mxu1 %vm88_vm0, %v350_v44  ;;  %v335_v61 = vadd.f32 %v1156_v48, %v312_v35  ;;  %v297_v37 = vmul.f32 %v868_v59, %v1135_v25 }
 0x183   :  { %v342_v47 = vadd.f32 %v1156_v48, %v319_v62 }
 0x184   :  { %v347_v63 = vpack.c.bf16 %v335_v61, %v334_v60  ;;  %v320_v21 = vmul.f32 %v1152_v33, %v297_v37 }
 0x186   :  { %813 = vmatmul.mubr.msk.bf16.gmra.mxu0 %vm88_vm0, %v347_v63  ;;  %v343_v2 = vadd.f32 %v1156_v48, %v320_v21 }
 0x188   :  { %v351_v3 = vpack.c.bf16 %v343_v2, %v342_v47 }
 0x18a   :  { %821 = vmatmul.mubr.msk.bf16.gmra.mxu1 %vm88_vm0, %v351_v3 }
 0x236   :  { %v810_v5 = vpop.f32.mrf.mxu0 }
 0x237   :  { %v442_v6 = vadd.f32 %v810_v5, %v1211_v4 }
 0x238   :  { %v433_v25 = vpop.f32.mrf.mxu0 }
 0x239   :  { %v498_v7 = vmul.f32 0.35355338, %v442_v6  ;;  %v780_v8 = vpack.c.bf16 %v442_v6, %v442_v6  ;;  %v434_v9 = vadd.f32 %v1211_v4, %v433_v25 }
 0x23a   :  { %v811_v33 = vpop.f32.mrf.mxu0  ;;  %v818_v45 = vpop.f32.mrf.mxu1 }
 0x23b   :  { %v764_v12 = vpack.c.bf16 %v498_v7, %v498_v7  ;;  %v496_v54 = vmul.f32 0.35355338, %v434_v9  ;;  %v445_v48 = vadd.f32 %v811_v33, %v1211_v4  ;;  %645 = vrot.lane.b32.xlu1 %v780_v8, %s961_s3  ;;  %v474_v13 = vadd.f32 %v818_v45, %v1211_v4 }
 0x23c   :  { %v436_v14 = vpop.f32.mrf.mxu0  ;;  %v465_v15 = vpop.f32.mrf.mxu1  ;;  %v778_v42 = vpack.c.bf16 %v434_v9, %v434_v9 }
 0x23d   :  { %579 = vst.msk [vmem:[%s1378_s5 + $0x8] sm:$0xf] %vm576_vm1, %v764_v12  ;;  %v762_v18 = vpack.c.bf16 %v496_v54, %v496_v54  ;;  %v499_v19 = vmul.f32 0.35355338, %v445_v48  ;;  %v781_v22 = vpack.c.bf16 %v445_v48, %v445_v48  ;;  %v437_v16 = vadd.f32 %v1211_v4, %v436_v14 }
 0x23e   :  { %v506_v26 = vmul.f32 0.35355338, %v474_v13  ;;  %v788_v27 = vpack.c.bf16 %v474_v13, %v474_v13  ;;  %v466_v55 = vadd.f32 %v1211_v4, %v465_v15  ;;  %v819_v30 = vpop.f32.mrf.mxu1 }
 0x23f   :  { %577 = vst.msk [vmem:[%s1378_s5] sm:$0xf] %vm576_vm1, %v762_v18  ;;  %v765_v31 = vpack.c.bf16 %v499_v19, %v499_v19  ;;  %v497_v0 = vmul.f32 0.35355338, %v437_v16  ;;  %v477_v32 = vadd.f32 %v819_v30, %v1211_v4  ;;  %647 = vrot.lane.b32.xlu1 %v781_v22, %s961_s3  ;;  %v779_v24 = vpack.c.bf16 %v437_v16, %v437_v16 }
 0x240   :  { %v772_v34 = vpack.c.bf16 %v506_v26, %v506_v26  ;;  %v504_v20 = vmul.f32 0.35355338, %v466_v55  ;;  %661 = vrot.lane.b32.xlu0 %v788_v27, %s961_s3  ;;  %v468_v38 = vpop.f32.mrf.mxu1  ;;  %v786_v36 = vpack.c.bf16 %v466_v55, %v466_v55 }
 0x241   :  { %580 = vst.msk [vmem:[%s1378_s5 + $0xc] sm:$0xf] %vm576_vm1, %v765_v31  ;;  %v763_v39 = vpack.c.bf16 %v497_v0, %v497_v0  ;;  %v507_v40 = vmul.f32 0.35355338, %v477_v32  ;;  %v789_v1 = vpack.c.bf16 %v477_v32, %v477_v32  ;;  %v469_v41 = vadd.f32 %v1211_v4, %v468_v38 }
 0x242   :  { %587 = vst.msk [vmem:[%s1378_s5 + $0x28] sm:$0xf] %vm576_vm1, %v772_v34  ;;  %v770_v43 = vpack.c.bf16 %v504_v20, %v504_v20 }
 0x243   :  { %578 = vst.msk [vmem:[%s1378_s5 + $0x4] sm:$0xf] %vm576_vm1, %v763_v39  ;;  %v773_v10 = vpack.c.bf16 %v507_v40, %v507_v40  ;;  %v505_v46 = vmul.f32 0.35355338, %v469_v41  ;;  %663 = vrot.lane.b32.xlu1 %v789_v1, %s961_s3  ;;  %v787_v52 = vpack.c.bf16 %v469_v41, %v469_v41 }
 0x244   :  { %585 = vst.msk [vmem:[%s1378_s5 + $0x20] sm:$0xf] %vm576_vm1, %v770_v43  ;;  %641 = vrot.lane.b32.xlu0 %v778_v42, %s961_s3 }
 0x245   :  { %588 = vst.msk [vmem:[%s1378_s5 + $0x2c] sm:$0xf] %vm576_vm1, %v773_v10  ;;  %v771_v49 = vpack.c.bf16 %v505_v46, %v505_v46 }
 0x246   :  { %v814_v50 = vpop.f32.mrf.mxu0 }
 0x247   :  { %586 = vst.msk [vmem:[%s1378_s5 + $0x24] sm:$0xf] %vm576_vm1, %v771_v49  ;;  %v458_v51 = vadd.f32 %v814_v50, %v1211_v4  ;;  %643 = vrot.lane.b32.xlu1 %v779_v24, %s961_s3 }
 0x248   :  { %657 = vrot.lane.b32.xlu0 %v786_v36, %s961_s3  ;;  %v449_v11 = vpop.f32.mrf.mxu0 }
 0x249   :  { %v502_v23 = vmul.f32 0.35355338, %v458_v51  ;;  %v784_v28 = vpack.c.bf16 %v458_v51, %v458_v51  ;;  %v450_v29 = vadd.f32 %v1211_v4, %v449_v11 }
 0x24a   :  { %v815_v53 = vpop.f32.mrf.mxu0  ;;  %v822_v56 = vpop.f32.mrf.mxu1 }
 0x24b   :  { %v768_v57 = vpack.c.bf16 %v502_v23, %v502_v23  ;;  %v500_v58 = vmul.f32 0.35355338, %v450_v29  ;;  %v461_v17 = vadd.f32 %v815_v53, %v1211_v4  ;;  %659 = vrot.lane.b32.xlu1 %v787_v52, %s961_s3  ;;  %v490_v44 = vadd.f32 %v822_v56, %v1211_v4 }
 0x24c   :  { %653 = vrot.lane.b32.xlu0 %v784_v28, %s961_s3  ;;  %v452_v35 = vpop.f32.mrf.mxu0  ;;  %v481_v59 = vpop.f32.mrf.mxu1  ;;  %v782_v63 = vpack.c.bf16 %v450_v29, %v450_v29 }
 0x24d   :  { %583 = vst.msk [vmem:[%s1378_s5 + $0x18] sm:$0xf] %vm576_vm1, %v768_v57  ;;  %v766_v60 = vpack.c.bf16 %v500_v58, %v500_v58  ;;  %v503_v61 = vmul.f32 0.35355338, %v461_v17  ;;  %v785_v37 = vpack.c.bf16 %v461_v17, %v461_v17  ;;  %v453_v62 = vadd.f32 %v1211_v4, %v452_v35 }
 0x24e   :  { %v510_v21 = vmul.f32 0.35355338, %v490_v44  ;;  %v482_v47 = vadd.f32 %v1211_v4, %v481_v59  ;;  %v823_v2 = vpop.f32.mrf.mxu1  ;;  %v792_v18 = vpack.c.bf16 %v490_v44, %v490_v44 }
 0x24f   :  { %581 = vst.msk [vmem:[%s1378_s5 + $0x10] sm:$0xf] %vm576_vm1, %v766_v60  ;;  %v769_v3 = vpack.c.bf16 %v503_v61, %v503_v61  ;;  %v501_v5 = vmul.f32 0.35355338, %v453_v62  ;;  %v493_v6 = vadd.f32 %v823_v2, %v1211_v4  ;;  %655 = vrot.lane.b32.xlu1 %v785_v37, %s961_s3  ;;  %v783_v33 = vpack.c.bf16 %v453_v62, %v453_v62 }
 0x250   :  { %v776_v25 = vpack.c.bf16 %v510_v21, %v510_v21  ;;  %v508_v7 = vmul.f32 0.35355338, %v482_v47  ;;  %649 = vrot.lane.b32.xlu0 %v782_v63, %s961_s3  ;;  %v484_v8 = vpop.f32.mrf.mxu1  ;;  %v790_v48 = vpack.c.bf16 %v482_v47, %v482_v47 }
 0x251   :  { %584 = vst.msk [vmem:[%s1378_s5 + $0x1c] sm:$0xf] %vm576_vm1, %v769_v3  ;;  %v767_v9 = vpack.c.bf16 %v501_v5, %v501_v5  ;;  %v511_v45 = vmul.f32 0.35355338, %v493_v6  ;;  %v485_v12 = vadd.f32 %v1211_v4, %v484_v8  ;;  %v793_v19 = vpack.c.bf16 %v493_v6, %v493_v6 }
 0x252   :  { %591 = vst.msk [vmem:[%s1378_s5 + $0x38] sm:$0xf] %vm576_vm1, %v776_v25  ;;  %v774_v54 = vpack.c.bf16 %v508_v7, %v508_v7 }
 0x253   :  { %582 = vst.msk [vmem:[%s1378_s5 + $0x14] sm:$0xf] %vm576_vm1, %v767_v9  ;;  %v777_v13 = vpack.c.bf16 %v511_v45, %v511_v45  ;;  %v509_v14 = vmul.f32 0.35355338, %v485_v12  ;;  %651 = vrot.lane.b32.xlu1 %v783_v33, %s961_s3  ;;  %v791_v15 = vpack.c.bf16 %v485_v12, %v485_v12 }
 0x254   :  { %589 = vst.msk [vmem:[%s1378_s5 + $0x30] sm:$0xf] %vm576_vm1, %v774_v54  ;;  %665 = vrot.lane.b32.xlu0 %v790_v48, %s961_s3 }
 0x255   :  { %592 = vst.msk [vmem:[%s1378_s5 + $0x3c] sm:$0xf] %vm576_vm1, %v777_v13  ;;  %v775_v4 = vpack.c.bf16 %v509_v14, %v509_v14 }
 0x257   :  { %590 = vst.msk [vmem:[%s1378_s5 + $0x34] sm:$0xf] %vm576_vm1, %v775_v4  ;;  %667 = vrot.lane.b32.xlu1 %v791_v15, %s961_s3 }
 0x258   :  { %669 = vrot.lane.b32.xlu0 %v792_v18, %s961_s3 }
 0x25b   :  { %671 = vrot.lane.b32.xlu1 %v793_v19, %s961_s3 }
 0x2ad   :  { %v646_v22 = vpop.permute.xlu1 %645 }
 0x2ae   :  { %692 = vst.msk [vmem:[%s1379_s6 + $0x8] sm:$0xf] %vm689_vm2, %v646_v22 }
 0x2b1   :  { %v648_v16 = vpop.permute.xlu1 %647 }
 0x2b2   :  { %693 = vst.msk [vmem:[%s1379_s6 + $0xc] sm:$0xf] %vm689_vm2, %v648_v16  ;;  %v662_v26 = vpop.permute.xlu0 %661 }
 0x2b3   :  { %700 = vst.msk [vmem:[%s1379_s6 + $0x28] sm:$0xf] %vm689_vm2, %v662_v26 }
 0x2b5   :  { %v664_v27 = vpop.permute.xlu1 %663 }
 0x2b6   :  { %701 = vst.msk [vmem:[%s1379_s6 + $0x2c] sm:$0xf] %vm689_vm2, %v664_v27  ;;  %v642_v55 = vpop.permute.xlu0 %641 }
 0x2b7   :  { %690 = vst.msk [vmem:[%s1379_s6] sm:$0xf] %vm689_vm2, %v642_v55 }
 0x2b9   :  { %v644_v30 = vpop.permute.xlu1 %643 }
 0x2ba   :  { %691 = vst.msk [vmem:[%s1379_s6 + $0x4] sm:$0xf] %vm689_vm2, %v644_v30  ;;  %v658_v31 = vpop.permute.xlu0 %657 }
 0x2bb   :  { %698 = vst.msk [vmem:[%s1379_s6 + $0x20] sm:$0xf] %vm689_vm2, %v658_v31 }
 0x2bd   :  { %v660_v0 = vpop.permute.xlu1 %659 }
 0x2be   :  { %699 = vst.msk [vmem:[%s1379_s6 + $0x24] sm:$0xf] %vm689_vm2, %v660_v0  ;;  %v654_v32 = vpop.permute.xlu0 %653 }
 0x2bf   :  { %696 = vst.msk [vmem:[%s1379_s6 + $0x18] sm:$0xf] %vm689_vm2, %v654_v32 }
 0x2c1   :  { %v656_v34 = vpop.permute.xlu1 %655 }
 0x2c2   :  { %697 = vst.msk [vmem:[%s1379_s6 + $0x1c] sm:$0xf] %vm689_vm2, %v656_v34  ;;  %v650_v20 = vpop.permute.xlu0 %649 }
 0x2c3   :  { %694 = vst.msk [vmem:[%s1379_s6 + $0x10] sm:$0xf] %vm689_vm2, %v650_v20 }
 0x2c5   :  { %v652_v38 = vpop.permute.xlu1 %651 }
 0x2c6   :  { %695 = vst.msk [vmem:[%s1379_s6 + $0x14] sm:$0xf] %vm689_vm2, %v652_v38  ;;  %v666_v39 = vpop.permute.xlu0 %665 }
 0x2c7   :  { %702 = vst.msk [vmem:[%s1379_s6 + $0x30] sm:$0xf] %vm689_vm2, %v666_v39 }
 0x2c9   :  { %v668_v40 = vpop.permute.xlu1 %667 }
 0x2ca   :  { %703 = vst.msk [vmem:[%s1379_s6 + $0x34] sm:$0xf] %vm689_vm2, %v668_v40  ;;  %v670_v1 = vpop.permute.xlu0 %669 }
 0x2cb   :  { %704 = vst.msk [vmem:[%s1379_s6 + $0x38] sm:$0xf] %vm689_vm2, %v670_v1 }
 0x2cd   :  { %v672_v41 = vpop.permute.xlu1 %671 }
 0x2ce   :  { %705 = vst.msk [vmem:[%s1379_s6 + $0x3c] sm:$0xf] %vm689_vm2, %v672_v41 }
 0x2cf   :  { %714 = vsyncpa [#allocation3], 1 }
 0x2d0   :  { %715 = vsyncpa [#allocation5], 1 }
 0x2d1   :  { %716 = vsyncpa [#allocation8], 1 }

// kernel: na_transformer_layer.7
= control target key start
LH: loop header
LB: loop body
LE: loop exit
PB: predicated region body
PF: predicated region fallthrough
CT: control target
= control target key end

     0   :  { %vm97_vm0 = vcmask 261120   ;;  %s530_s1 = inlined_call_operand.vmem [shape: bf16[32,32], index: 1, kind: input, shape index: {}]   ;;  %s531_s0 = inlined_call_operand.vmem [shape: bf16[128,32], index: 0, kind: input, shape index: {}]   ;;  %s532_s2 = inlined_call_operand.vmem [shape: f32[1,32], index: 2, kind: input, shape index: {}]   ;;  %s533_s3 = inlined_call_operand.vmem [shape: f32[128,32], index: 3, kind: input, shape index: {}]   ;;  %s534_s4 = inlined_call_operand.vmem [shape: f32[128,32], index: 4, kind: output, shape index: {}]  }
   0x1   :  { %v324_v0 = vld [vmem:[%s530_s1 + $0x8] sm:$0xff]   ;;  %v325_v1 = vld [vmem:[%s530_s1] sm:$0xff]   ;;  %v330_v6 = vld [vmem:[%s531_s0 + $0x10] sm:$0xff]  }
   0x2   :  { %300 = vmatprep.subr.bf16.mxu0 %v324_v0  ;;  %320 = vmatprep.subr.bf16.mxu1 %v324_v0  ;;  %v326_v2 = vld [vmem:[%s531_s0] sm:$0xff]   ;;  %v328_v4 = vld [vmem:[%s531_s0 + $0x8] sm:$0xff]   ;;  %v331_v7 = vld [vmem:[%s531_s0 + $0x30] sm:$0xff]  }
   0x3   :  { %301 = vmatpush3.bf16.msra.mxu0 %v324_v0  ;;  %322 = vmatpush3.bf16.msra.mxu1 %v324_v0  ;;  %v327_v3 = vld [vmem:[%s531_s0 + $0x20] sm:$0xff]   ;;  %v329_v5 = vld [vmem:[%s531_s0 + $0x28] sm:$0xff]   ;;  %v332_v8 = vld [vmem:[%s531_s0 + $0x18] sm:$0xff]  }
   0x4   :  { %302 = vmatprep.subr.bf16.mxu0 %v325_v1  ;;  %321 = vmatprep.subr.bf16.mxu1 %v325_v1  ;;  %v333_v9 = vld [vmem:[%s531_s0 + $0x38] sm:$0xff]   ;;  %v400_v10 = vld [vmem:[%s532_s2] ss:$0 sm:$0xff]  ;;  %v221_v12 = vld [vmem:[%s533_s3 + $0x10] sm:$0xff] }
   0x5   :  { %304 = vmatprep.mubr.msk.bf16.mxu0 %vm97_vm0, %v326_v2  ;;  %312 = vmatprep.mubr.msk.bf16.mxu1 %vm97_vm0, %v327_v3  ;;  %v229_v14 = vld [vmem:[%s533_s3 + $0x50] sm:$0xff]  ;;  %v219_v18 = vld [vmem:[%s533_s3] sm:$0xff]  ;;  %v222_v26 = vld [vmem:[%s533_s3 + $0x18] sm:$0xff] }
   0x6   :  { %v227_v20 = vld [vmem:[%s533_s3 + $0x40] sm:$0xff]  ;;  %v230_v28 = vld [vmem:[%s533_s3 + $0x58] sm:$0xff]  ;;  %v220_v34 = vld [vmem:[%s533_s3 + $0x8] sm:$0xff] }
   0x7   :  { %303 = vmatpush3.bf16.msra.mxu0 %v325_v1  ;;  %323 = vmatpush3.bf16.msra.mxu1 %v325_v1  ;;  %v228_v36 = vld [vmem:[%s533_s3 + $0x48] sm:$0xff]  ;;  %v225_v42 = vld [vmem:[%s533_s3 + $0x30] sm:$0xff]  ;;  %v223_v50 = vld [vmem:[%s533_s3 + $0x20] sm:$0xff] }
   0x8   :  { %v233_v44 = vld [vmem:[%s533_s3 + $0x70] sm:$0xff]  ;;  %v231_v52 = vld [vmem:[%s533_s3 + $0x60] sm:$0xff]  ;;  %v226_v58 = vld [vmem:[%s533_s3 + $0x38] sm:$0xff] }
   0x9   :  { %v234_v60 = vld [vmem:[%s533_s3 + $0x78] sm:$0xff]  ;;  %v224_v2 = vld [vmem:[%s533_s3 + $0x28] sm:$0xff] }
   0xa   :  { %305 = vmatmul.mubr.msk.bf16.vlgmr.msra.gmra.mxu0 %vm97_vm0, %v328_v4  ;;  %313 = vmatmul.mubr.msk.bf16.vlgmr.msra.gmra.mxu1 %vm97_vm0, %v329_v5  ;;  %v232_v4 = vld [vmem:[%s533_s3 + $0x68] sm:$0xff] }
   0xb   :  { %308 = vmatprep.mubr.msk.bf16.mxu0 %vm97_vm0, %v330_v6  ;;  %316 = vmatprep.mubr.msk.bf16.mxu1 %vm97_vm0, %v331_v7 }
  0x12   :  { %309 = vmatmul.mubr.msk.bf16.gmra.mxu0 %vm97_vm0, %v332_v8  ;;  %317 = vmatmul.mubr.msk.bf16.gmra.mxu1 %vm97_vm0, %v333_v9 }
  0xca   :  { %v306_v11 = vpop.f32.mrf.mxu0  ;;  %v314_v13 = vpop.f32.mrf.mxu1 }
  0xcb   :  { %v165_v15 = vadd.f32 %v306_v11, %v400_v10  ;;  %v197_v16 = vadd.f32 %v314_v13, %v400_v10 }
  0xcc   :  { %v156_v17 = vpop.f32.mrf.mxu0  ;;  %v188_v19 = vpop.f32.mrf.mxu1 }
  0xcd   :  { %v237_v21 = vadd.f32 %v221_v12, %v165_v15  ;;  %v245_v22 = vadd.f32 %v229_v14, %v197_v16  ;;  %v157_v23 = vadd.f32 %v400_v10, %v156_v17  ;;  %v189_v24 = vadd.f32 %v400_v10, %v188_v19 }
  0xce   :  { %v307_v25 = vpop.f32.mrf.mxu0  ;;  %v315_v27 = vpop.f32.mrf.mxu1 }
  0xcf   :  { %253 = vst.msk [vmem:[%s534_s4 + $0x10] sm:$0xff] %vm97_vm0, %v237_v21  ;;  %261 = vst.msk [vmem:[%s534_s4 + $0x50] sm:$0xff] %vm97_vm0, %v245_v22  ;;  %v235_v29 = vadd.f32 %v219_v18, %v157_v23  ;;  %v243_v30 = vadd.f32 %v227_v20, %v189_v24  ;;  %v168_v31 = vadd.f32 %v307_v25, %v400_v10 }
  0xd0   :  { %v200_v32 = vadd.f32 %v315_v27, %v400_v10  ;;  %v159_v33 = vpop.f32.mrf.mxu0  ;;  %v191_v35 = vpop.f32.mrf.mxu1 }
  0xd1   :  { %251 = vst.msk [vmem:[%s534_s4] sm:$0xff] %vm97_vm0, %v235_v29  ;;  %259 = vst.msk [vmem:[%s534_s4 + $0x40] sm:$0xff] %vm97_vm0, %v243_v30  ;;  %v238_v37 = vadd.f32 %v222_v26, %v168_v31  ;;  %v160_v39 = vadd.f32 %v400_v10, %v159_v33  ;;  %v192_v40 = vadd.f32 %v400_v10, %v191_v35 }
  0xd2   :  { %v246_v38 = vadd.f32 %v230_v28, %v200_v32  ;;  %v310_v41 = vpop.f32.mrf.mxu0  ;;  %v318_v43 = vpop.f32.mrf.mxu1 }
  0xd3   :  { %254 = vst.msk [vmem:[%s534_s4 + $0x18] sm:$0xff] %vm97_vm0, %v238_v37  ;;  %v236_v45 = vadd.f32 %v220_v34, %v160_v39  ;;  %v244_v46 = vadd.f32 %v228_v36, %v192_v40  ;;  %v181_v47 = vadd.f32 %v310_v41, %v400_v10  ;;  %v213_v48 = vadd.f32 %v318_v43, %v400_v10 }
  0xd4   :  { %262 = vst.msk [vmem:[%s534_s4 + $0x58] sm:$0xff] %vm97_vm0, %v246_v38  ;;  %v172_v49 = vpop.f32.mrf.mxu0  ;;  %v204_v51 = vpop.f32.mrf.mxu1 }
  0xd5   :  { %252 = vst.msk [vmem:[%s534_s4 + $0x8] sm:$0xff] %vm97_vm0, %v236_v45  ;;  %260 = vst.msk [vmem:[%s534_s4 + $0x48] sm:$0xff] %vm97_vm0, %v244_v46  ;;  %v241_v53 = vadd.f32 %v225_v42, %v181_v47  ;;  %v249_v54 = vadd.f32 %v233_v44, %v213_v48  ;;  %v173_v55 = vadd.f32 %v400_v10, %v172_v49 }
  0xd6   :  { %v205_v56 = vadd.f32 %v400_v10, %v204_v51  ;;  %v311_v57 = vpop.f32.mrf.mxu0  ;;  %v319_v59 = vpop.f32.mrf.mxu1 }
  0xd7   :  { %257 = vst.msk [vmem:[%s534_s4 + $0x30] sm:$0xff] %vm97_vm0, %v241_v53  ;;  %265 = vst.msk [vmem:[%s534_s4 + $0x70] sm:$0xff] %vm97_vm0, %v249_v54  ;;  %v239_v61 = vadd.f32 %v223_v50, %v173_v55  ;;  %v184_v63 = vadd.f32 %v311_v57, %v400_v10  ;;  %v216_v0 = vadd.f32 %v319_v59, %v400_v10 }
  0xd8   :  { %v247_v62 = vadd.f32 %v231_v52, %v205_v56  ;;  %v175_v1 = vpop.f32.mrf.mxu0  ;;  %v207_v3 = vpop.f32.mrf.mxu1 }
  0xd9   :  { %255 = vst.msk [vmem:[%s534_s4 + $0x20] sm:$0xff] %vm97_vm0, %v239_v61  ;;  %v242_v5 = vadd.f32 %v226_v58, %v184_v63  ;;  %v250_v6 = vadd.f32 %v234_v60, %v216_v0  ;;  %v176_v7 = vadd.f32 %v400_v10, %v175_v1  ;;  %v208_v8 = vadd.f32 %v400_v10, %v207_v3 }
  0xda   :  { %263 = vst.msk [vmem:[%s534_s4 + $0x60] sm:$0xff] %vm97_vm0, %v247_v62 }
  0xdb   :  { %258 = vst.msk [vmem:[%s534_s4 + $0x38] sm:$0xff] %vm97_vm0, %v242_v5  ;;  %266 = vst.msk [vmem:[%s534_s4 + $0x78] sm:$0xff] %vm97_vm0, %v250_v6  ;;  %v240_v9 = vadd.f32 %v224_v2, %v176_v7  ;;  %v248_v11 = vadd.f32 %v232_v4, %v208_v8 }
  0xdd   :  { %256 = vst.msk [vmem:[%s534_s4 + $0x28] sm:$0xff] %vm97_vm0, %v240_v9  ;;  %264 = vst.msk [vmem:[%s534_s4 + $0x68] sm:$0xff] %vm97_vm0, %v248_v11 }

// kernel: na_transformer_layer.6
= control target key start
LH: loop header
LB: loop body
LE: loop exit
PB: predicated region body
PF: predicated region fallthrough
CT: control target
= control target key end

     0   :  { %s2502_s12 = smov 0   ;;  %s2504_s13 = smov 0   ;;  %s3079_s0 = inlined_call_operand.vmem [shape: bf16[2,64,32], index: 0, kind: input, shape index: {}]   ;;  %s3080_s1 = inlined_call_operand.vmem [shape: bf16[2,64,64], index: 1, kind: input, shape index: {}]   ;;  %s3081_s2 = inlined_call_operand.vmem [shape: f32[1,4,64,64], index: 2, kind: input, shape index: {}]   ;;  %s3082_s3 = inlined_call_operand.vmem [shape: bf16[2,64,32], index: 3, kind: output, shape index: {}]  }
   0x1   :  { %s2506_s14 = smov 0  }
   0x2 LB: > { %s22_s15 = sadd.s32 1, %s2466_s13  ;;  %p1887_p0 = scmp.ge.s32.totalorder %s2470_s14, 1  ;;  %s2470_s14 = sphi %s2506_s14, %s13_s14   ;;  %s2466_s13 = sphi %s2504_s13, %s3084_s13   ;;  %s2462_s12 = sphi %s2502_s12, %s3083_s12  }
   0x3   : > { %p23_p1 = scmp.ge.s32.totalorder %s22_s15, 2  ;;  %p144_p2 = scmp.lt.s32.totalorder %s2470_s14, 3 }
   0x5   : > { %s3086_s15 = smov (%p23_p1, %s22_s15), 0  ;;  %p145_p3 = pnand %p1887_p0, %p144_p2 }
   0x6   : > { %p180_p4 = scmp.lt.s32.totalorder (!%p145_p3), %s2462_s12, 1  ;;  %s2524_s16 = sand.u32 (!%p145_p3), 1, %s2462_s12 }
   0x7   : > { %148 = sbr.rel (%p145_p3) target bundleno = 2641 (0xa51), region = 28  ;;  %p1892_p5 = scmp.ne.s32.totalorder (!%p145_p3), %s2462_s12, 0 }
   0xc   : > { %s181_s17 = scalar_select %p180_p4, %s2462_s12, 1 }
   0xd   : > { %216 = sbr.rel (%p1892_p5) target bundleno = 22 (0x16), region = 32  ;;  %s1987_s25 = sshll.u32 (!%p1892_p5), %s2462_s12, 5 }
   0xe   : > { %s1985_s18 = sshll.u32 %s181_s17, 5  ;;  %s1988_s26 = sshll.u32 (!%p1892_p5), %s2524_s16, 5 }
   0xf   : > { %s2530_s21 = scalar_lea.vmem %s3079_s0, %s1985_s18  ;;  %s2535_s24 = scalar_lea.vmem %s3082_s3, %s1985_s18 }
  0x10   : > { %s222_s29 = scalar_lea.vmem (!%p1892_p5), %s3080_s1, %s1987_s25  ;;  %s225_s30 = scalar_lea.vmem (!%p1892_p5), [#allocation2], %s1988_s26 }
  0x11   : > { %s226_s4 = scalar_lea.sflag (!%p1892_p5), [#allocation3], %s2524_s16 }
  0x12   : > { %v260_v0 = vld [vmem:[%s222_s29] sm:$0xff]  ;;  %v262_v1 = vld [vmem:[%s222_s29 + $0x8] sm:$0xff]  ;;  %v264_v2 = vld [vmem:[%s222_s29 + $0x10] sm:$0xff] }
  0x13   : > { %261 = vst [vmem:[%s225_s30] sm:$0xff] %v260_v0  ;;  %263 = vst [vmem:[%s225_s30 + $0x8] sm:$0xff] %v262_v1  ;;  %v266_v3 = vld [vmem:[%s222_s29 + $0x18] sm:$0xff] }
  0x14   : > { %265 = vst [vmem:[%s225_s30 + $0x10] sm:$0xff] %v264_v2  ;;  %267 = vst [vmem:[%s225_s30 + $0x18] sm:$0xff] %v266_v3 }
  0x15   : > { %275 = vsyncadd %s226_s4, 512 }
  0x16 PF: > { %s276_s5 = sadd.s32 1, %s2462_s12 }
  0x17   : > { %p1897_p6 = scmp.ge.s32.totalorder %s276_s5, 2 }
  0x18   : > { %s281_s6 = ssub.s32 (!%p1897_p6), 1, %s2524_s16  ;;  %s1989_s7 = sshll.u32 (!%p1897_p6), %s2462_s12, 5 }
  0x19   : > { %280 = sbr.rel (%p1897_p6) target bundleno = 34 (0x22), region = 70  ;;  %s1812_s10 = scalar_lea.vmem (!%p1897_p6), %s3080_s1, %s1989_s7 }
  0x1a   : > { %s1990_s11 = sshll.u32 (!%p1897_p6), %s281_s6, 5  ;;  %s291_s18 = scalar_lea.sflag (!%p1897_p6), [#allocation3], %s281_s6 }
  0x1b   : > { %s290_s17 = scalar_lea.vmem (!%p1897_p6), [#allocation2], %s1990_s11 }
  0x1e   : > { %v1902_v4 = vld [vmem:[%s1812_s10 + $0x20] sm:$0xff]  ;;  %v1903_v5 = vld [vmem:[%s1812_s10 + $0x28] sm:$0xff]  ;;  %v1904_v6 = vld [vmem:[%s1812_s10 + $0x30] sm:$0xff] }
  0x1f   : > { %326 = vst [vmem:[%s290_s17] sm:$0xff] %v1902_v4  ;;  %328 = vst [vmem:[%s290_s17 + $0x8] sm:$0xff] %v1903_v5  ;;  %v1905_v7 = vld [vmem:[%s1812_s10 + $0x38] sm:$0xff] }
  0x20   : > { %330 = vst [vmem:[%s290_s17 + $0x10] sm:$0xff] %v1904_v6  ;;  %332 = vst [vmem:[%s290_s17 + $0x18] sm:$0xff] %v1905_v7 }
  0x21   : > { %340 = vsyncadd %s291_s18, 512 }
  0x22 PF: > { %s341_s19 = scalar_lea.sflag [#allocation3], %s2524_s16 }
  0x23   : > { %2458 = dma.done.wait %s341_s19, 512 }
  0x24   : > { %2459 = vsyncadd %s341_s19, 4294966784  ;;  %s1991_s12 = sshll.u32 %s2524_s16, 5  ;;  %vm413_vm0 = vcmask 64512   ;;  %v2567_v11 = vld [vmem:[%s2530_s21] sm:$0xff]   ;;  %v2588_v17 = vld [vmem:[%s2530_s21 + $0x8] sm:$0xff]   ;;  %vm503_vm1 = vcmask 523264  }
  0x25   : > { %s2552_s20 = scalar_lea.vmem [#allocation2], %s1991_s12  ;;  %2072 = vmatprep.mubr.msk.bf16.mxu0 %vm413_vm0, %v2567_v11  ;;  %v2591_v18 = vld [vmem:[%s2530_s21 + $0x10] sm:$0xff]   ;;  %v2598_v19 = vld [vmem:[%s2530_s21 + $0x18] sm:$0xff]   ;;  %v365_v22 = vld [vmem:[%s3081_s2] sm:$0xff]  ;;  %s2472_s11 = smov 96   ;;  %vm1674_vm2 = vcmask 130048  }
  0x26   : > { %v367_v20 = vld [vmem:[%s3081_s2 + $0x10] sm:$0xff]  ;;  %v368_v25 = vld [vmem:[%s3081_s2 + $0x18] sm:$0xff]  ;;  %v366_v29 = vld [vmem:[%s3081_s2 + $0x8] sm:$0xff]  ;;  %s2473_s17 = smov 120   ;;  %s2474_s8 = smov 88   ;;  %vm1683_vm3 = vcmask 195584  }
  0x27   : > { %v2555_v8 = vld [vmem:[%s2552_s20 + $0x18] sm:$0xff]   ;;  %v2558_v9 = vld [vmem:[%s2552_s20 + $0x10] sm:$0xff]   ;;  %v2574_v13 = vld [vmem:[%s2552_s20 + $0x8] sm:$0xff]   ;;  %s2475_s9 = smov 112   ;;  %s2476_s5 = smov 80   ;;  %vm1724_vm4 = vcmask 257024  }
  0x28   : > { %2192 = vmatprep.subr.msk.bf16.mxu0 %vm413_vm0, %v2555_v8  ;;  %v436_v10 = vsel %vm413_vm0, %v2555_v8, 0  ;;  %v433_v12 = vsel %vm413_vm0, %v2558_v9, 0  ;;  %v430_v14 = vsel %vm413_vm0, %v2574_v13, 0  ;;  %v2581_v15 = vld [vmem:[%s2552_s20] sm:$0xff]   ;;  %v371_v33 = vld [vmem:[%s3081_s2 + $0x30] sm:$0xff]  ;;  %v372_v41 = vld [vmem:[%s3081_s2 + $0x38] sm:$0xff] }
  0x29   : > { %2065 = vmatpush3.bf16.xpose.msra.mxu0 %v436_v10  ;;  %v427_v16 = vsel %vm413_vm0, %v2581_v15, 0  ;;  %v369_v37 = vld [vmem:[%s3081_s2 + $0x20] sm:$0xff]  ;;  %v370_v45 = vld [vmem:[%s3081_s2 + $0x28] sm:$0xff]  ;;  %s2477_s6 = smov 104   ;;  %s2478_s27 = smov 72  }
  0x2a   : > { %2193 = vmatprep.subr.msk.bf16.mxu0 %vm413_vm0, %v2558_v9  ;;  %s2479_s28 = smov 8   ;;  %s2480_s29 = smov 16  }
  0x2b   : > { %s2481_s30 = smov 24  }
  0x31   : > { %2067 = vmatpush3.bf16.xpose.msra.mxu0 %v433_v12 }
  0x32   : > { %2194 = vmatprep.subr.msk.bf16.mxu0 %vm413_vm0, %v2574_v13 }
  0x39   : > { %2069 = vmatpush3.bf16.xpose.msra.mxu0 %v430_v14 }
  0x3a   : > { %2195 = vmatprep.subr.msk.bf16.mxu0 %vm413_vm0, %v2581_v15 }
  0x41   : > { %2071 = vmatpush3.bf16.xpose.msra.mxu0 %v427_v16 }
  0x48   : > { %2073 = vmatmul.mubr.msk.bf16.vlgmr.msra.gmra.mxu0 %vm413_vm0, %v2588_v17 }
  0x49   : > { %2076 = vmatprep.mubr.msk.bf16.mxu0 %vm413_vm0, %v2591_v18 }
  0x50   : > { %2077 = vmatmul.mubr.msk.bf16.gmra.mxu0 %vm413_vm0, %v2598_v19 }
 0x108   : > { %v2074_v21 = vpop.f32.mrf.mxu0 }
 0x109   : > { %v481_v23 = vadd.f32 %v2074_v21, %v367_v20 }
 0x10a   : > { %v472_v24 = vpop.f32.mrf.mxu0 }
 0x10b   : > { %v473_v26 = vadd.f32 %v472_v24, %v365_v22  ;;  %v510_v27 = vsel %vm503_vm1, %v481_v23, -inf }
 0x10c   : > { %511 = vmax.xlane.f32.xlu1 %v510_v27  ;;  %v2075_v28 = vpop.f32.mrf.mxu0 }
 0x10d   : > { %v484_v30 = vadd.f32 %v2075_v28, %v368_v25  ;;  %v504_v31 = vsel %vm503_vm1, %v473_v26, -inf }
 0x10e   : > { %v475_v32 = vpop.f32.mrf.mxu0  ;;  %505 = vmax.xlane.f32.xlu0 %v504_v31 }
 0x10f   : > { %v476_v34 = vadd.f32 %v475_v32, %v366_v29  ;;  %v513_v35 = vsel %vm503_vm1, %v484_v30, -inf }
 0x110   : > { %514 = vmax.xlane.f32.xlu1 %v513_v35  ;;  %v2078_v36 = vpop.f32.mrf.mxu0 }
 0x111   : > { %v497_v38 = vadd.f32 %v2078_v36, %v371_v33  ;;  %v507_v39 = vsel %vm503_vm1, %v476_v34, -inf }
 0x112   : > { %v488_v40 = vpop.f32.mrf.mxu0  ;;  %508 = vmax.xlane.f32.xlu0 %v507_v39 }
 0x113   : > { %v489_v42 = vadd.f32 %v488_v40, %v369_v37  ;;  %v522_v43 = vsel %vm503_vm1, %v497_v38, -inf }
 0x114   : > { %v2079_v44 = vpop.f32.mrf.mxu0 }
 0x115   : > { %v500_v46 = vadd.f32 %v2079_v44, %v372_v41  ;;  %v516_v50 = vsel %vm503_vm1, %v489_v42, -inf }
 0x116   : > { %v491_v47 = vpop.f32.mrf.mxu0  ;;  %523 = vmax.xlane.f32.xlu0 %v522_v43 }
 0x117   : > { %v492_v48 = vadd.f32 %v491_v47, %v370_v45  ;;  %v525_v49 = vsel %vm503_vm1, %v500_v46, -inf }
 0x118   : > { %526 = vmax.xlane.f32.xlu1 %v525_v49 }
 0x119   : > { %v519_v51 = vsel %vm503_vm1, %v492_v48, -inf }
 0x11a   : > { %517 = vmax.xlane.f32.xlu0 %v516_v50 }
 0x11c   : > { %520 = vmax.xlane.f32.xlu1 %v519_v51 }
 0x12d   : > { %600 = vrot.lane.b32.xlu1 %v2558_v9, %s2472_s11 }
 0x130   : > { %602 = vrot.lane.b32.xlu0 %v2555_v8, %s2472_s11 }
 0x131   : > { %598 = vrot.lane.b32.xlu1 %v2574_v13, %s2472_s11 }
 0x135   : > { %596 = vrot.lane.b32.xlu1 %v2581_v15, %s2472_s11 }
 0x195   : > { %v512_v52 = vpop.xlane.xlu1 %511 }
 0x196   : > { %v530_v53 = vsub.f32 %v481_v23, %v512_v52 }
 0x197   : > { %v506_v54 = vpop.xlane.xlu0 %505 }
 0x198   : > { %v540_v55 = vmul.f32 1.442695, %v530_v53  ;;  %v528_v56 = vsub.f32 %v473_v26, %v506_v54 }
 0x199   : > { %v515_v57 = vpop.xlane.xlu1 %514 }
 0x19a   : > { %2310 = vpow2.f32 %v540_v55  ;;  %v536_v58 = vmul.f32 1.442695, %v528_v56  ;;  %v531_v59 = vsub.f32 %v484_v30, %v515_v57 }
 0x19b   : > { %v509_v60 = vpop.xlane.xlu0 %508 }
 0x19c   : > { %2312 = vpow2.f32 %v536_v58  ;;  %v542_v61 = vmul.f32 1.442695, %v531_v59  ;;  %v529_v62 = vsub.f32 %v476_v34, %v509_v60 }
 0x19e   : > { %2314 = vpow2.f32 %v542_v61  ;;  %v538_v63 = vmul.f32 1.442695, %v529_v62 }
 0x19f   : > { %v524_v0 = vpop.xlane.xlu0 %523 }
 0x1a0   : > { %2316 = vpow2.f32 %v538_v63  ;;  %v534_v1 = vsub.f32 %v497_v38, %v524_v0 }
 0x1a1   : > { %v527_v2 = vpop.xlane.xlu1 %526 }
 0x1a2   : > { %v548_v3 = vmul.f32 1.442695, %v534_v1  ;;  %v535_v4 = vsub.f32 %v500_v46, %v527_v2 }
 0x1a3   : > { %v518_v5 = vpop.xlane.xlu0 %517 }
 0x1a4   : > { %2318 = vpow2.f32 %v548_v3  ;;  %v550_v6 = vmul.f32 1.442695, %v535_v4  ;;  %v532_v7 = vsub.f32 %v489_v42, %v518_v5 }
 0x1a5   : > { %v521_v10 = vpop.xlane.xlu1 %520 }
 0x1a6   : > { %2320 = vpow2.f32 %v550_v6  ;;  %v544_v12 = vmul.f32 1.442695, %v532_v7  ;;  %v533_v14 = vsub.f32 %v492_v48, %v521_v10 }
 0x1a7   : > { %v2638_v16 = vpop.eup %2310  ;;  %v603_v20 = vpop.permute.xlu0 %602 }
 0x1a8   : > { %2322 = vpow2.f32 %v544_v12  ;;  %v546_v21 = vmul.f32 1.442695, %v533_v14  ;;  %v558_v22 = vsel %vm503_vm1, %v2638_v16, 0.0  ;;  %2080 = vmatprep.subr.bf16.mxu1 %v603_v20 }
 0x1a9   : > { %v2642_v23 = vpop.eup %2312  ;;  %559 = vadd.xlane.f32.xlu0 %v558_v22  ;;  %2081 = vmatpush3.bf16.msra.mxu1 %v603_v20  ;;  %v601_v24 = vpop.permute.xlu1 %600 }
 0x1aa   : > { %2324 = vpow2.f32 %v546_v21  ;;  %2082 = vmatprep.subr.bf16.mxu1 %v601_v24  ;;  %v552_v27 = vsel %vm503_vm1, %v2642_v23, 0.0 }
 0x1ab   : > { %v2315_v25 = vpop.eup %2314 }
 0x1ac   : > { %v561_v26 = vsel %vm503_vm1, %v2315_v25, 0.0 }
 0x1ad   : > { %v2317_v28 = vpop.eup %2316  ;;  %562 = vadd.xlane.f32.xlu1 %v561_v26  ;;  %553 = vadd.xlane.f32.xlu0 %v552_v27  ;;  %v599_v29 = vpop.permute.xlu1 %598 }
 0x1ae   : > { %2083 = vmatpush3.bf16.msra.mxu1 %v601_v24  ;;  %v555_v30 = vsel %vm503_vm1, %v2317_v28, 0.0 }
 0x1af   : > { %2084 = vmatprep.subr.bf16.mxu1 %v599_v29 }
 0x1b1   : > { %v2648_v31 = vpop.eup %2318  ;;  %556 = vadd.xlane.f32.xlu1 %v555_v30  ;;  %v597_v32 = vpop.permute.xlu1 %596 }
 0x1b2   : > { %v570_v33 = vsel %vm503_vm1, %v2648_v31, 0.0  ;;  %2085 = vmatpush3.bf16.msra.mxu1 %v599_v29 }
 0x1b3   : > { %v2321_v34 = vpop.eup %2320  ;;  %571 = vadd.xlane.f32.xlu0 %v570_v33  ;;  %2086 = vmatprep.subr.bf16.mxu1 %v597_v32  ;;  %v1925_v33 = vld [vmem:[%s3081_s2 + $0x40] sm:$0xff] }
 0x1b4   : > { %v573_v36 = vsel %vm503_vm1, %v2321_v34, 0.0 }
 0x1b5   : > { %v2323_v35 = vpop.eup %2322 }
 0x1b6   : > { %v564_v37 = vsel %vm503_vm1, %v2323_v35, 0.0  ;;  %2087 = vmatpush3.bf16.msra.mxu1 %v597_v32 }
 0x1b7   : > { %v2325_v38 = vpop.eup %2324  ;;  %574 = vadd.xlane.f32.xlu0 %v573_v36  ;;  %565 = vadd.xlane.f32.xlu1 %v564_v37 }
 0x1b8   : > { %v567_v39 = vsel %vm503_vm1, %v2325_v38, 0.0 }
 0x1bb   : > { %568 = vadd.xlane.f32.xlu0 %v567_v39 }
 0x1c8   : > { %706 = vrot.lane.b32.xlu1 %v2558_v9, %s2473_s17 }
 0x1cc   : > { %704 = vrot.lane.b32.xlu1 %v2574_v13, %s2473_s17 }
 0x1d0   : > { %702 = vrot.lane.b32.xlu1 %v2581_v15, %s2473_s17 }
 0x1d1   : > { %708 = vrot.lane.b32.xlu0 %v2555_v8, %s2473_s17 }
 0x1d4   : > { %696 = vrot.lane.b32.xlu1 %v2588_v17, %s2473_s17 }
 0x1d5   : > { %694 = vrot.lane.b32.xlu0 %v2567_v11, %s2473_s17 }
 0x1d8   : > { %700 = vrot.lane.b32.xlu1 %v2598_v19, %s2473_s17 }
 0x1d9   : > { %698 = vrot.lane.b32.xlu0 %v2591_v18, %s2473_s17 }
 0x232   : > { %v560_v40 = vpop.xlane.xlu0 %559 }
 0x236   : > { %v563_v41 = vpop.xlane.xlu1 %562  ;;  %v554_v42 = vpop.xlane.xlu0 %553 }
 0x237   : > { %2326 = vrcp.f32 %v563_v41  ;;  %v1928_v41 = vld [vmem:[%s3081_s2 + $0x58] sm:$0xff] }
 0x238   : > { %2328 = vrcp.f32 %v554_v42 }
 0x239   : > { %2330 = vrcp.f32 %v560_v40 }
 0x23a   : > { %v557_v43 = vpop.xlane.xlu1 %556 }
 0x23b   : > { %2332 = vrcp.f32 %v557_v43 }
 0x23c   : > { %v572_v44 = vpop.xlane.xlu0 %571 }
 0x240   : > { %v566_v45 = vpop.xlane.xlu1 %565  ;;  %v575_v46 = vpop.xlane.xlu0 %574 }
 0x241   : > { %2334 = vrcp.f32 %v575_v46 }
 0x242   : > { %2336 = vrcp.f32 %v566_v45 }
 0x243   : > { %2338 = vrcp.f32 %v572_v44  ;;  %v1931_v44 = vld [vmem:[%s3081_s2 + $0x70] sm:$0xff] }
 0x244   : > { %v569_v47 = vpop.xlane.xlu0 %568  ;;  %v2327_v48 = vpop.eup %2326 }
 0x245   : > { %2340 = vrcp.f32 %v569_v47  ;;  %v2329_v49 = vpop.eup %2328  ;;  %v587_v53 = vmul.f32 %v2327_v48, %v2315_v25  ;;  %v707_v60 = vpop.permute.xlu1 %706 }
 0x246   : > { %v2331_v50 = vpop.eup %2330  ;;  %v584_v54 = vmul.f32 %v2329_v49, %v2642_v23  ;;  %v729_v4 = vsel %vm413_vm0, %v707_v60, 0 }
 0x247   : > { %v586_v56 = vmul.f32 %v2331_v50, %v2638_v16  ;;  %v1932_v50 = vld [vmem:[%s3081_s2 + $0x78] sm:$0xff] }
 0x248   : > { %v2333_v51 = vpop.eup %2332  ;;  %v709_v52 = vpop.permute.xlu0 %708 }
 0x249   : > { %v585_v55 = vmul.f32 %v2333_v51, %v2317_v28  ;;  %2196 = vmatprep.subr.msk.bf16.mxu1 %vm413_vm0, %v709_v52  ;;  %v732_v58 = vsel %vm413_vm0, %v709_v52, 0  ;;  %v593_v59 = vpack.c.bf16 %v587_v53, %v586_v56  ;;  %v705_v7 = vpop.permute.xlu1 %704  ;;  %v1929_v52 = vld [vmem:[%s3081_s2 + $0x60] sm:$0xff] }
 0x24a   : > { %v726_v14 = vsel %vm413_vm0, %v705_v7, 0 }
 0x24b   : > { %v592_v57 = vpack.c.bf16 %v585_v55, %v584_v54  ;;  %v1930_v54 = vld [vmem:[%s3081_s2 + $0x68] sm:$0xff] }
 0x24c   : > { %v695_v12 = vpop.permute.xlu0 %694 }
 0x24d   : > { %2088 = vmatprep.mubr.msk.bf16.mxu1 %vm503_vm1, %v592_v57  ;;  %v703_v16 = vpop.permute.xlu1 %702 }
 0x24e   : > { %2089 = vmatmul.mubr.msk.bf16.vlgmr.msra.gmra.mxu1 %vm503_vm1, %v593_v59  ;;  %v2335_v61 = vpop.eup %2334  ;;  %v723_v20 = vsel %vm413_vm0, %v703_v16, 0 }
 0x24f   : > { %2097 = vmatpush3.bf16.xpose.msra.mxu1 %v732_v58  ;;  %v2337_v62 = vpop.eup %2336  ;;  %v591_v1 = vmul.f32 %v2335_v61, %v2321_v34  ;;  %v1927_v34 = vld [vmem:[%s3081_s2 + $0x50] sm:$0xff] }
 0x250   : > { %2197 = vmatprep.subr.msk.bf16.mxu1 %vm413_vm0, %v707_v60  ;;  %v2339_v63 = vpop.eup %2338  ;;  %v588_v2 = vmul.f32 %v2337_v62, %v2323_v35  ;;  %v699_v22 = vpop.permute.xlu0 %698 }
 0x251   : > { %v590_v5 = vmul.f32 %v2339_v63, %v2648_v31  ;;  %v697_v21 = vpop.permute.xlu1 %696 }
 0x252   : > { %v2341_v0 = vpop.eup %2340 }
 0x253   : > { %v589_v3 = vmul.f32 %v2341_v0, %v2325_v38  ;;  %v595_v10 = vpack.c.bf16 %v591_v1, %v590_v5  ;;  %v1926_v38 = vld [vmem:[%s3081_s2 + $0x48] sm:$0xff] }
 0x255   : > { %v594_v6 = vpack.c.bf16 %v589_v3, %v588_v2  ;;  %v701_v23 = vpop.permute.xlu1 %700 }
 0x257   : > { %2099 = vmatpush3.bf16.xpose.msra.mxu1 %v729_v4  ;;  %2092 = vmatprep.mubr.msk.bf16.mxu1 %vm503_vm1, %v594_v6 }
 0x258   : > { %2093 = vmatmul.mubr.msk.bf16.gmra.mxu1 %vm503_vm1, %v595_v10  ;;  %2198 = vmatprep.subr.msk.bf16.mxu1 %vm413_vm0, %v705_v7 }
 0x259   : > { %2104 = vmatprep.mubr.msk.bf16.mxu1 %vm413_vm0, %v695_v12 }
 0x25f   : > { %2101 = vmatpush3.bf16.xpose.msra.mxu1 %v726_v14 }
 0x260   : > { %2199 = vmatprep.subr.msk.bf16.mxu1 %vm413_vm0, %v703_v16 }
 0x267   : > { %2103 = vmatpush3.bf16.xpose.msra.mxu1 %v723_v20 }
 0x26e   : > { %2105 = vmatmul.mubr.msk.bf16.vlgmr.msra.gmra.mxu1 %vm413_vm0, %v697_v21 }
 0x26f   : > { %2108 = vmatprep.mubr.msk.bf16.mxu1 %vm413_vm0, %v699_v22 }
 0x276   : > { %2109 = vmatmul.mubr.msk.bf16.gmra.mxu1 %vm413_vm0, %v701_v23 }
 0x30e   : > { %v2682_v24 = vpop.f32.mrf.mxu1 }
 0x310   : > { %v2684_v25 = vpop.f32.mrf.mxu1 }
 0x312   : > { %v2686_v26 = vpop.f32.mrf.mxu1 }
 0x314   : > { %v2688_v27 = vpop.f32.mrf.mxu1 }
 0x318   : > { %v2690_v28 = vpop.f32.mrf.mxu1 }
 0x31a   : > { %v2692_v29 = vpop.f32.mrf.mxu1 }
 0x31c   : > { %v2694_v30 = vpop.f32.mrf.mxu1 }
 0x31e   : > { %v2696_v31 = vpop.f32.mrf.mxu1 }
 0x32e   : > { %v2106_v32 = vpop.f32.mrf.mxu1 }
 0x32f   : > { %v777_v39 = vadd.f32 %v2106_v32, %v1927_v34 }
 0x330   : > { %v768_v35 = vpop.f32.mrf.mxu1 }
 0x331   : > { %v769_v36 = vadd.f32 %v1925_v33, %v768_v35  ;;  %v805_v48 = vsel %vm503_vm1, %v777_v39, -inf }
 0x332   : > { %v2107_v37 = vpop.f32.mrf.mxu1 }
 0x333   : > { %v799_v40 = vsel %vm503_vm1, %v769_v36, -inf  ;;  %v780_v46 = vadd.f32 %v2107_v37, %v1928_v41 }
 0x334   : > { %v771_v42 = vpop.f32.mrf.mxu1  ;;  %800 = vmax.xlane.f32.xlu0 %v799_v40 }
 0x335   : > { %v772_v43 = vadd.f32 %v1926_v38, %v771_v42  ;;  %v808_v56 = vsel %vm503_vm1, %v780_v46, -inf }
 0x336   : > { %v2110_v45 = vpop.f32.mrf.mxu1 }
 0x337   : > { %v802_v47 = vsel %vm503_vm1, %v772_v43, -inf  ;;  %v793_v51 = vadd.f32 %v2110_v45, %v1931_v44 }
 0x338   : > { %803 = vmax.xlane.f32.xlu1 %v802_v47  ;;  %806 = vmax.xlane.f32.xlu0 %v805_v48  ;;  %v784_v49 = vpop.f32.mrf.mxu1 }
 0x339   : > { %v785_v58 = vadd.f32 %v1929_v52, %v784_v49  ;;  %v817_v61 = vsel %vm503_vm1, %v793_v51, -inf }
 0x33a   : > { %v2111_v53 = vpop.f32.mrf.mxu1 }
 0x33b   : > { %v796_v55 = vadd.f32 %v2111_v53, %v1932_v50  ;;  %v811_v63 = vsel %vm503_vm1, %v785_v58, -inf }
 0x33c   : > { %809 = vmax.xlane.f32.xlu0 %v808_v56  ;;  %v787_v57 = vpop.f32.mrf.mxu1 }
 0x33d   : > { %v820_v59 = vsel %vm503_vm1, %v796_v55, -inf  ;;  %v788_v60 = vadd.f32 %v1930_v54, %v787_v57 }
 0x33e   : > { %821 = vmax.xlane.f32.xlu1 %v820_v59 }
 0x33f   : > { %v814_v62 = vsel %vm503_vm1, %v788_v60, -inf }
 0x340   : > { %818 = vmax.xlane.f32.xlu0 %v817_v61 }
 0x342   : > { %815 = vmax.xlane.f32.xlu1 %v814_v62 }
 0x344   : > { %812 = vmax.xlane.f32.xlu0 %v811_v63 }
 0x353   : > { %895 = vrot.lane.b32.xlu1 %v2558_v9, %s2474_s8 }
 0x357   : > { %893 = vrot.lane.b32.xlu1 %v2574_v13, %s2474_s8 }
 0x35a   : > { %897 = vrot.lane.b32.xlu0 %v2555_v8, %s2474_s8 }
 0x35b   : > { %891 = vrot.lane.b32.xlu1 %v2581_v15, %s2474_s8 }
 0x3bd   : > { %v801_v0 = vpop.xlane.xlu0 %800 }
 0x3be   : > { %v823_v1 = vsub.f32 %v769_v36, %v801_v0 }
 0x3c0   : > { %v831_v7 = vmul.f32 1.442695, %v823_v1 }
 0x3c1   : > { %v804_v2 = vpop.xlane.xlu1 %803  ;;  %v807_v3 = vpop.xlane.xlu0 %806 }
 0x3c2   : > { %v825_v4 = vsub.f32 %v777_v39, %v807_v3  ;;  %v824_v5 = vsub.f32 %v772_v43, %v804_v2 }
 0x3c4   : > { %v835_v6 = vmul.f32 1.442695, %v825_v4  ;;  %v833_v16 = vmul.f32 1.442695, %v824_v5 }
 0x3c5   : > { %v810_v10 = vpop.xlane.xlu0 %809 }
 0x3c6   : > { %v826_v12 = vsub.f32 %v780_v46, %v810_v10  ;;  %2342 = vpow2.f32 %v835_v6 }
 0x3c7   : > { %v822_v14 = vpop.xlane.xlu1 %821  ;;  %2344 = vpow2.f32 %v831_v7 }
 0x3c8   : > { %v837_v20 = vmul.f32 1.442695, %v826_v12  ;;  %v830_v21 = vsub.f32 %v796_v55, %v822_v14 }
 0x3c9   : > { %v819_v22 = vpop.xlane.xlu0 %818 }
 0x3ca   : > { %2346 = vpow2.f32 %v837_v20  ;;  %v829_v23 = vsub.f32 %v793_v51, %v819_v22  ;;  %v845_v34 = vmul.f32 1.442695, %v830_v21 }
 0x3cb   : > { %v816_v32 = vpop.xlane.xlu1 %815  ;;  %2348 = vpow2.f32 %v833_v16 }
 0x3cc   : > { %v843_v33 = vmul.f32 1.442695, %v829_v23  ;;  %v828_v35 = vsub.f32 %v788_v60, %v816_v32 }
 0x3cd   : > { %v813_v36 = vpop.xlane.xlu0 %812 }
 0x3ce   : > { %2350 = vpow2.f32 %v843_v33  ;;  %v827_v37 = vsub.f32 %v785_v58, %v813_v36  ;;  %v841_v40 = vmul.f32 1.442695, %v828_v35 }
 0x3cf   : > { %v896_v38 = vpop.permute.xlu1 %895  ;;  %2352 = vpow2.f32 %v845_v34 }
 0x3d0   : > { %v839_v39 = vmul.f32 1.442695, %v827_v37 }
 0x3d1   : > { %v898_v41 = vpop.permute.xlu0 %897 }
 0x3d2   : > { %2354 = vpow2.f32 %v839_v39  ;;  %2112 = vmatprep.subr.bf16.mxu0 %v898_v41 }
 0x3d3   : > { %2113 = vmatpush3.bf16.msra.mxu0 %v898_v41  ;;  %v894_v42 = vpop.permute.xlu1 %893  ;;  %v2734_v43 = vpop.eup %2342  ;;  %2356 = vpow2.f32 %v841_v40 }
 0x3d4   : > { %2114 = vmatprep.subr.bf16.mxu0 %v896_v38  ;;  %v853_v44 = vsel %vm503_vm1, %v2734_v43, 0.0  ;;  %v2345_v45 = vpop.eup %2344 }
 0x3d5   : > { %854 = vadd.xlane.f32.xlu0 %v853_v44  ;;  %v847_v49 = vsel %vm503_vm1, %v2345_v45, 0.0 }
 0x3d7   : > { %v2347_v46 = vpop.eup %2346  ;;  %2115 = vmatpush3.bf16.msra.mxu0 %v896_v38  ;;  %v892_v50 = vpop.permute.xlu1 %891 }
 0x3d8   : > { %v856_v47 = vsel %vm503_vm1, %v2347_v46, 0.0  ;;  %2116 = vmatprep.subr.bf16.mxu0 %v894_v42  ;;  %v2349_v48 = vpop.eup %2348 }
 0x3d9   : > { %857 = vadd.xlane.f32.xlu1 %v856_v47  ;;  %848 = vadd.xlane.f32.xlu0 %v847_v49  ;;  %v850_v52 = vsel %vm503_vm1, %v2349_v48, 0.0 }
 0x3db   : > { %v2740_v51 = vpop.eup %2350  ;;  %2117 = vmatpush3.bf16.msra.mxu0 %v894_v42 }
 0x3dc   : > { %v865_v53 = vsel %vm503_vm1, %v2740_v51, 0.0  ;;  %2118 = vmatprep.subr.bf16.mxu0 %v892_v50  ;;  %v2353_v54 = vpop.eup %2352 }
 0x3dd   : > { %851 = vadd.xlane.f32.xlu1 %v850_v52  ;;  %866 = vadd.xlane.f32.xlu0 %v865_v53  ;;  %v868_v57 = vsel %vm503_vm1, %v2353_v54, 0.0 }
 0x3df   : > { %v2355_v55 = vpop.eup %2354  ;;  %2119 = vmatpush3.bf16.msra.mxu0 %v892_v50 }
 0x3e0   : > { %v859_v56 = vsel %vm503_vm1, %v2355_v55, 0.0  ;;  %v2357_v58 = vpop.eup %2356 }
 0x3e1   : > { %860 = vadd.xlane.f32.xlu1 %v859_v56  ;;  %869 = vadd.xlane.f32.xlu0 %v868_v57  ;;  %v862_v59 = vsel %vm503_vm1, %v2357_v58, 0.0 }
 0x3e5   : > { %863 = vadd.xlane.f32.xlu0 %v862_v59 }
 0x3f2   : > { %1001 = vrot.lane.b32.xlu1 %v2558_v9, %s2475_s9 }
 0x3f6   : > { %999 = vrot.lane.b32.xlu1 %v2574_v13, %s2475_s9 }
 0x3fa   : > { %997 = vrot.lane.b32.xlu1 %v2581_v15, %s2475_s9 }
 0x3fb   : > { %1003 = vrot.lane.b32.xlu0 %v2555_v8, %s2475_s9 }
 0x3fe   : > { %991 = vrot.lane.b32.xlu1 %v2588_v17, %s2475_s9 }
 0x3ff   : > { %989 = vrot.lane.b32.xlu0 %v2567_v11, %s2475_s9 }
 0x402   : > { %995 = vrot.lane.b32.xlu1 %v2598_v19, %s2475_s9 }
 0x403   : > { %993 = vrot.lane.b32.xlu0 %v2591_v18, %s2475_s9 }
 0x45e   : > { %v855_v60 = vpop.xlane.xlu0 %854 }
 0x462   : > { %v858_v61 = vpop.xlane.xlu1 %857  ;;  %v849_v62 = vpop.xlane.xlu0 %848 }
 0x463   : > { %2358 = vrcp.f32 %v858_v61  ;;  %v1941_v61 = vld [vmem:[%s3081_s2 + $0x80] sm:$0xff] }
 0x464   : > { %2360 = vrcp.f32 %v849_v62  ;;  %v1943_v62 = vld [vmem:[%s3081_s2 + $0x90] sm:$0xff] }
 0x465   : > { %2362 = vrcp.f32 %v855_v60 }
 0x466   : > { %v852_v63 = vpop.xlane.xlu1 %851  ;;  %v867_v0 = vpop.xlane.xlu0 %866 }
 0x467   : > { %2364 = vrcp.f32 %v852_v63 }
 0x46a   : > { %v861_v1 = vpop.xlane.xlu1 %860  ;;  %v870_v2 = vpop.xlane.xlu0 %869 }
 0x46b   : > { %2366 = vrcp.f32 %v870_v2  ;;  %v1942_v2 = vld [vmem:[%s3081_s2 + $0x88] sm:$0xff] }
 0x46c   : > { %2368 = vrcp.f32 %v861_v1 }
 0x46d   : > { %2370 = vrcp.f32 %v867_v0 }
 0x46e   : > { %v864_v17 = vpop.xlane.xlu0 %863  ;;  %v1002_v20 = vpop.permute.xlu1 %1001 }
 0x46f   : > { %2372 = vrcp.f32 %v864_v17  ;;  %v1024_v38 = vsel %vm413_vm0, %v1002_v20, 0 }
 0x470   : > { %v2359_v11 = vpop.eup %2358 }
 0x471   : > { %v2361_v19 = vpop.eup %2360  ;;  %v882_v5 = vmul.f32 %v2359_v11, %v2347_v46 }
 0x472   : > { %v2363_v3 = vpop.eup %2362  ;;  %v1004_v18 = vpop.permute.xlu0 %1003  ;;  %v879_v6 = vmul.f32 %v2361_v19, %v2345_v45  ;;  %v1944_v19 = vld [vmem:[%s3081_s2 + $0x98] sm:$0xff] }
 0x473   : > { %2200 = vmatprep.subr.msk.bf16.mxu0 %vm413_vm0, %v1004_v18  ;;  %v881_v10 = vmul.f32 %v2363_v3, %v2734_v43  ;;  %v1027_v16 = vsel %vm413_vm0, %v1004_v18, 0  ;;  %v1000_v41 = vpop.permute.xlu1 %999 }
 0x474   : > { %v2365_v4 = vpop.eup %2364  ;;  %v1021_v42 = vsel %vm413_vm0, %v1000_v41, 0 }
 0x475   : > { %v880_v7 = vmul.f32 %v2365_v4, %v2349_v48  ;;  %v888_v14 = vpack.c.bf16 %v882_v5, %v881_v10  ;;  %v1947_v4 = vld [vmem:[%s3081_s2 + $0xb0] sm:$0xff] }
 0x476   : > { %v990_v40 = vpop.permute.xlu0 %989 }
 0x477   : > { %v887_v12 = vpack.c.bf16 %v880_v7, %v879_v6  ;;  %v998_v43 = vpop.permute.xlu1 %997 }
 0x478   : > { %v2367_v21 = vpop.eup %2366  ;;  %v1018_v44 = vsel %vm413_vm0, %v998_v43, 0 }
 0x479   : > { %2120 = vmatprep.mubr.msk.bf16.mxu0 %vm503_vm1, %v887_v12  ;;  %v2369_v22 = vpop.eup %2368  ;;  %v886_v33 = vmul.f32 %v2367_v21, %v2353_v54 }
 0x47a   : > { %2121 = vmatmul.mubr.msk.bf16.vlgmr.msra.gmra.mxu0 %vm503_vm1, %v888_v14  ;;  %v2371_v23 = vpop.eup %2370  ;;  %v883_v34 = vmul.f32 %v2369_v22, %v2355_v55  ;;  %v994_v46 = vpop.permute.xlu0 %993  ;;  %v1948_v14 = vld [vmem:[%s3081_s2 + $0xb8] sm:$0xff]  ;;  %v1946_v22 = vld [vmem:[%s3081_s2 + $0xa8] sm:$0xff] }
 0x47b   : > { %2129 = vmatpush3.bf16.xpose.msra.mxu0 %v1027_v16  ;;  %v885_v36 = vmul.f32 %v2371_v23, %v2740_v51  ;;  %v992_v45 = vpop.permute.xlu1 %991 }
 0x47c   : > { %2201 = vmatprep.subr.msk.bf16.mxu0 %vm413_vm0, %v1002_v20  ;;  %v2373_v32 = vpop.eup %2372  ;;  %v1945_v20 = vld [vmem:[%s3081_s2 + $0xa0] sm:$0xff] }
 0x47d   : > { %v884_v35 = vmul.f32 %v2373_v32, %v2357_v58  ;;  %v890_v39 = vpack.c.bf16 %v886_v33, %v885_v36 }
 0x47f   : > { %v889_v37 = vpack.c.bf16 %v884_v35, %v883_v34  ;;  %v996_v47 = vpop.permute.xlu1 %995 }
 0x481   : > { %2124 = vmatprep.mubr.msk.bf16.mxu0 %vm503_vm1, %v889_v37 }
 0x482   : > { %2125 = vmatmul.mubr.msk.bf16.gmra.mxu0 %vm503_vm1, %v890_v39 }
 0x483   : > { %2131 = vmatpush3.bf16.xpose.msra.mxu0 %v1024_v38  ;;  %2136 = vmatprep.mubr.msk.bf16.mxu0 %vm413_vm0, %v990_v40 }
 0x484   : > { %2202 = vmatprep.subr.msk.bf16.mxu0 %vm413_vm0, %v1000_v41 }
 0x48b   : > { %2133 = vmatpush3.bf16.xpose.msra.mxu0 %v1021_v42 }
 0x48c   : > { %2203 = vmatprep.subr.msk.bf16.mxu0 %vm413_vm0, %v998_v43 }
 0x493   : > { %2135 = vmatpush3.bf16.xpose.msra.mxu0 %v1018_v44 }
 0x49a   : > { %2137 = vmatmul.mubr.msk.bf16.vlgmr.msra.gmra.mxu0 %vm413_vm0, %v992_v45 }
 0x49b   : > { %2140 = vmatprep.mubr.msk.bf16.mxu0 %vm413_vm0, %v994_v46 }
 0x4a2   : > { %2141 = vmatmul.mubr.msk.bf16.gmra.mxu0 %vm413_vm0, %v996_v47 }
 0x53a   : > { %v2774_v48 = vpop.f32.mrf.mxu0 }
 0x53c   : > { %v2776_v49 = vpop.f32.mrf.mxu0 }
 0x53e   : > { %v2778_v50 = vpop.f32.mrf.mxu0 }
 0x53f   : > { %v2247_v51 = vpack.i.bf16 %v2778_v50, %v2774_v48 }
 0x540   : > { %v2782_v52 = vpop.f32.mrf.mxu0 }
 0x541   : > { %v2242_v53 = vpack.i.bf16 %v2782_v52, %v2776_v49 }
 0x542   : > { %v2786_v54 = vpop.f32.mrf.mxu0 }
 0x544   : > { %v2788_v55 = vpop.f32.mrf.mxu0 }
 0x546   : > { %v2790_v56 = vpop.f32.mrf.mxu0 }
 0x547   : > { %v2257_v57 = vpack.i.bf16 %v2790_v56, %v2786_v54 }
 0x548   : > { %v2794_v58 = vpop.f32.mrf.mxu0 }
 0x549   : > { %v2252_v59 = vpack.i.bf16 %v2794_v58, %v2788_v55 }
 0x55a   : > { %v2138_v60 = vpop.f32.mrf.mxu0 }
 0x55b   : > { %v1072_v17 = vadd.f32 %v2138_v60, %v1943_v62 }
 0x55c   : > { %v1063_v63 = vpop.f32.mrf.mxu0 }
 0x55d   : > { %v1064_v0 = vadd.f32 %v1941_v61, %v1063_v63  ;;  %v1100_v10 = vsel %vm503_vm1, %v1072_v17, -inf }
 0x55e   : > { %v2139_v1 = vpop.f32.mrf.mxu0 }
 0x55f   : > { %v1094_v11 = vsel %vm503_vm1, %v1064_v0, -inf  ;;  %v1075_v6 = vadd.f32 %v2139_v1, %v1944_v19 }
 0x560   : > { %v1066_v3 = vpop.f32.mrf.mxu0  ;;  %1095 = vmax.xlane.f32.xlu0 %v1094_v11 }
 0x561   : > { %v1067_v18 = vadd.f32 %v1942_v2, %v1066_v3  ;;  %v1103_v32 = vsel %vm503_vm1, %v1075_v6, -inf }
 0x562   : > { %v2142_v5 = vpop.f32.mrf.mxu0 }
 0x563   : > { %v1097_v7 = vsel %vm503_vm1, %v1067_v18, -inf  ;;  %v1088_v16 = vadd.f32 %v2142_v5, %v1947_v4 }
 0x564   : > { %1098 = vmax.xlane.f32.xlu1 %v1097_v7  ;;  %1101 = vmax.xlane.f32.xlu0 %v1100_v10  ;;  %v1079_v12 = vpop.f32.mrf.mxu0 }
 0x565   : > { %v1080_v34 = vadd.f32 %v1945_v20, %v1079_v12  ;;  %v1112_v37 = vsel %vm503_vm1, %v1088_v16, -inf }
 0x566   : > { %v2143_v21 = vpop.f32.mrf.mxu0 }
 0x567   : > { %v1091_v23 = vadd.f32 %v2143_v21, %v1948_v14  ;;  %v1106_v39 = vsel %vm503_vm1, %v1080_v34, -inf }
 0x568   : > { %1104 = vmax.xlane.f32.xlu0 %v1103_v32  ;;  %v1082_v33 = vpop.f32.mrf.mxu0 }
 0x569   : > { %v1115_v35 = vsel %vm503_vm1, %v1091_v23, -inf  ;;  %v1083_v36 = vadd.f32 %v1946_v22, %v1082_v33 }
 0x56a   : > { %1116 = vmax.xlane.f32.xlu1 %v1115_v35 }
 0x56b   : > { %v1109_v38 = vsel %vm503_vm1, %v1083_v36, -inf }
 0x56c   : > { %1113 = vmax.xlane.f32.xlu0 %v1112_v37 }
 0x56e   : > { %1110 = vmax.xlane.f32.xlu1 %v1109_v38 }
 0x570   : > { %1107 = vmax.xlane.f32.xlu0 %v1106_v39 }
 0x57f   : > { %1190 = vrot.lane.b32.xlu1 %v2558_v9, %s2476_s5 }
 0x583   : > { %1188 = vrot.lane.b32.xlu1 %v2574_v13, %s2476_s5 }
 0x586   : > { %1192 = vrot.lane.b32.xlu0 %v2555_v8, %s2476_s5 }
 0x587   : > { %1186 = vrot.lane.b32.xlu1 %v2581_v15, %s2476_s5 }
 0x5e9   : > { %v1096_v40 = vpop.xlane.xlu0 %1095 }
 0x5ea   : > { %v1118_v41 = vsub.f32 %v1064_v0, %v1096_v40  ;;  %v2864_v40 = vld [vmem:[%s2552_s20 + $0x10] sm:$0xff]  }
 0x5ec   : > { %v1126_v47 = vmul.f32 1.442695, %v1118_v41  ;;  %v2868_v41 = vld [vmem:[%s2552_s20 + $0x8] sm:$0xff]  }
 0x5ed   : > { %v1099_v42 = vpop.xlane.xlu1 %1098  ;;  %v1102_v43 = vpop.xlane.xlu0 %1101 }
 0x5ee   : > { %v1120_v44 = vsub.f32 %v1072_v17, %v1102_v43  ;;  %v1119_v45 = vsub.f32 %v1067_v18, %v1099_v42  ;;  %v2872_v42 = vld [vmem:[%s2552_s20] sm:$0xff]   ;;  %v2876_v43 = vld [vmem:[%s2552_s20 + $0x18] sm:$0xff]  }
 0x5f0   : > { %v1130_v46 = vmul.f32 1.442695, %v1120_v44  ;;  %v1128_v63 = vmul.f32 1.442695, %v1119_v45  ;;  %v2442_v44 = vld [vmem:[%s2530_s21 + $0x8] sm:$0xff]   ;;  %v2443_v45 = vld [vmem:[%s2530_s21] sm:$0xff]  }
 0x5f1   : > { %v1105_v60 = vpop.xlane.xlu0 %1104 }
 0x5f2   : > { %v1121_v61 = vsub.f32 %v1075_v6, %v1105_v60  ;;  %2374 = vpow2.f32 %v1130_v46  ;;  %v2444_v46 = vld [vmem:[%s2530_s21 + $0x18] sm:$0xff]  }
 0x5f3   : > { %v1117_v62 = vpop.xlane.xlu1 %1116  ;;  %2376 = vpow2.f32 %v1126_v47  ;;  %v2445_v47 = vld [vmem:[%s2530_s21 + $0x10] sm:$0xff]  }
 0x5f4   : > { %v1132_v9 = vmul.f32 1.442695, %v1121_v61  ;;  %v1125_v13 = vsub.f32 %v1091_v23, %v1117_v62 }
 0x5f5   : > { %v1114_v1 = vpop.xlane.xlu0 %1113 }
 0x5f6   : > { %2378 = vpow2.f32 %v1132_v9  ;;  %v1124_v8 = vsub.f32 %v1088_v16, %v1114_v1  ;;  %v1140_v2 = vmul.f32 1.442695, %v1125_v13 }
 0x5f7   : > { %v1111_v15 = vpop.xlane.xlu1 %1110  ;;  %2380 = vpow2.f32 %v1128_v63 }
 0x5f8   : > { %v1138_v0 = vmul.f32 1.442695, %v1124_v8  ;;  %v1123_v11 = vsub.f32 %v1083_v36, %v1111_v15 }
 0x5f9   : > { %v1108_v17 = vpop.xlane.xlu0 %1107 }
 0x5fa   : > { %2382 = vpow2.f32 %v1138_v0  ;;  %v1122_v19 = vsub.f32 %v1080_v34, %v1108_v17  ;;  %v1136_v4 = vmul.f32 1.442695, %v1123_v11 }
 0x5fb   : > { %v1191_v3 = vpop.permute.xlu1 %1190  ;;  %2384 = vpow2.f32 %v1140_v2 }
 0x5fc   : > { %v1134_v18 = vmul.f32 1.442695, %v1122_v19 }
 0x5fd   : > { %v1193_v5 = vpop.permute.xlu0 %1192 }
 0x5fe   : > { %2386 = vpow2.f32 %v1134_v18  ;;  %2144 = vmatprep.subr.bf16.mxu1 %v1193_v5 }
 0x5ff   : > { %2145 = vmatpush3.bf16.msra.mxu1 %v1193_v5  ;;  %v1189_v6 = vpop.permute.xlu1 %1188  ;;  %v2834_v7 = vpop.eup %2374  ;;  %2388 = vpow2.f32 %v1136_v4 }
 0x600   : > { %2146 = vmatprep.subr.bf16.mxu1 %v1191_v3  ;;  %v1148_v10 = vsel %vm503_vm1, %v2834_v7, 0.0  ;;  %v2838_v12 = vpop.eup %2376 }
 0x601   : > { %1149 = vadd.xlane.f32.xlu0 %v1148_v10  ;;  %v1142_v21 = vsel %vm503_vm1, %v2838_v12, 0.0 }
 0x603   : > { %v2840_v14 = vpop.eup %2378  ;;  %2147 = vmatpush3.bf16.msra.mxu1 %v1191_v3  ;;  %v1187_v22 = vpop.permute.xlu1 %1186 }
 0x604   : > { %v1151_v16 = vsel %vm503_vm1, %v2840_v14, 0.0  ;;  %2148 = vmatprep.subr.bf16.mxu1 %v1189_v6  ;;  %v2844_v20 = vpop.eup %2380 }
 0x605   : > { %1152 = vadd.xlane.f32.xlu1 %v1151_v16  ;;  %1143 = vadd.xlane.f32.xlu0 %v1142_v21  ;;  %v1145_v32 = vsel %vm503_vm1, %v2844_v20, 0.0 }
 0x607   : > { %v2848_v23 = vpop.eup %2382  ;;  %2149 = vmatpush3.bf16.msra.mxu1 %v1189_v6 }
 0x608   : > { %v1160_v33 = vsel %vm503_vm1, %v2848_v23, 0.0  ;;  %2150 = vmatprep.subr.bf16.mxu1 %v1187_v22  ;;  %v2854_v34 = vpop.eup %2384 }
 0x609   : > { %1146 = vadd.xlane.f32.xlu1 %v1145_v32  ;;  %1161 = vadd.xlane.f32.xlu0 %v1160_v33  ;;  %v1163_v37 = vsel %vm503_vm1, %v2854_v34, 0.0 }
 0x60b   : > { %v2856_v35 = vpop.eup %2386  ;;  %2151 = vmatpush3.bf16.msra.mxu1 %v1187_v22 }
 0x60c   : > { %v1154_v36 = vsel %vm503_vm1, %v2856_v35, 0.0  ;;  %v2389_v38 = vpop.eup %2388 }
 0x60d   : > { %1155 = vadd.xlane.f32.xlu1 %v1154_v36  ;;  %1164 = vadd.xlane.f32.xlu0 %v1163_v37  ;;  %v1157_v39 = vsel %vm503_vm1, %v2389_v38, 0.0 }
 0x611   : > { %1158 = vadd.xlane.f32.xlu0 %v1157_v39 }
 0x61e   : > { %1296 = vrot.lane.b32.xlu1 %v2864_v40, %s2477_s6 }
 0x622   : > { %1294 = vrot.lane.b32.xlu1 %v2868_v41, %s2477_s6 }
 0x626   : > { %1292 = vrot.lane.b32.xlu1 %v2872_v42, %s2477_s6 }
 0x627   : > { %1298 = vrot.lane.b32.xlu0 %v2876_v43, %s2477_s6 }
 0x62a   : > { %1286 = vrot.lane.b32.xlu1 %v2442_v44, %s2477_s6 }
 0x62b   : > { %1284 = vrot.lane.b32.xlu0 %v2443_v45, %s2477_s6 }
 0x62e   : > { %1290 = vrot.lane.b32.xlu1 %v2444_v46, %s2477_s6 }
 0x62f   : > { %1288 = vrot.lane.b32.xlu0 %v2445_v47, %s2477_s6 }
 0x68a   : > { %v1150_v60 = vpop.xlane.xlu0 %1149 }
 0x68e   : > { %v1153_v61 = vpop.xlane.xlu1 %1152  ;;  %v1144_v62 = vpop.xlane.xlu0 %1143 }
 0x68f   : > { %2390 = vrcp.f32 %v1153_v61 }
 0x690   : > { %2392 = vrcp.f32 %v1144_v62 }
 0x691   : > { %2394 = vrcp.f32 %v1150_v60 }
 0x692   : > { %v1147_v63 = vpop.xlane.xlu1 %1146  ;;  %v1162_v9 = vpop.xlane.xlu0 %1161 }
 0x693   : > { %2396 = vrcp.f32 %v1147_v63 }
 0x696   : > { %v1156_v13 = vpop.xlane.xlu1 %1155  ;;  %v1165_v1 = vpop.xlane.xlu0 %1164 }
 0x697   : > { %2398 = vrcp.f32 %v1165_v1 }
 0x698   : > { %2400 = vrcp.f32 %v1156_v13 }
 0x699   : > { %2402 = vrcp.f32 %v1162_v9 }
 0x69a   : > { %v1159_v8 = vpop.xlane.xlu0 %1158  ;;  %v1297_v16 = vpop.permute.xlu1 %1296 }
 0x69b   : > { %2404 = vrcp.f32 %v1159_v8  ;;  %v1319_v37 = vsel %vm413_vm0, %v1297_v16, 0 }
 0x69c   : > { %v2391_v15 = vpop.eup %2390 }
 0x69d   : > { %v2393_v0 = vpop.eup %2392  ;;  %v1177_v19 = vmul.f32 %v2391_v15, %v2840_v14 }
 0x69e   : > { %v2395_v2 = vpop.eup %2394  ;;  %v1299_v11 = vpop.permute.xlu0 %1298  ;;  %v1174_v3 = vmul.f32 %v2393_v0, %v2838_v12 }
 0x69f   : > { %2204 = vmatprep.subr.msk.bf16.mxu1 %vm413_vm0, %v1299_v11  ;;  %v1176_v4 = vmul.f32 %v2395_v2, %v2834_v7  ;;  %v1322_v10 = vsel %vm413_vm0, %v1299_v11, 0  ;;  %v1295_v45 = vpop.permute.xlu1 %1294 }
 0x6a0   : > { %v2397_v17 = vpop.eup %2396 }
 0x6a1   : > { %v1175_v18 = vmul.f32 %v2397_v17, %v2844_v20  ;;  %v1183_v6 = vpack.c.bf16 %v1177_v19, %v1176_v4  ;;  %v1957_v19 = vld [vmem:[%s3081_s2 + $0xc0] sm:$0xff] }
 0x6a2   : > { %v1285_v44 = vpop.permute.xlu0 %1284 }
 0x6a3   : > { %v1182_v5 = vpack.c.bf16 %v1175_v18, %v1174_v3  ;;  %v1959_v3 = vld [vmem:[%s3081_s2 + $0xd0] sm:$0xff] }
 0x6a4   : > { %v2399_v21 = vpop.eup %2398 }
 0x6a5   : > { %2152 = vmatprep.mubr.msk.bf16.mxu1 %vm503_vm1, %v1182_v5  ;;  %v2401_v22 = vpop.eup %2400  ;;  %v1181_v20 = vmul.f32 %v2399_v21, %v2854_v34  ;;  %v1316_v34 = vsel %vm413_vm0, %v1295_v45, 0  ;;  %v1960_v21 = vld [vmem:[%s3081_s2 + $0xd8] sm:$0xff] }
 0x6a6   : > { %2153 = vmatmul.mubr.msk.bf16.vlgmr.msra.gmra.mxu1 %vm503_vm1, %v1183_v6  ;;  %v2403_v14 = vpop.eup %2402  ;;  %v1178_v7 = vmul.f32 %v2401_v22, %v2856_v35  ;;  %v1293_v35 = vpop.permute.xlu1 %1292  ;;  %v1958_v6 = vld [vmem:[%s3081_s2 + $0xc8] sm:$0xff] }
 0x6a7   : > { %2161 = vmatpush3.bf16.xpose.msra.mxu1 %v1322_v10  ;;  %v1180_v33 = vmul.f32 %v2403_v14, %v2848_v23  ;;  %v1313_v23 = vsel %vm413_vm0, %v1293_v35, 0  ;;  %v1289_v46 = vpop.permute.xlu0 %1288 }
 0x6a8   : > { %2205 = vmatprep.subr.msk.bf16.mxu1 %vm413_vm0, %v1297_v16  ;;  %v2405_v12 = vpop.eup %2404 }
 0x6a9   : > { %v1179_v32 = vmul.f32 %v2405_v12, %v2389_v38  ;;  %v1185_v39 = vpack.c.bf16 %v1181_v20, %v1180_v33  ;;  %v1961_v20 = vld [vmem:[%s3081_s2 + $0xe0] sm:$0xff] }
 0x6aa   : > { %v1287_v38 = vpop.permute.xlu1 %1286 }
 0x6ab   : > { %v1184_v36 = vpack.c.bf16 %v1179_v32, %v1178_v7 }
 0x6ad   : > { %2156 = vmatprep.mubr.msk.bf16.mxu1 %vm503_vm1, %v1184_v36 }
 0x6ae   : > { %2157 = vmatmul.mubr.msk.bf16.gmra.mxu1 %vm503_vm1, %v1185_v39  ;;  %v1291_v47 = vpop.permute.xlu1 %1290  ;;  %v1963_v39 = vld [vmem:[%s3081_s2 + $0xf0] sm:$0xff] }
 0x6af   : > { %2163 = vmatpush3.bf16.xpose.msra.mxu1 %v1319_v37  ;;  %2168 = vmatprep.mubr.msk.bf16.mxu1 %vm413_vm0, %v1285_v44  ;;  %v1964_v44 = vld [vmem:[%s3081_s2 + $0xf8] sm:$0xff] }
 0x6b0   : > { %2206 = vmatprep.subr.msk.bf16.mxu1 %vm413_vm0, %v1295_v45 }
 0x6b7   : > { %2165 = vmatpush3.bf16.xpose.msra.mxu1 %v1316_v34  ;;  %v1962_v34 = vld [vmem:[%s3081_s2 + $0xe8] sm:$0xff] }
 0x6b8   : > { %2207 = vmatprep.subr.msk.bf16.mxu1 %vm413_vm0, %v1293_v35 }
 0x6bf   : > { %2167 = vmatpush3.bf16.xpose.msra.mxu1 %v1313_v23 }
 0x6c6   : > { %2169 = vmatmul.mubr.msk.bf16.vlgmr.msra.gmra.mxu1 %vm413_vm0, %v1287_v38 }
 0x6c7   : > { %2172 = vmatprep.mubr.msk.bf16.mxu1 %vm413_vm0, %v1289_v46 }
 0x6ce   : > { %2173 = vmatmul.mubr.msk.bf16.gmra.mxu1 %vm413_vm0, %v1291_v47 }
 0x766   : > { %v2906_v60 = vpop.f32.mrf.mxu1 }
 0x768   : > { %v2908_v61 = vpop.f32.mrf.mxu1 }
 0x76a   : > { %v2910_v62 = vpop.f32.mrf.mxu1 }
 0x76b   : > { %v2267_v63 = vpack.i.bf16 %v2910_v62, %v2906_v60 }
 0x76c   : > { %v2914_v9 = vpop.f32.mrf.mxu1 }
 0x76d   : > { %v2262_v13 = vpack.i.bf16 %v2914_v9, %v2908_v61 }
 0x76e   : > { %v2918_v1 = vpop.f32.mrf.mxu1 }
 0x770   : > { %v2920_v8 = vpop.f32.mrf.mxu1 }
 0x772   : > { %v2922_v15 = vpop.f32.mrf.mxu1 }
 0x773   : > { %v2277_v0 = vpack.i.bf16 %v2922_v15, %v2918_v1 }
 0x774   : > { %v2926_v2 = vpop.f32.mrf.mxu1 }
 0x775   : > { %v2272_v11 = vpack.i.bf16 %v2926_v2, %v2920_v8 }
 0x786   : > { %v2170_v17 = vpop.f32.mrf.mxu1 }
 0x787   : > { %v1367_v10 = vadd.f32 %v2170_v17, %v1959_v3 }
 0x788   : > { %v1358_v18 = vpop.f32.mrf.mxu1 }
 0x789   : > { %v1359_v4 = vadd.f32 %v1957_v19, %v1358_v18  ;;  %v1395_v33 = vsel %vm503_vm1, %v1367_v10, -inf }
 0x78a   : > { %v2171_v5 = vpop.f32.mrf.mxu1 }
 0x78b   : > { %v1389_v16 = vsel %vm503_vm1, %v1359_v4, -inf  ;;  %v1370_v7 = vadd.f32 %v2171_v5, %v1960_v21 }
 0x78c   : > { %v1361_v22 = vpop.f32.mrf.mxu1  ;;  %1390 = vmax.xlane.f32.xlu0 %v1389_v16 }
 0x78d   : > { %v1362_v14 = vadd.f32 %v1958_v6, %v1361_v22  ;;  %v1398_v35 = vsel %vm503_vm1, %v1370_v7, -inf }
 0x78e   : > { %v2174_v12 = vpop.f32.mrf.mxu1 }
 0x78f   : > { %v1392_v32 = vsel %vm503_vm1, %v1362_v14, -inf  ;;  %v1383_v38 = vadd.f32 %v2174_v12, %v1963_v39 }
 0x790   : > { %1393 = vmax.xlane.f32.xlu1 %v1392_v32  ;;  %1396 = vmax.xlane.f32.xlu0 %v1395_v33  ;;  %v1374_v36 = vpop.f32.mrf.mxu1 }
 0x791   : > { %v1375_v37 = vadd.f32 %v1961_v20, %v1374_v36  ;;  %v1407_v18 = vsel %vm503_vm1, %v1383_v38, -inf }
 0x792   : > { %v2175_v45 = vpop.f32.mrf.mxu1 }
 0x793   : > { %v1386_v46 = vadd.f32 %v2175_v45, %v1964_v44  ;;  %v1401_v17 = vsel %vm503_vm1, %v1375_v37, -inf }
 0x794   : > { %1399 = vmax.xlane.f32.xlu0 %v1398_v35  ;;  %v1377_v23 = vpop.f32.mrf.mxu1 }
 0x795   : > { %v2958_v47 = vadd.f32 %v1962_v34, %v1377_v23  ;;  %v1410_v3 = vsel %vm503_vm1, %v1386_v46, -inf }
 0x797   : > { %v1404_v19 = vsel %vm503_vm1, %v2958_v47, -inf }
 0x798   : > { %1405 = vmax.xlane.f32.xlu1 %v1404_v19  ;;  %1402 = vmax.xlane.f32.xlu0 %v1401_v17 }
 0x79c   : > { %1411 = vmax.xlane.f32.xlu1 %v1410_v3  ;;  %1408 = vmax.xlane.f32.xlu0 %v1407_v18 }
 0x815   : > { %v1391_v5 = vpop.xlane.xlu0 %1390 }
 0x816   : > { %v1413_v6 = vsub.f32 %v1359_v4, %v1391_v5 }
 0x818   : > { %v1421_v32 = vmul.f32 1.442695, %v1413_v6 }
 0x819   : > { %v1394_v16 = vpop.xlane.xlu1 %1393  ;;  %v1397_v21 = vpop.xlane.xlu0 %1396 }
 0x81a   : > { %v1415_v22 = vsub.f32 %v1367_v10, %v1397_v21  ;;  %v1414_v12 = vsub.f32 %v1362_v14, %v1394_v16 }
 0x81c   : > { %v1425_v20 = vmul.f32 1.442695, %v1415_v22  ;;  %v1423_v39 = vmul.f32 1.442695, %v1414_v12 }
 0x81d   : > { %v1400_v33 = vpop.xlane.xlu0 %1399 }
 0x81e   : > { %v1416_v36 = vsub.f32 %v1370_v7, %v1400_v33  ;;  %2406 = vpow2.f32 %v1425_v20 }
 0x81f   : > { %2408 = vpow2.f32 %v1421_v32 }
 0x820   : > { %v1427_v44 = vmul.f32 1.442695, %v1416_v36 }
 0x821   : > { %v1403_v45 = vpop.xlane.xlu0 %1402  ;;  %v1406_v22 = vpop.xlane.xlu1 %1405 }
 0x822   : > { %2410 = vpow2.f32 %v1427_v44  ;;  %v1417_v34 = vsub.f32 %v1375_v37, %v1403_v45  ;;  %v1418_v32 = vsub.f32 %v2958_v47, %v1406_v22 }
 0x823   : > { %2412 = vpow2.f32 %v1423_v39 }
 0x824   : > { %v1429_v4 = vmul.f32 1.442695, %v1417_v34 }
 0x825   : > { %v1409_v35 = vpop.xlane.xlu0 %1408  ;;  %v1412_v12 = vpop.xlane.xlu1 %1411 }
 0x826   : > { %v1419_v23 = vsub.f32 %v1383_v38, %v1409_v35  ;;  %v1420_v20 = vsub.f32 %v1386_v46, %v1412_v12 }
 0x828   : > { %v1433_v17 = vmul.f32 1.442695, %v1419_v23  ;;  %v1435_v33 = vmul.f32 1.442695, %v1420_v20 }
 0x82a   : > { %2414 = vpow2.f32 %v1433_v17 }
 0x82b   : > { %v2965_v19 = vpop.eup %2406  ;;  %2416 = vpow2.f32 %v1429_v4 }
 0x82c   : > { %v1443_v10 = vsel %vm503_vm1, %v2965_v19, 0.0  ;;  %v2409_v14 = vpop.eup %2408  ;;  %2418 = vpow2.f32 %v1435_v33 }
 0x82d   : > { %1444 = vadd.xlane.f32.xlu0 %v1443_v10  ;;  %v1437_v37 = vsel %vm503_vm1, %v2409_v14, 0.0 }
 0x82f   : > { %v2969_v7 = vpop.eup %2410 }
 0x830   : > { %v1446_v3 = vsel %vm503_vm1, %v2969_v7, 0.0  ;;  %v2413_v18 = vpop.eup %2412 }
 0x831   : > { %1447 = vadd.xlane.f32.xlu1 %v1446_v3  ;;  %1438 = vadd.xlane.f32.xlu0 %v1437_v37  ;;  %v1440_v38 = vsel %vm503_vm1, %v2413_v18, 0.0 }
 0x835   : > { %1441 = vadd.xlane.f32.xlu1 %v1440_v38 }
 0x837   : > { %v2975_v5 = vpop.eup %2414 }
 0x838   : > { %v1455_v6 = vsel %vm503_vm1, %v2975_v5, 0.0  ;;  %v2979_v16 = vpop.eup %2416 }
 0x839   : > { %1456 = vadd.xlane.f32.xlu0 %v1455_v6  ;;  %v1449_v21 = vsel %vm503_vm1, %v2979_v16, 0.0  ;;  %v2419_v49 = vpop.eup %2418 }
 0x83a   : > { %v1458_v52 = vsel %vm503_vm1, %v2419_v49, 0.0 }
 0x83d   : > { %1450 = vadd.xlane.f32.xlu0 %v1449_v21 }
 0x846   : > { %1485 = vrot.lane.b32.xlu1 %v2864_v40, %s2478_s27  ;;  %v1431_v40 = vmul.f32 1.442695, %v1418_v32 }
 0x848   : > { %2420 = vpow2.f32 %v1431_v40 }
 0x84a   : > { %1483 = vrot.lane.b32.xlu1 %v2868_v41, %s2478_s27 }
 0x853   : > { %1487 = vrot.lane.b32.xlu0 %v2876_v43, %s2478_s27 }
 0x857   : > { %2243 = vrot.lane.b32.xlu0 %v2242_v53, %s2479_s28  ;;  %v2421_v53 = vpop.eup %2420 }
 0x858   : > { %v1452_v55 = vsel %vm503_vm1, %v2421_v53, 0.0 }
 0x85b   : > { %2253 = vrot.lane.b32.xlu0 %v2252_v59, %s2479_s28 }
 0x85f   : > { %2263 = vrot.lane.b32.xlu0 %v2262_v13, %s2480_s29 }
 0x863   : > { %2273 = vrot.lane.b32.xlu0 %v2272_v11, %s2480_s29 }
 0x86e   : > { %1459 = vadd.xlane.f32.xlu1 %v1458_v52 }
 0x872   : > { %1453 = vadd.xlane.f32.xlu1 %v1452_v55 }
 0x883   : > { %1481 = vrot.lane.b32.xlu1 %v2872_v42, %s2478_s27 }
 0x887   : > { %2248 = vrot.lane.b32.xlu1 %v2247_v51, %s2479_s28 }
 0x88b   : > { %2258 = vrot.lane.b32.xlu1 %v2257_v57, %s2479_s28 }
 0x88f   : > { %2268 = vrot.lane.b32.xlu1 %v2267_v63, %s2480_s29 }
 0x893   : > { %2278 = vrot.lane.b32.xlu1 %v2277_v0, %s2480_s29 }
 0x8b6   : > { %v1445_v58 = vpop.xlane.xlu0 %1444 }
 0x8ba   : > { %v1448_v59 = vpop.xlane.xlu1 %1447  ;;  %v1439_v41 = vpop.xlane.xlu0 %1438 }
 0x8bb   : > { %2422 = vrcp.f32 %v1439_v41 }
 0x8be   : > { %v1442_v42 = vpop.xlane.xlu1 %1441 }
 0x8bf   : > { %2424 = vrcp.f32 %v1442_v42 }
 0x8c0   : > { %2426 = vrcp.f32 %v1448_v59 }
 0x8c1   : > { %2428 = vrcp.f32 %v1445_v58 }
 0x8c2   : > { %v1457_v48 = vpop.xlane.xlu0 %1456  ;;  %v1486_v43 = vpop.permute.xlu1 %1485 }
 0x8c6   : > { %v1451_v50 = vpop.xlane.xlu0 %1450  ;;  %v1484_v62 = vpop.permute.xlu1 %1483 }
 0x8c8   : > { %v2423_v51 = vpop.eup %2422 }
 0x8c9   : > { %v1469_v57 = vmul.f32 %v2423_v51, %v2409_v14 }
 0x8ca   : > { %v1488_v54 = vpop.permute.xlu0 %1487 }
 0x8cb   : > { %2176 = vmatprep.subr.bf16.mxu0 %v1488_v54 }
 0x8cc   : > { %v2425_v56 = vpop.eup %2424  ;;  %2177 = vmatpush3.bf16.msra.mxu0 %v1488_v54 }
 0x8cd   : > { %v1470_v60 = vmul.f32 %v2425_v56, %v2413_v18  ;;  %2178 = vmatprep.subr.bf16.mxu0 %v1486_v43  ;;  %v2427_v9 = vpop.eup %2426 }
 0x8ce   : > { %v2429_v1 = vpop.eup %2428  ;;  %v1472_v8 = vmul.f32 %v2427_v9, %v2969_v7  ;;  %v2244_v21 = vpop.permute.xlu0 %2243 }
 0x8cf   : > { %v1477_v61 = vpack.c.bf16 %v1470_v60, %v1469_v57  ;;  %v1471_v0 = vmul.f32 %v2429_v1, %v2965_v19  ;;  %v2246_v33 = vunpack.i.h.bf16 %v2244_v21 }
 0x8d0   : > { %2179 = vmatpush3.bf16.msra.mxu0 %v1486_v43 }
 0x8d1   : > { %2184 = vmatprep.mubr.msk.bf16.mxu0 %vm503_vm1, %v1477_v61  ;;  %2180 = vmatprep.subr.bf16.mxu0 %v1484_v62  ;;  %v1478_v2 = vpack.c.bf16 %v1472_v8, %v1471_v0  ;;  %v1667_v41 = vsel %vm413_vm0, %v2688_v27, %v2246_v33 }
 0x8d2   : > { %v2254_v12 = vpop.permute.xlu0 %2253 }
 0x8d4   : > { %2181 = vmatpush3.bf16.msra.mxu0 %v1484_v62 }
 0x8d6   : > { %v2264_v32 = vpop.permute.xlu0 %2263 }
 0x8d7   : > { %v2266_v42 = vunpack.i.h.bf16 %v2264_v32 }
 0x8da   : > { %v2274_v55 = vpop.permute.xlu0 %2273 }
 0x8f7   : > { %v1460_v63 = vpop.xlane.xlu1 %1459 }
 0x8f8   : > { %2430 = vrcp.f32 %v1460_v63 }
 0x8f9   : > { %2432 = vrcp.f32 %v1451_v50 }
 0x8fa   : > { %2434 = vrcp.f32 %v1457_v48  ;;  %v2265_v48 = vunpack.i.l.bf16 %v2264_v32 }
 0x8fb   : > { %v1454_v13 = vpop.xlane.xlu1 %1453 }
 0x8fc   : > { %2436 = vrcp.f32 %v1454_v13  ;;  %v1676_v13 = vsel %vm1674_vm2, %v1667_v41, %v2266_v42 }
 0x8ff   : > { %v1482_v15 = vpop.permute.xlu1 %1481 }
 0x900   : > { %2182 = vmatprep.subr.bf16.mxu0 %v1482_v15 }
 0x901   : > { %2183 = vmatpush3.bf16.msra.mxu0 %v1482_v15 }
 0x904   : > { %2185 = vmatmul.mubr.msk.bf16.vlgmr.msra.gmra.mxu0 %vm503_vm1, %v1478_v2 }
 0x905   : > { %v2431_v11 = vpop.eup %2430 }
 0x906   : > { %v2433_v46 = vpop.eup %2432  ;;  %v1476_v39 = vmul.f32 %v2431_v11, %v2419_v49 }
 0x907   : > { %v2435_v47 = vpop.eup %2434  ;;  %v1473_v44 = vmul.f32 %v2433_v46, %v2979_v16  ;;  %v2249_v16 = vpop.permute.xlu1 %2248 }
 0x908   : > { %v1475_v34 = vmul.f32 %v2435_v47, %v2975_v5  ;;  %v2251_v49 = vunpack.i.h.bf16 %v2249_v16  ;;  %v2250_v52 = vunpack.i.l.bf16 %v2249_v16  ;;  %v2256_v47 = vunpack.i.h.bf16 %v2254_v12 }
 0x909   : > { %v2437_v36 = vpop.eup %2436 }
 0x90a   : > { %v1474_v45 = vmul.f32 %v2437_v36, %v2421_v53  ;;  %v1480_v23 = vpack.c.bf16 %v1476_v39, %v1475_v34  ;;  %v2245_v53 = vunpack.i.l.bf16 %v2244_v21  ;;  %v1669_v51 = vsel %vm413_vm0, %v2686_v26, %v2251_v49 }
 0x90b   : > { %v2259_v22 = vpop.permute.xlu1 %2258  ;;  %v1668_v43 = vsel %vm413_vm0, %v2682_v24, %v2250_v52  ;;  %v2255_v36 = vunpack.i.l.bf16 %v2254_v12  ;;  %v2275_v34 = vunpack.i.l.bf16 %v2274_v55 }
 0x90c   : > { %v1479_v35 = vpack.c.bf16 %v1474_v45, %v1473_v44  ;;  %v1666_v57 = vsel %vm413_vm0, %v2684_v25, %v2245_v53  ;;  %v2261_v11 = vunpack.i.h.bf16 %v2259_v22  ;;  %v2260_v46 = vunpack.i.l.bf16 %v2259_v22 }
 0x90d   : > { %v1675_v9 = vsel %vm1674_vm2, %v1666_v57, %v2265_v48  ;;  %v2276_v45 = vunpack.i.h.bf16 %v2274_v55 }
 0x90e   : > { %2188 = vmatprep.mubr.msk.bf16.mxu0 %vm503_vm1, %v1479_v35 }
 0x90f   : > { %2189 = vmatmul.mubr.msk.bf16.gmra.mxu0 %vm503_vm1, %v1480_v23  ;;  %v2269_v20 = vpop.permute.xlu1 %2268  ;;  %v1673_v23 = vsel %vm413_vm0, %v2694_v30, %v2261_v11 }
 0x910   : > { %v2271_v58 = vunpack.i.h.bf16 %v2269_v20  ;;  %v2270_v59 = vunpack.i.l.bf16 %v2269_v20 }
 0x912   : > { %v1677_v60 = vsel %vm1674_vm2, %v1668_v43, %v2270_v59  ;;  %v1678_v27 = vsel %vm1674_vm2, %v1669_v51, %v2271_v58 }
 0x913   : > { %v2279_v40 = vpop.permute.xlu1 %2278 }
 0x914   : > { %v2281_v39 = vunpack.i.h.bf16 %v2279_v40  ;;  %v2280_v44 = vunpack.i.l.bf16 %v2279_v40 }
 0x9c4   : > { %v2186_v17 = vpop.f32.mrf.mxu0 }
 0x9c6   : > { %v1539_v4 = vpop.f32.mrf.mxu0 }
 0x9c8   : > { %v2187_v19 = vpop.f32.mrf.mxu0 }
 0x9c9   : > { %v2282_v10 = vpack.i.bf16 %v2187_v19, %v2186_v17  ;;  %v1672_v17 = vsel %vm413_vm0, %v2690_v28, %v2260_v46 }
 0x9ca   : > { %v1542_v14 = vpop.f32.mrf.mxu0 }
 0x9cb   : > { %v2287_v7 = vpack.i.bf16 %v1542_v14, %v1539_v4  ;;  %2283 = vrot.lane.b32.xlu1 %v2282_v10, %s2481_s30  ;;  %v1671_v10 = vsel %vm413_vm0, %v2696_v31, %v2256_v47  ;;  %v1670_v14 = vsel %vm413_vm0, %v2692_v29, %v2255_v36 }
 0x9cc   : > { %v1680_v31 = vsel %vm1674_vm2, %v1671_v10, %v2276_v45 }
 0x9cd   : > { %2288 = vrot.lane.b32.xlu0 %v2287_v7, %s2481_s30  ;;  %v1681_v7 = vsel %vm1674_vm2, %v1672_v17, %v2280_v44 }
 0x9cf   : > { %v2190_v3 = vpop.f32.mrf.mxu0 }
 0x9d1   : > { %v1555_v18 = vpop.f32.mrf.mxu0 }
 0x9d3   : > { %v2191_v37 = vpop.f32.mrf.mxu0 }
 0x9d4   : > { %v2297_v38 = vpack.i.bf16 %v2191_v37, %v2190_v3  ;;  %v1682_v3 = vsel %vm1674_vm2, %v1673_v23, %v2281_v39 }
 0x9d5   : > { %v1558_v5 = vpop.f32.mrf.mxu0 }
 0x9d6   : > { %v2292_v6 = vpack.i.bf16 %v1558_v5, %v1555_v18  ;;  %2298 = vrot.lane.b32.xlu1 %v2297_v38, %s2481_s30  ;;  %v1679_v5 = vsel %vm1674_vm2, %v1670_v14, %v2275_v34 }
 0x9d8   : > { %2293 = vrot.lane.b32.xlu0 %v2292_v6, %s2481_s30 }
 0xa3d   : > { %v2284_v50 = vpop.permute.xlu1 %2283 }
 0xa3e   : > { %v2286_v54 = vunpack.i.h.bf16 %v2284_v50  ;;  %v2285_v56 = vunpack.i.l.bf16 %v2284_v50 }
 0xa3f   : > { %v2289_v61 = vpop.permute.xlu0 %2288 }
 0xa40   : > { %v1687_v62 = vsel %vm1683_vm3, %v1678_v27, %v2286_v54  ;;  %v1686_v26 = vsel %vm1683_vm3, %v1677_v60, %v2285_v56  ;;  %v2291_v24 = vunpack.i.h.bf16 %v2289_v61  ;;  %v2290_v63 = vunpack.i.l.bf16 %v2289_v61 }
 0xa41   : > { %v1995_v25 = vpack.c.bf16 %v1687_v62, %v1687_v62  ;;  %v1994_v1 = vpack.c.bf16 %v1686_v26, %v1686_v26 }
 0xa42   : > { %v1684_v8 = vsel %vm1683_vm3, %v1675_v9, %v2290_v63  ;;  %v1685_v15 = vsel %vm1683_vm3, %v1676_v13, %v2291_v24 }
 0xa43   : > { %1728 = vst.msk [vmem:[%s2535_s24 + $0xc] sm:$0xf] %vm1724_vm4, %v1995_v25  ;;  %1727 = vst.msk [vmem:[%s2535_s24 + $0x8] sm:$0xf] %vm1724_vm4, %v1994_v1  ;;  %v1992_v0 = vpack.c.bf16 %v1684_v8, %v1684_v8  ;;  %v1993_v2 = vpack.c.bf16 %v1685_v15, %v1685_v15 }
 0xa45   : > { %1725 = vst.msk [vmem:[%s2535_s24] sm:$0xf] %vm1724_vm4, %v1992_v0  ;;  %1726 = vst.msk [vmem:[%s2535_s24 + $0x4] sm:$0xf] %vm1724_vm4, %v1993_v2 }
 0xa48   : > { %v2299_v35 = vpop.permute.xlu1 %2298 }
 0xa49   : > { %v2301_v4 = vunpack.i.h.bf16 %v2299_v35  ;;  %v2300_v19 = vunpack.i.l.bf16 %v2299_v35 }
 0xa4a   : > { %v2294_v18 = vpop.permute.xlu0 %2293 }
 0xa4b   : > { %v1691_v30 = vsel %vm1683_vm3, %v1682_v3, %v2301_v4  ;;  %v1690_v28 = vsel %vm1683_vm3, %v1681_v7, %v2300_v19  ;;  %v2296_v37 = vunpack.i.h.bf16 %v2294_v18  ;;  %v2295_v38 = vunpack.i.l.bf16 %v2294_v18 }
 0xa4c   : > { %v1999_v6 = vpack.c.bf16 %v1691_v30, %v1691_v30  ;;  %v1998_v16 = vpack.c.bf16 %v1690_v28, %v1690_v28 }
 0xa4d   : > { %v1688_v29 = vsel %vm1683_vm3, %v1679_v5, %v2295_v38  ;;  %v1689_v21 = vsel %vm1683_vm3, %v1680_v31, %v2296_v37 }
 0xa4e   : > { %1732 = vst.msk [vmem:[%s2535_s24 + $0x1c] sm:$0xf] %vm1724_vm4, %v1999_v6  ;;  %1731 = vst.msk [vmem:[%s2535_s24 + $0x18] sm:$0xf] %vm1724_vm4, %v1998_v16  ;;  %v1996_v22 = vpack.c.bf16 %v1688_v29, %v1688_v29  ;;  %v1997_v12 = vpack.c.bf16 %v1689_v21, %v1689_v21 }
 0xa50   : > { %1729 = vst.msk [vmem:[%s2535_s24 + $0x10] sm:$0xf] %vm1724_vm4, %v1996_v22  ;;  %1730 = vst.msk [vmem:[%s2535_s24 + $0x14] sm:$0xf] %vm1724_vm4, %v1997_v12 }
 0xa51 PF: > { %s13_s14 = sadd.s32 1, %s2470_s14   ;;  %s3083_s12 = smov %s2466_s13 }
 0xa52   : > { %p10_p7 = scmp.ge.s32.totalorder %s13_s14, 4   ;;  %s3084_s13 = smov %s3086_s15 }
 0xa54   :  { %12 = sbr.rel (!%p10_p7) target bundleno = 2 (0x2), region = 165 }
 0xa59   :  { %1763 = vsyncmov [#allocation3] }
 0xa5c   :  { %s1764_s4 = vpop.sfrf %1763 }
 0xa5d   :  { %p1983_p8 = scmp.ne.s32.totalorder %s1764_s4, 0 }
 0xa5f   :  { %1768 = shalt.err (%p1983_p8)  }
 0xa60   :  { %1770 = vsyncmov [#allocation3 + $0x1] }
 0xa63   :  { %s1771_s5 = vpop.sfrf %1770 }
 0xa64   :  { %p1984_p9 = scmp.ne.s32.totalorder %s1771_s5, 0 }
 0xa66   :  { %1775 = shalt.err (%p1984_p9)  }

// kernel: na_transformer_layer.9
= control target key start
LH: loop header
LB: loop body
LE: loop exit
PB: predicated region body
PF: predicated region fallthrough
CT: control target
= control target key end

     0   :  { %s602_s0 = inlined_call_operand.vmem [shape: bf16[128,128], index: 0, kind: input, shape index: {}]   ;;  %s603_s1 = inlined_call_operand.vmem [shape: bf16[128,32], index: 1, kind: input, shape index: {}]   ;;  %s604_s2 = inlined_call_operand.vmem [shape: f32[1,32], index: 2, kind: input, shape index: {}]   ;;  %s605_s3 = inlined_call_operand.vmem [shape: f32[128,32], index: 3, kind: input, shape index: {}]   ;;  %s606_s4 = inlined_call_operand.hbm [shape: f32[128,32], index: 4, kind: output, shape index: {}]  }
   0x1   :  { %v400_v0 = vld [vmem:[%s603_s1 + $0x38] sm:$0xff]   ;;  %v401_v1 = vld [vmem:[%s603_s1 + $0x30] sm:$0xff]   ;;  %v402_v2 = vld [vmem:[%s603_s1 + $0x28] sm:$0xff]  }
   0x2   :  { %349 = vmatprep.subr.bf16.mxu0 %v400_v0  ;;  %381 = vmatprep.subr.bf16.mxu1 %v400_v0  ;;  %v403_v3 = vld [vmem:[%s603_s1 + $0x20] sm:$0xff]   ;;  %v404_v6 = vld [vmem:[%s603_s1 + $0x18] sm:$0xff]   ;;  %v405_v7 = vld [vmem:[%s603_s1 + $0x10] sm:$0xff]  }
   0x3   :  { %350 = vmatpush3.bf16.msra.mxu0 %v400_v0  ;;  %389 = vmatpush3.bf16.msra.mxu1 %v400_v0  ;;  %v408_v4 = vld [vmem:[%s602_s0] sm:$0xff]  }
   0x4   :  { %351 = vmatprep.subr.bf16.mxu0 %v401_v1  ;;  %382 = vmatprep.subr.bf16.mxu1 %v401_v1  ;;  %v409_v5 = vld [vmem:[%s602_s0 + $0x20] sm:$0xff]  }
   0x5   :  { %365 = vmatprep.mubr.bf16.mxu0 %v408_v4  ;;  %373 = vmatprep.mubr.bf16.mxu1 %v409_v5 }
   0x7   :  { %352 = vmatpush3.bf16.msra.mxu0 %v401_v1  ;;  %390 = vmatpush3.bf16.msra.mxu1 %v401_v1 }
   0x8   :  { %353 = vmatprep.subr.bf16.mxu0 %v402_v2  ;;  %383 = vmatprep.subr.bf16.mxu1 %v402_v2 }
   0xb   :  { %354 = vmatpush3.bf16.msra.mxu0 %v402_v2  ;;  %391 = vmatpush3.bf16.msra.mxu1 %v402_v2 }
   0xc   :  { %355 = vmatprep.subr.bf16.mxu0 %v403_v3  ;;  %384 = vmatprep.subr.bf16.mxu1 %v403_v3 }
   0xf   :  { %356 = vmatpush3.bf16.msra.mxu0 %v403_v3  ;;  %392 = vmatpush3.bf16.msra.mxu1 %v403_v3 }
  0x10   :  { %357 = vmatprep.subr.bf16.mxu0 %v404_v6  ;;  %385 = vmatprep.subr.bf16.mxu1 %v404_v6 }
  0x11   :  { %9 = vsyncpa [#allocation3], 0  ;;  %v406_v8 = vld [vmem:[%s603_s1 + $0x8] sm:$0xff]   ;;  %v407_v9 = vld [vmem:[%s603_s1] sm:$0xff]   ;;  %vm283_vm0 = vcmask 261120   ;;  %s438_s21 = smov [#allocation2]  }
  0x12   :  { %v410_v10 = vld [vmem:[%s602_s0 + $0x8] sm:$0xff]   ;;  %v412_v12 = vld [vmem:[%s602_s0 + $0x10] sm:$0xff]   ;;  %v414_v14 = vld [vmem:[%s602_s0 + $0x18] sm:$0xff]   ;;  %s305_s22 = sshll.u32 %s438_s21, 4  ;;  %s306_s22 = int_to_ptr.vmem [resolvable:$true] %s305_s22 }
  0x13   :  { %358 = vmatpush3.bf16.msra.mxu0 %v404_v6  ;;  %393 = vmatpush3.bf16.msra.mxu1 %v404_v6  ;;  %v411_v11 = vld [vmem:[%s602_s0 + $0x28] sm:$0xff]   ;;  %v413_v13 = vld [vmem:[%s602_s0 + $0x30] sm:$0xff]   ;;  %v415_v15 = vld [vmem:[%s602_s0 + $0x38] sm:$0xff]   ;;  %p421_p1 = scmp.lt.s32.totalorder %s306_s22, %s306_s22 }
  0x14   :  { %359 = vmatprep.subr.bf16.mxu0 %v405_v7  ;;  %386 = vmatprep.subr.bf16.mxu1 %v405_v7  ;;  %v517_v16 = vld [vmem:[%s604_s2] ss:$0 sm:$0xff]  ;;  %v253_v18 = vld [vmem:[%s605_s3 + $0x10] sm:$0xff]  ;;  %v254_v32 = vld [vmem:[%s605_s3 + $0x18] sm:$0xff] }
  0x15   :  { %v261_v20 = vld [vmem:[%s605_s3 + $0x50] sm:$0xff]  ;;  %v251_v24 = vld [vmem:[%s605_s3] sm:$0xff]  ;;  %v262_v34 = vld [vmem:[%s605_s3 + $0x58] sm:$0xff] }
  0x16   :  { %v259_v26 = vld [vmem:[%s605_s3 + $0x40] sm:$0xff]  ;;  %v252_v40 = vld [vmem:[%s605_s3 + $0x8] sm:$0xff]  ;;  %v257_v48 = vld [vmem:[%s605_s3 + $0x30] sm:$0xff] }
  0x17   :  { %360 = vmatpush3.bf16.msra.mxu0 %v405_v7  ;;  %394 = vmatpush3.bf16.msra.mxu1 %v405_v7  ;;  %v260_v42 = vld [vmem:[%s605_s3 + $0x48] sm:$0xff]  ;;  %v265_v50 = vld [vmem:[%s605_s3 + $0x70] sm:$0xff]  ;;  %v255_v56 = vld [vmem:[%s605_s3 + $0x20] sm:$0xff] }
  0x18   :  { %361 = vmatprep.subr.bf16.mxu0 %v406_v8  ;;  %387 = vmatprep.subr.bf16.mxu1 %v406_v8  ;;  %v263_v58 = vld [vmem:[%s605_s3 + $0x60] sm:$0xff]  ;;  %v258_v0 = vld [vmem:[%s605_s3 + $0x38] sm:$0xff] }
  0x19   :  { %v266_v2 = vld [vmem:[%s605_s3 + $0x78] sm:$0xff] }
  0x1b   :  { %362 = vmatpush3.bf16.msra.mxu0 %v406_v8  ;;  %395 = vmatpush3.bf16.msra.mxu1 %v406_v8  ;;  %v256_v8 = vld [vmem:[%s605_s3 + $0x28] sm:$0xff] }
  0x1c   :  { %363 = vmatprep.subr.bf16.mxu0 %v407_v9  ;;  %388 = vmatprep.subr.bf16.mxu1 %v407_v9 }
  0x1f   :  { %364 = vmatpush3.bf16.msra.mxu0 %v407_v9  ;;  %396 = vmatpush3.bf16.msra.mxu1 %v407_v9 }
  0x22   :  { %366 = vmatmul.mubr.bf16.vlgmr.msra.gmra.mxu0 %v410_v10  ;;  %374 = vmatmul.mubr.bf16.vlgmr.msra.gmra.mxu1 %v411_v11  ;;  %v264_v10 = vld [vmem:[%s605_s3 + $0x68] sm:$0xff]  ;;  %s416_s3 = scalar_lea.vmem %s306_s22, 2048 }
  0x23   :  { %369 = vmatprep.mubr.bf16.mxu0 %v412_v12  ;;  %377 = vmatprep.mubr.bf16.mxu1 %v413_v13  ;;  %p417_p0 = scmp.ne.s32.totalorder %s306_s22, %s416_s3  ;;  %p422_p2 = scmp.lt.s32.totalorder %s416_s3, %s416_s3 }
  0x25   :  { %p423_p3 = por %p422_p2, %p421_p1 }
  0x27   :  { %p424_p4 = pnand %p423_p3, %p417_p0 }
  0x2a   :  { %370 = vmatmul.mubr.bf16.gmra.mxu0 %v414_v14  ;;  %378 = vmatmul.mubr.bf16.gmra.mxu1 %v415_v15 }
  0xe2   :  { %v367_v17 = vpop.f32.mrf.mxu0  ;;  %v375_v19 = vpop.f32.mrf.mxu1 }
  0xe3   :  { %v197_v21 = vadd.f32 %v367_v17, %v517_v16  ;;  %v229_v22 = vadd.f32 %v375_v19, %v517_v16 }
  0xe4   :  { %v188_v23 = vpop.f32.mrf.mxu0  ;;  %v220_v25 = vpop.f32.mrf.mxu1 }
  0xe5   :  { %v269_v27 = vadd.f32 %v253_v18, %v197_v21  ;;  %v277_v28 = vadd.f32 %v261_v20, %v229_v22  ;;  %v189_v29 = vadd.f32 %v517_v16, %v188_v23  ;;  %v221_v30 = vadd.f32 %v517_v16, %v220_v25 }
  0xe6   :  { %v368_v31 = vpop.f32.mrf.mxu0  ;;  %v376_v33 = vpop.f32.mrf.mxu1 }
  0xe7   :  { %286 = vst.msk [vmem:[#allocation2 + $0x10] sm:$0xff] %vm283_vm0, %v269_v27  ;;  %294 = vst.msk [vmem:[#allocation2 + $0x50] sm:$0xff] %vm283_vm0, %v277_v28  ;;  %v267_v35 = vadd.f32 %v251_v24, %v189_v29  ;;  %v275_v36 = vadd.f32 %v259_v26, %v221_v30  ;;  %v200_v37 = vadd.f32 %v368_v31, %v517_v16 }
  0xe8   :  { %v232_v38 = vadd.f32 %v376_v33, %v517_v16  ;;  %v191_v39 = vpop.f32.mrf.mxu0  ;;  %v223_v41 = vpop.f32.mrf.mxu1 }
  0xe9   :  { %284 = vst.msk [vmem:[#allocation2] sm:$0xff] %vm283_vm0, %v267_v35  ;;  %292 = vst.msk [vmem:[#allocation2 + $0x40] sm:$0xff] %vm283_vm0, %v275_v36  ;;  %v270_v43 = vadd.f32 %v254_v32, %v200_v37  ;;  %v192_v45 = vadd.f32 %v517_v16, %v191_v39  ;;  %v224_v46 = vadd.f32 %v517_v16, %v223_v41 }
  0xea   :  { %v278_v44 = vadd.f32 %v262_v34, %v232_v38  ;;  %v371_v47 = vpop.f32.mrf.mxu0  ;;  %v379_v49 = vpop.f32.mrf.mxu1 }
  0xeb   :  { %287 = vst.msk [vmem:[#allocation2 + $0x18] sm:$0xff] %vm283_vm0, %v270_v43  ;;  %v268_v51 = vadd.f32 %v252_v40, %v192_v45  ;;  %v276_v52 = vadd.f32 %v260_v42, %v224_v46  ;;  %v213_v53 = vadd.f32 %v371_v47, %v517_v16  ;;  %v245_v54 = vadd.f32 %v379_v49, %v517_v16 }
  0xec   :  { %295 = vst.msk [vmem:[#allocation2 + $0x58] sm:$0xff] %vm283_vm0, %v278_v44  ;;  %v204_v55 = vpop.f32.mrf.mxu0  ;;  %v236_v57 = vpop.f32.mrf.mxu1 }
  0xed   :  { %285 = vst.msk [vmem:[#allocation2 + $0x8] sm:$0xff] %vm283_vm0, %v268_v51  ;;  %293 = vst.msk [vmem:[#allocation2 + $0x48] sm:$0xff] %vm283_vm0, %v276_v52  ;;  %v273_v59 = vadd.f32 %v257_v48, %v213_v53  ;;  %v281_v60 = vadd.f32 %v265_v50, %v245_v54  ;;  %v205_v61 = vadd.f32 %v517_v16, %v204_v55 }
  0xee   :  { %v237_v62 = vadd.f32 %v517_v16, %v236_v57  ;;  %v372_v63 = vpop.f32.mrf.mxu0  ;;  %v380_v1 = vpop.f32.mrf.mxu1 }
  0xef   :  { %290 = vst.msk [vmem:[#allocation2 + $0x30] sm:$0xff] %vm283_vm0, %v273_v59  ;;  %298 = vst.msk [vmem:[#allocation2 + $0x70] sm:$0xff] %vm283_vm0, %v281_v60  ;;  %v271_v3 = vadd.f32 %v255_v56, %v205_v61  ;;  %v216_v5 = vadd.f32 %v372_v63, %v517_v16  ;;  %v248_v6 = vadd.f32 %v380_v1, %v517_v16 }
  0xf0   :  { %v279_v4 = vadd.f32 %v263_v58, %v237_v62  ;;  %v207_v7 = vpop.f32.mrf.mxu0  ;;  %v239_v9 = vpop.f32.mrf.mxu1 }
  0xf1   :  { %288 = vst.msk [vmem:[#allocation2 + $0x20] sm:$0xff] %vm283_vm0, %v271_v3  ;;  %v274_v11 = vadd.f32 %v258_v0, %v216_v5  ;;  %v282_v12 = vadd.f32 %v266_v2, %v248_v6  ;;  %v208_v13 = vadd.f32 %v517_v16, %v207_v7  ;;  %v240_v14 = vadd.f32 %v517_v16, %v239_v9 }
  0xf2   :  { %296 = vst.msk [vmem:[#allocation2 + $0x60] sm:$0xff] %vm283_vm0, %v279_v4 }
  0xf3   :  { %291 = vst.msk [vmem:[#allocation2 + $0x38] sm:$0xff] %vm283_vm0, %v274_v11  ;;  %299 = vst.msk [vmem:[#allocation2 + $0x78] sm:$0xff] %vm283_vm0, %v282_v12  ;;  %v272_v15 = vadd.f32 %v256_v8, %v208_v13  ;;  %v280_v17 = vadd.f32 %v264_v10, %v240_v14 }
  0xf5   :  { %289 = vst.msk [vmem:[#allocation2 + $0x28] sm:$0xff] %vm283_vm0, %v272_v15  ;;  %297 = vst.msk [vmem:[#allocation2 + $0x68] sm:$0xff] %vm283_vm0, %v280_v17 }
  0xf6   :  { %427 = shalt.err (!%p424_p4)
}
  0xf7   :  { %s439_s26 = smov 128   ;;  %s440_s2 = smov 8  }
  0xf8   :  { %311 = dma.vmem_to_hbm [thread:$0]  %s306_s22, 2048, %s606_s4, [#allocation3], %s439_s26, %s439_s26, %s440_s2  }
  0xf9   :  { %436 = dma.done.wait [#allocation3], 2048  }
  0xfa   :  { %437 = vsyncadd [#allocation3], 4294965248 }
  0xfb   :  { %315 = vsyncpa [#allocation3], 1 }

// kernel: na_transformer_layer.8
= control target key start
LH: loop header
LB: loop body
LE: loop exit
PB: predicated region body
PF: predicated region fallthrough
CT: control target
= control target key end

     0   :  { %vm37_vm0 = vcmask 261120   ;;  %s1148_s0 = inlined_call_operand.vmem [shape: f32[128,32], index: 0, kind: input, shape index: {}]   ;;  %s1149_s3 = inlined_call_operand.vmem [shape: bf16[32,128], index: 3, kind: input, shape index: {}]   ;;  %s1150_s1 = inlined_call_operand.vmem [shape: f32[1,32], index: 1, kind: input, shape index: {}]   ;;  %s1151_s2 = inlined_call_operand.vmem [shape: f32[1,32], index: 2, kind: input, shape index: {}]   ;;  %s1152_s4 = inlined_call_operand.vmem [shape: f32[1,128], index: 4, kind: input, shape index: {}]   ;;  %s1153_s5 = inlined_call_operand.vmem [shape: bf16[128,128], index: 5, kind: output, shape index: {}]  }
   0x1   :  { %v21_v0 = vld [vmem:[%s1148_s0] sm:$0xff]  ;;  %v22_v2 = vld [vmem:[%s1148_s0 + $0x8] sm:$0xff]  ;;  %v23_v8 = vld [vmem:[%s1148_s0 + $0x10] sm:$0xff] }
   0x2   :  { %v29_v1 = vld [vmem:[%s1148_s0 + $0x40] sm:$0xff]  ;;  %v38_v3 = vsel %vm37_vm0, %v21_v0, 0.0  ;;  %v30_v5 = vld [vmem:[%s1148_s0 + $0x48] sm:$0xff]  ;;  %v41_v6 = vsel %vm37_vm0, %v22_v2, 0.0  ;;  %v24_v9 = vld [vmem:[%s1148_s0 + $0x18] sm:$0xff]  ;;  %v44_v10 = vsel %vm37_vm0, %v23_v8, 0.0 }
   0x3   :  { %v62_v4 = vsel %vm37_vm0, %v29_v1, 0.0  ;;  %39 = vadd.xlane.f32.xlu0 %v38_v3  ;;  %v65_v7 = vsel %vm37_vm0, %v30_v5, 0.0  ;;  %v47_v11 = vsel %vm37_vm0, %v24_v9, 0.0  ;;  %v858_v12 = vld [vmem:[%s1148_s0 + $0x50] sm:$0xff]  ;;  %v863_v13 = vld [vmem:[%s1148_s0 + $0x58] sm:$0xff]  ;;  %v872_v16 = vld [vmem:[%s1148_s0 + $0x20] sm:$0xff] }
   0x4   :  { %63 = vadd.xlane.f32.xlu1 %v62_v4  ;;  %v68_v14 = vsel %vm37_vm0, %v858_v12, 0.0  ;;  %v71_v15 = vsel %vm37_vm0, %v863_v13, 0.0  ;;  %v877_v17 = vld [vmem:[%s1148_s0 + $0x28] sm:$0xff]  ;;  %v50_v18 = vsel %vm37_vm0, %v872_v16, 0.0  ;;  %v886_v20 = vld [vmem:[%s1148_s0 + $0x60] sm:$0xff]  ;;  %v900_v24 = vld [vmem:[%s1148_s0 + $0x30] sm:$0xff] }
   0x5   :  { %v53_v19 = vsel %vm37_vm0, %v877_v17, 0.0  ;;  %v891_v21 = vld [vmem:[%s1148_s0 + $0x68] sm:$0xff]  ;;  %v74_v22 = vsel %vm37_vm0, %v886_v20, 0.0  ;;  %v905_v25 = vld [vmem:[%s1148_s0 + $0x38] sm:$0xff]  ;;  %v56_v26 = vsel %vm37_vm0, %v900_v24, 0.0  ;;  %v914_v28 = vld [vmem:[%s1148_s0 + $0x70] sm:$0xff] }
   0x6   :  { %v77_v23 = vsel %vm37_vm0, %v891_v21, 0.0  ;;  %v59_v27 = vsel %vm37_vm0, %v905_v25, 0.0  ;;  %v919_v29 = vld [vmem:[%s1148_s0 + $0x78] sm:$0xff]  ;;  %v80_v30 = vsel %vm37_vm0, %v914_v28, 0.0 }
   0x7   :  { %42 = vadd.xlane.f32.xlu0 %v41_v6  ;;  %v83_v31 = vsel %vm37_vm0, %v919_v29, 0.0 }
   0x8   :  { %66 = vadd.xlane.f32.xlu1 %v65_v7 }
   0xb   :  { %45 = vadd.xlane.f32.xlu0 %v44_v10 }
   0xc   :  { %48 = vadd.xlane.f32.xlu1 %v47_v11 }
   0xf   :  { %69 = vadd.xlane.f32.xlu0 %v68_v14 }
  0x10   :  { %72 = vadd.xlane.f32.xlu1 %v71_v15 }
  0x13   :  { %51 = vadd.xlane.f32.xlu0 %v50_v18 }
  0x14   :  { %54 = vadd.xlane.f32.xlu1 %v53_v19 }
  0x17   :  { %75 = vadd.xlane.f32.xlu0 %v74_v22 }
  0x18   :  { %78 = vadd.xlane.f32.xlu1 %v77_v23 }
  0x1b   :  { %57 = vadd.xlane.f32.xlu0 %v56_v26 }
  0x1c   :  { %60 = vadd.xlane.f32.xlu1 %v59_v27 }
  0x1f   :  { %81 = vadd.xlane.f32.xlu0 %v80_v30 }
  0x20   :  { %84 = vadd.xlane.f32.xlu1 %v83_v31 }
  0x8c   :  { %v40_v32 = vpop.xlane.xlu0 %39 }
  0x8d   :  { %v64_v33 = vpop.xlane.xlu1 %63  ;;  %v87_v34 = vmul.f32 0.03125, %v40_v32 }
  0x8e   :  { %v95_v35 = vmul.f32 0.03125, %v64_v33 }
  0x8f   :  { %v925_v36 = vsub.f32 %v21_v0, %v87_v34 }
  0x90   :  { %v927_v37 = vsub.f32 %v29_v1, %v95_v35  ;;  %v43_v38 = vpop.xlane.xlu0 %42 }
  0x91   :  { %v67_v39 = vpop.xlane.xlu1 %66  ;;  %v88_v40 = vmul.f32 0.03125, %v43_v38  ;;  %v119_v42 = vmul.f32 %v925_v36, %v925_v36 }
  0x92   :  { %v96_v41 = vmul.f32 0.03125, %v67_v39  ;;  %v127_v43 = vmul.f32 %v927_v37, %v927_v37 }
  0x93   :  { %v933_v44 = vsub.f32 %v22_v2, %v88_v40  ;;  %v135_v46 = vsel %vm37_vm0, %v119_v42, 0.0 }
  0x94   :  { %v935_v45 = vsub.f32 %v30_v5, %v96_v41  ;;  %136 = vadd.xlane.f32.xlu0 %v135_v46  ;;  %v46_v47 = vpop.xlane.xlu0 %45  ;;  %v159_v49 = vsel %vm37_vm0, %v127_v43, 0.0 }
  0x95   :  { %v49_v48 = vpop.xlane.xlu1 %48  ;;  %v89_v50 = vmul.f32 0.03125, %v46_v47  ;;  %v120_v52 = vmul.f32 %v933_v44, %v933_v44 }
  0x96   :  { %v90_v51 = vmul.f32 0.03125, %v49_v48  ;;  %v128_v53 = vmul.f32 %v935_v45, %v935_v45 }
  0x97   :  { %v943_v54 = vsub.f32 %v23_v8, %v89_v50  ;;  %v138_v56 = vsel %vm37_vm0, %v120_v52, 0.0 }
  0x98   :  { %v945_v55 = vsub.f32 %v24_v9, %v90_v51  ;;  %160 = vadd.xlane.f32.xlu0 %v159_v49  ;;  %139 = vadd.xlane.f32.xlu1 %v138_v56  ;;  %v70_v57 = vpop.xlane.xlu0 %69  ;;  %v162_v59 = vsel %vm37_vm0, %v128_v53, 0.0  ;;  %v736_v53 = vld [vmem:[%s1149_s3] sm:$0xff]  }
  0x99   :  { %v73_v58 = vpop.xlane.xlu1 %72  ;;  %v97_v60 = vmul.f32 0.03125, %v70_v57  ;;  %v121_v62 = vmul.f32 %v943_v54, %v943_v54 }
  0x9a   :  { %v98_v61 = vmul.f32 0.03125, %v73_v58  ;;  %v122_v63 = vmul.f32 %v945_v55, %v945_v55 }
  0x9b   :  { %v954_v0 = vsub.f32 %v858_v12, %v97_v60  ;;  %v141_v2 = vsel %vm37_vm0, %v121_v62, 0.0 }
  0x9c   :  { %v957_v1 = vsub.f32 %v863_v13, %v98_v61  ;;  %163 = vadd.xlane.f32.xlu1 %v162_v59  ;;  %142 = vadd.xlane.f32.xlu0 %v141_v2  ;;  %v52_v3 = vpop.xlane.xlu0 %51  ;;  %v144_v5 = vsel %vm37_vm0, %v122_v63, 0.0 }
  0x9d   :  { %v55_v4 = vpop.xlane.xlu1 %54  ;;  %v91_v6 = vmul.f32 0.03125, %v52_v3  ;;  %v129_v8 = vmul.f32 %v954_v0, %v954_v0 }
  0x9e   :  { %v92_v7 = vmul.f32 0.03125, %v55_v4  ;;  %v130_v9 = vmul.f32 %v957_v1, %v957_v1 }
  0x9f   :  { %v966_v10 = vsub.f32 %v872_v16, %v91_v6  ;;  %v165_v12 = vsel %vm37_vm0, %v129_v8, 0.0 }
  0xa0   :  { %v969_v11 = vsub.f32 %v877_v17, %v92_v7  ;;  %145 = vadd.xlane.f32.xlu1 %v144_v5  ;;  %166 = vadd.xlane.f32.xlu0 %v165_v12  ;;  %v76_v13 = vpop.xlane.xlu0 %75  ;;  %v168_v15 = vsel %vm37_vm0, %v130_v9, 0.0 }
  0xa1   :  { %v79_v14 = vpop.xlane.xlu1 %78  ;;  %v99_v18 = vmul.f32 0.03125, %v76_v13  ;;  %v123_v22 = vmul.f32 %v966_v10, %v966_v10 }
  0xa2   :  { %v100_v19 = vmul.f32 0.03125, %v79_v14  ;;  %v124_v16 = vmul.f32 %v969_v11, %v969_v11 }
  0xa3   :  { %v978_v23 = vsub.f32 %v886_v20, %v99_v18  ;;  %v147_v26 = vsel %vm37_vm0, %v123_v22, 0.0 }
  0xa4   :  { %v981_v17 = vsub.f32 %v891_v21, %v100_v19  ;;  %169 = vadd.xlane.f32.xlu1 %v168_v15  ;;  %148 = vadd.xlane.f32.xlu0 %v147_v26  ;;  %v58_v27 = vpop.xlane.xlu0 %57  ;;  %v150_v31 = vsel %vm37_vm0, %v124_v16, 0.0 }
  0xa5   :  { %v61_v30 = vpop.xlane.xlu1 %60  ;;  %v93_v32 = vmul.f32 0.03125, %v58_v27  ;;  %v131_v34 = vmul.f32 %v978_v23, %v978_v23 }
  0xa6   :  { %v94_v33 = vmul.f32 0.03125, %v61_v30  ;;  %v132_v20 = vmul.f32 %v981_v17, %v981_v17 }
  0xa7   :  { %v990_v35 = vsub.f32 %v900_v24, %v93_v32  ;;  %v171_v38 = vsel %vm37_vm0, %v131_v34, 0.0 }
  0xa8   :  { %v993_v21 = vsub.f32 %v905_v25, %v94_v33  ;;  %151 = vadd.xlane.f32.xlu1 %v150_v31  ;;  %172 = vadd.xlane.f32.xlu0 %v171_v38  ;;  %v82_v39 = vpop.xlane.xlu0 %81  ;;  %v174_v41 = vsel %vm37_vm0, %v132_v20, 0.0  ;;  %v1025_v33 = vld [vmem:[%s1150_s1] ss:$0 sm:$0xff] }
  0xa9   :  { %v85_v40 = vpop.xlane.xlu1 %84  ;;  %v101_v42 = vmul.f32 0.03125, %v82_v39  ;;  %v125_v46 = vmul.f32 %v990_v35, %v990_v35 }
  0xaa   :  { %v102_v43 = vmul.f32 0.03125, %v85_v40  ;;  %v126_v24 = vmul.f32 %v993_v21, %v993_v21 }
  0xab   :  { %v1002_v47 = vsub.f32 %v914_v28, %v101_v42  ;;  %v153_v48 = vsel %vm37_vm0, %v125_v46, 0.0 }
  0xac   :  { %v1005_v25 = vsub.f32 %v919_v29, %v102_v43  ;;  %175 = vadd.xlane.f32.xlu1 %v174_v41  ;;  %154 = vadd.xlane.f32.xlu0 %v153_v48  ;;  %v156_v49 = vsel %vm37_vm0, %v126_v24, 0.0  ;;  %v735_v29 = vld [vmem:[%s1149_s3 + $0x8] sm:$0xff]  }
  0xad   :  { %v133_v50 = vmul.f32 %v1002_v47, %v1002_v47  ;;  %711 = vmatprep.subr.bf16.mxu0 %v735_v29  ;;  %731 = vmatprep.subr.bf16.mxu1 %v735_v29 }
  0xae   :  { %v134_v51 = vmul.f32 %v1005_v25, %v1005_v25  ;;  %712 = vmatpush3.bf16.msra.mxu0 %v735_v29  ;;  %733 = vmatpush3.bf16.msra.mxu1 %v735_v29 }
  0xaf   :  { %v177_v52 = vsel %vm37_vm0, %v133_v50, 0.0  ;;  %713 = vmatprep.subr.bf16.mxu0 %v736_v53  ;;  %732 = vmatprep.subr.bf16.mxu1 %v736_v53 }
  0xb0   :  { %157 = vadd.xlane.f32.xlu1 %v156_v49  ;;  %178 = vadd.xlane.f32.xlu0 %v177_v52  ;;  %v180_v28 = vsel %vm37_vm0, %v134_v51, 0.0 }
  0xb2   :  { %714 = vmatpush3.bf16.msra.mxu0 %v736_v53  ;;  %734 = vmatpush3.bf16.msra.mxu1 %v736_v53 }
  0xb4   :  { %181 = vadd.xlane.f32.xlu1 %v180_v28 }
 0x11d   :  { %v137_v56 = vpop.xlane.xlu0 %136 }
 0x11e   :  { %v183_v57 = vmul.f32 0.03125, %v137_v56 }
 0x120   :  { %v199_v58 = vadd.f32 1e-05, %v183_v57 }
 0x121   :  { %v140_v59 = vpop.xlane.xlu1 %139  ;;  %v161_v60 = vpop.xlane.xlu0 %160 }
 0x122   :  { %737 = vrsqrt.f32 %v199_v58  ;;  %v184_v61 = vmul.f32 0.03125, %v140_v59  ;;  %v191_v62 = vmul.f32 0.03125, %v161_v60 }
 0x124   :  { %v200_v63 = vadd.f32 1e-05, %v184_v61  ;;  %v207_v2 = vadd.f32 1e-05, %v191_v62 }
 0x125   :  { %v164_v3 = vpop.xlane.xlu1 %163  ;;  %v143_v4 = vpop.xlane.xlu0 %142 }
 0x126   :  { %739 = vrsqrt.f32 %v200_v63  ;;  %v192_v5 = vmul.f32 0.03125, %v164_v3  ;;  %v185_v6 = vmul.f32 0.03125, %v143_v4 }
 0x127   :  { %741 = vrsqrt.f32 %v207_v2 }
 0x128   :  { %v208_v7 = vadd.f32 1e-05, %v192_v5  ;;  %v201_v8 = vadd.f32 1e-05, %v185_v6 }
 0x129   :  { %v146_v9 = vpop.xlane.xlu1 %145  ;;  %v167_v12 = vpop.xlane.xlu0 %166 }
 0x12a   :  { %743 = vrsqrt.f32 %v208_v7  ;;  %v186_v13 = vmul.f32 0.03125, %v146_v9  ;;  %v193_v14 = vmul.f32 0.03125, %v167_v12 }
 0x12b   :  { %745 = vrsqrt.f32 %v201_v8 }
 0x12c   :  { %v202_v15 = vadd.f32 1e-05, %v186_v13  ;;  %v209_v18 = vadd.f32 1e-05, %v193_v14 }
 0x12d   :  { %v170_v19 = vpop.xlane.xlu1 %169  ;;  %v149_v22 = vpop.xlane.xlu0 %148 }
 0x12e   :  { %747 = vrsqrt.f32 %v202_v15  ;;  %v194_v16 = vmul.f32 0.03125, %v170_v19  ;;  %v187_v26 = vmul.f32 0.03125, %v149_v22 }
 0x12f   :  { %v738_v27 = vpop.eup %737  ;;  %749 = vrsqrt.f32 %v209_v18 }
 0x130   :  { %v210_v30 = vadd.f32 1e-05, %v194_v16  ;;  %v203_v31 = vadd.f32 1e-05, %v187_v26  ;;  %v231_v32 = vmul.f32 %v738_v27, %v925_v36  ;;  %v1032_v36 = vld [vmem:[%s1151_s2] ss:$0 sm:$0xff] }
 0x131   :  { %v152_v34 = vpop.xlane.xlu1 %151  ;;  %v173_v20 = vpop.xlane.xlu0 %172 }
 0x132   :  { %751 = vrsqrt.f32 %v210_v30  ;;  %v188_v38 = vmul.f32 0.03125, %v152_v34  ;;  %v195_v39 = vmul.f32 0.03125, %v173_v20  ;;  %v254_v41 = vmul.f32 %v1025_v33, %v231_v32 }
 0x133   :  { %v740_v40 = vpop.eup %739  ;;  %753 = vrsqrt.f32 %v203_v31 }
 0x134   :  { %v742_v42 = vpop.eup %741  ;;  %v204_v43 = vadd.f32 1e-05, %v188_v38  ;;  %v211_v46 = vadd.f32 1e-05, %v195_v39  ;;  %v232_v24 = vmul.f32 %v740_v40, %v933_v44  ;;  %v277_v53 = vadd.f32 %v1032_v36, %v254_v41 }
 0x135   :  { %v176_v48 = vpop.xlane.xlu1 %175  ;;  %v155_v49 = vpop.xlane.xlu0 %154  ;;  %v239_v50 = vmul.f32 %v742_v42, %v927_v37 }
 0x136   :  { %755 = vrsqrt.f32 %v204_v43  ;;  %v196_v51 = vmul.f32 0.03125, %v176_v48  ;;  %v189_v52 = vmul.f32 0.03125, %v155_v49  ;;  %v255_v28 = vmul.f32 %v1025_v33, %v232_v24 }
 0x137   :  { %v744_v29 = vpop.eup %743  ;;  %757 = vrsqrt.f32 %v211_v46  ;;  %v262_v37 = vmul.f32 %v1025_v33, %v239_v50 }
 0x138   :  { %v746_v56 = vpop.eup %745  ;;  %v212_v44 = vadd.f32 1e-05, %v196_v51  ;;  %v205_v57 = vadd.f32 1e-05, %v189_v52  ;;  %v278_v58 = vadd.f32 %v1032_v36, %v255_v28  ;;  %v240_v59 = vmul.f32 %v744_v29, %v935_v45 }
 0x139   :  { %v158_v60 = vpop.xlane.xlu1 %157  ;;  %v179_v61 = vpop.xlane.xlu0 %178  ;;  %v233_v62 = vmul.f32 %v746_v56, %v943_v54  ;;  %v285_v54 = vadd.f32 %v1032_v36, %v262_v37 }
 0x13a   :  { %759 = vrsqrt.f32 %v212_v44  ;;  %v190_v63 = vmul.f32 0.03125, %v158_v60  ;;  %v197_v2 = vmul.f32 0.03125, %v179_v61  ;;  %v293_v3 = vpack.c.bf16 %v278_v58, %v277_v53 }
 0x13b   :  { %v748_v4 = vpop.eup %747  ;;  %761 = vrsqrt.f32 %v205_v57  ;;  %v263_v5 = vmul.f32 %v1025_v33, %v240_v59  ;;  %v256_v6 = vmul.f32 %v1025_v33, %v233_v62 }
 0x13c   :  { %v750_v7 = vpop.eup %749  ;;  %v206_v8 = vadd.f32 1e-05, %v190_v63  ;;  %v213_v9 = vadd.f32 1e-05, %v197_v2  ;;  %715 = vmatprep.mubr.msk.bf16.mxu0 %vm37_vm0, %v293_v3  ;;  %v234_v45 = vmul.f32 %v748_v4, %v945_v55  ;;  %v1090_v4 = vld [vmem:[%s1152_s4] ss:$0 sm:$0xff] }
 0x13d   :  { %v182_v12 = vpop.xlane.xlu1 %181  ;;  %v286_v13 = vadd.f32 %v1032_v36, %v263_v5  ;;  %v241_v14 = vmul.f32 %v750_v7, %v954_v0  ;;  %v279_v16 = vadd.f32 %v1032_v36, %v256_v6 }
 0x13e   :  { %763 = vrsqrt.f32 %v206_v8  ;;  %v198_v15 = vmul.f32 0.03125, %v182_v12  ;;  %v257_v18 = vmul.f32 %v1025_v33, %v234_v45 }
 0x13f   :  { %v752_v19 = vpop.eup %751  ;;  %765 = vrsqrt.f32 %v213_v9  ;;  %v297_v22 = vpack.c.bf16 %v286_v13, %v285_v54  ;;  %v264_v31 = vmul.f32 %v1025_v33, %v241_v14 }
 0x140   :  { %v754_v26 = vpop.eup %753  ;;  %v214_v27 = vadd.f32 1e-05, %v198_v15  ;;  %v280_v55 = vadd.f32 %v1032_v36, %v257_v18  ;;  %v242_v30 = vmul.f32 %v752_v19, %v957_v1 }
 0x141   :  { %723 = vmatprep.mubr.msk.bf16.mxu1 %vm37_vm0, %v297_v22  ;;  %v235_v0 = vmul.f32 %v754_v26, %v966_v10  ;;  %v287_v39 = vadd.f32 %v1032_v36, %v264_v31 }
 0x142   :  { %767 = vrsqrt.f32 %v214_v27  ;;  %v294_v32 = vpack.c.bf16 %v280_v55, %v279_v16  ;;  %v265_v34 = vmul.f32 %v1025_v33, %v242_v30 }
 0x143   :  { %v756_v20 = vpop.eup %755  ;;  %v258_v41 = vmul.f32 %v1025_v33, %v235_v0 }
 0x144   :  { %v758_v38 = vpop.eup %757  ;;  %716 = vmatmul.mubr.msk.bf16.vlgmr.msra.gmra.mxu0 %vm37_vm0, %v294_v32  ;;  %v288_v40 = vadd.f32 %v1032_v36, %v265_v34  ;;  %v236_v1 = vmul.f32 %v756_v20, %v969_v11 }
 0x145   :  { %v243_v42 = vmul.f32 %v758_v38, %v978_v23  ;;  %v281_v48 = vadd.f32 %v1032_v36, %v258_v41 }
 0x146   :  { %v298_v43 = vpack.c.bf16 %v288_v40, %v287_v39  ;;  %v259_v10 = vmul.f32 %v1025_v33, %v236_v1 }
 0x147   :  { %v760_v46 = vpop.eup %759  ;;  %v266_v51 = vmul.f32 %v1025_v33, %v243_v42 }
 0x148   :  { %v762_v24 = vpop.eup %761  ;;  %724 = vmatmul.mubr.msk.bf16.vlgmr.msra.gmra.mxu1 %vm37_vm0, %v298_v43  ;;  %v282_v49 = vadd.f32 %v1032_v36, %v259_v10  ;;  %v244_v50 = vmul.f32 %v760_v46, %v981_v17 }
 0x149   :  { %v237_v11 = vmul.f32 %v762_v24, %v990_v35  ;;  %v289_v53 = vadd.f32 %v1032_v36, %v266_v51 }
 0x14a   :  { %v295_v52 = vpack.c.bf16 %v282_v49, %v281_v48  ;;  %v267_v23 = vmul.f32 %v1025_v33, %v244_v50 }
 0x14b   :  { %v764_v28 = vpop.eup %763  ;;  %v260_v57 = vmul.f32 %v1025_v33, %v237_v11 }
 0x14c   :  { %v766_v29 = vpop.eup %765  ;;  %719 = vmatprep.mubr.msk.bf16.mxu0 %vm37_vm0, %v295_v52  ;;  %v290_v56 = vadd.f32 %v1032_v36, %v267_v23  ;;  %v238_v44 = vmul.f32 %v764_v28, %v993_v21 }
 0x14d   :  { %v245_v17 = vmul.f32 %v766_v29, %v1002_v47  ;;  %v283_v60 = vadd.f32 %v1032_v36, %v260_v57 }
 0x14e   :  { %v299_v58 = vpack.c.bf16 %v290_v56, %v289_v53  ;;  %v261_v35 = vmul.f32 %v1025_v33, %v238_v44 }
 0x14f   :  { %v768_v59 = vpop.eup %767  ;;  %v268_v62 = vmul.f32 %v1025_v33, %v245_v17 }
 0x150   :  { %727 = vmatprep.mubr.msk.bf16.mxu1 %vm37_vm0, %v299_v58  ;;  %v284_v61 = vadd.f32 %v1032_v36, %v261_v35  ;;  %v246_v37 = vmul.f32 %v768_v59, %v1005_v25 }
 0x151   :  { %v291_v47 = vadd.f32 %v1032_v36, %v268_v62 }
 0x152   :  { %v296_v63 = vpack.c.bf16 %v284_v61, %v283_v60  ;;  %v269_v21 = vmul.f32 %v1025_v33, %v246_v37 }
 0x154   :  { %720 = vmatmul.mubr.msk.bf16.gmra.mxu0 %vm37_vm0, %v296_v63  ;;  %v292_v2 = vadd.f32 %v1032_v36, %v269_v21 }
 0x156   :  { %v300_v3 = vpack.c.bf16 %v292_v2, %v291_v47 }
 0x158   :  { %728 = vmatmul.mubr.msk.bf16.gmra.mxu1 %vm37_vm0, %v300_v3 }
 0x204   :  { %v717_v25 = vpop.f32.mrf.mxu0 }
 0x205   :  { %v391_v5 = vadd.f32 %v717_v25, %v1090_v4 }
 0x206   :  { %v382_v6 = vpop.f32.mrf.mxu0 }
 0x207   :  { %v463_v7 = vmul.f32 0.70710677, %v391_v5  ;;  %v383_v33 = vadd.f32 %v1090_v4, %v382_v6  ;;  %v447_v42 = vmul.f32 0.5, %v391_v5 }
 0x208   :  { %v718_v8 = vpop.f32.mrf.mxu0  ;;  %v725_v9 = vpop.f32.mrf.mxu1 }
 0x209   :  { %769 = verf.f32 %v463_v7  ;;  %v461_v45 = vmul.f32 0.70710677, %v383_v33  ;;  %v394_v36 = vadd.f32 %v718_v8, %v1090_v4  ;;  %v423_v12 = vadd.f32 %v725_v9, %v1090_v4 }
 0x20a   :  { %v385_v54 = vpop.f32.mrf.mxu0  ;;  %v414_v13 = vpop.f32.mrf.mxu1  ;;  %v445_v46 = vmul.f32 0.5, %v383_v33 }
 0x20b   :  { %771 = verf.f32 %v461_v45  ;;  %v464_v14 = vmul.f32 0.70710677, %v394_v36  ;;  %v386_v15 = vadd.f32 %v1090_v4, %v385_v54  ;;  %v471_v18 = vmul.f32 0.70710677, %v423_v12 }
 0x20c   :  { %v415_v19 = vadd.f32 %v1090_v4, %v414_v13  ;;  %v726_v22 = vpop.f32.mrf.mxu1  ;;  %v448_v48 = vmul.f32 0.5, %v394_v36  ;;  %v455_v49 = vmul.f32 0.5, %v423_v12 }
 0x20d   :  { %773 = verf.f32 %v464_v14  ;;  %v462_v16 = vmul.f32 0.70710677, %v386_v15  ;;  %v426_v26 = vadd.f32 %v726_v22, %v1090_v4  ;;  %v446_v44 = vmul.f32 0.5, %v386_v15 }
 0x20e   :  { %775 = verf.f32 %v471_v18  ;;  %v469_v27 = vmul.f32 0.70710677, %v415_v19  ;;  %v417_v55 = vpop.f32.mrf.mxu1  ;;  %v453_v57 = vmul.f32 0.5, %v415_v19 }
 0x20f   :  { %777 = verf.f32 %v462_v16  ;;  %v472_v30 = vmul.f32 0.70710677, %v426_v26  ;;  %v418_v31 = vadd.f32 %v1090_v4, %v417_v55  ;;  %v456_v3 = vmul.f32 0.5, %v426_v26 }
 0x210   :  { %779 = verf.f32 %v469_v27 }
 0x211   :  { %781 = verf.f32 %v472_v30  ;;  %v470_v0 = vmul.f32 0.70710677, %v418_v31  ;;  %v454_v25 = vmul.f32 0.5, %v418_v31 }
 0x213   :  { %783 = verf.f32 %v470_v0 }
 0x214   :  { %v721_v32 = vpop.f32.mrf.mxu0 }
 0x215   :  { %v1101_v34 = vadd.f32 %v721_v32, %v1090_v4 }
 0x216   :  { %v770_v20 = vpop.eup %769  ;;  %v398_v38 = vpop.f32.mrf.mxu0 }
 0x217   :  { %v495_v39 = vadd.f32 1.0, %v770_v20  ;;  %v467_v40 = vmul.f32 0.70710677, %v1101_v34  ;;  %v1105_v1 = vadd.f32 %v1090_v4, %v398_v38  ;;  %v451_v32 = vmul.f32 0.5, %v1101_v34 }
 0x218   :  { %v772_v41 = vpop.eup %771  ;;  %v722_v43 = vpop.f32.mrf.mxu0 }
 0x219   :  { %v729_v10 = vpop.f32.mrf.mxu1  ;;  %v493_v24 = vadd.f32 1.0, %v772_v41  ;;  %785 = verf.f32 %v467_v40  ;;  %v465_v51 = vmul.f32 0.70710677, %v1105_v1  ;;  %v410_v11 = vadd.f32 %v722_v43, %v1090_v4 }
 0x21a   :  { %v774_v50 = vpop.eup %773  ;;  %v1110_v52 = vadd.f32 %v729_v10, %v1090_v4  ;;  %v401_v23 = vpop.f32.mrf.mxu0  ;;  %v511_v53 = vmul.f32 %v495_v39, %v447_v42 }
 0x21b   :  { %v430_v28 = vpop.f32.mrf.mxu1  ;;  %v776_v29 = vpop.eup %775  ;;  %v496_v56 = vadd.f32 1.0, %v774_v50  ;;  %v468_v35 = vmul.f32 0.70710677, %v410_v11  ;;  %v402_v59 = vadd.f32 %v1090_v4, %v401_v23  ;;  %787 = verf.f32 %v465_v51 }
 0x21c   :  { %v778_v17 = vpop.eup %777  ;;  %v503_v58 = vadd.f32 1.0, %v776_v29  ;;  %v1114_v60 = vadd.f32 %v1090_v4, %v430_v28  ;;  %v475_v21 = vmul.f32 0.70710677, %v1110_v52  ;;  %v509_v2 = vmul.f32 %v493_v24, %v445_v46 }
 0x21d   :  { %v730_v61 = vpop.f32.mrf.mxu1  ;;  %v780_v37 = vpop.eup %779  ;;  %v512_v62 = vmul.f32 %v496_v56, %v448_v48  ;;  %v494_v63 = vadd.f32 1.0, %v778_v17  ;;  %789 = verf.f32 %v468_v35  ;;  %v466_v36 = vmul.f32 0.70710677, %v402_v59 }
 0x21e   :  { %v782_v47 = vpop.eup %781  ;;  %v501_v7 = vadd.f32 1.0, %v780_v37  ;;  %v519_v45 = vmul.f32 %v503_v58, %v455_v49  ;;  %791 = verf.f32 %v475_v21  ;;  %v473_v12 = vmul.f32 0.70710677, %v1114_v60 }
 0x21f   :  { %v662_v5 = vpack.c.bf16 %v512_v62, %v511_v53  ;;  %v510_v6 = vmul.f32 %v494_v63, %v446_v44  ;;  %v504_v33 = vadd.f32 1.0, %v782_v47  ;;  %v433_v8 = vpop.f32.mrf.mxu1  ;;  %v442_v15 = vadd.f32 %v730_v61, %v1090_v4 }
 0x220   :  { %v784_v9 = vpop.eup %783  ;;  %793 = verf.f32 %v466_v36  ;;  %v434_v18 = vadd.f32 %v1090_v4, %v433_v8  ;;  %v517_v19 = vmul.f32 %v501_v7, %v453_v57  ;;  %v452_v20 = vmul.f32 0.5, %v410_v11 }
 0x221   :  { %694 = vst [vmem:[%s1153_s5 + $0x8] sm:$0xff] %v662_v5   ;;  %v657_v54 = vpack.c.bf16 %v510_v6, %v509_v2  ;;  %v520_v13 = vmul.f32 %v504_v33, %v456_v3  ;;  %v502_v14 = vadd.f32 1.0, %v784_v9  ;;  %795 = verf.f32 %v473_v12 }
 0x222   :  { %v476_v26 = vmul.f32 0.70710677, %v442_v15  ;;  %v474_v27 = vmul.f32 0.70710677, %v434_v18  ;;  %v449_v46 = vmul.f32 0.5, %v1105_v1  ;;  %v450_v48 = vmul.f32 0.5, %v402_v59 }
 0x223   :  { %658 = vst [vmem:[%s1153_s5] sm:$0xff] %v657_v54   ;;  %v682_v22 = vpack.c.bf16 %v520_v13, %v519_v45  ;;  %v518_v16 = vmul.f32 %v502_v14, %v454_v25  ;;  %v459_v29 = vmul.f32 0.5, %v1110_v52  ;;  %v460_v56 = vmul.f32 0.5, %v442_v15 }
 0x224   :  { %797 = verf.f32 %v476_v26  ;;  %v457_v1 = vmul.f32 0.5, %v1114_v60  ;;  %v458_v57 = vmul.f32 0.5, %v434_v18 }
 0x225   :  { %698 = vst [vmem:[%s1153_s5 + $0x28] sm:$0xff] %v682_v22   ;;  %v677_v55 = vpack.c.bf16 %v518_v16, %v517_v19  ;;  %799 = verf.f32 %v474_v27 }
 0x226   :  { %v786_v30 = vpop.eup %785 }
 0x227   :  { %697 = vst [vmem:[%s1153_s5 + $0x20] sm:$0xff] %v677_v55   ;;  %v499_v31 = vadd.f32 1.0, %v786_v30 }
 0x228   :  { %v788_v4 = vpop.eup %787 }
 0x229   :  { %v515_v40 = vmul.f32 %v499_v31, %v451_v32  ;;  %v497_v41 = vadd.f32 1.0, %v788_v4 }
 0x22a   :  { %v790_v0 = vpop.eup %789 }
 0x22b   :  { %v500_v38 = vadd.f32 1.0, %v790_v0  ;;  %v792_v39 = vpop.eup %791  ;;  %v513_v50 = vmul.f32 %v497_v41, %v449_v46 }
 0x22c   :  { %v507_v51 = vadd.f32 1.0, %v792_v39 }
 0x22d   :  { %v516_v42 = vmul.f32 %v500_v38, %v452_v20  ;;  %v794_v43 = vpop.eup %793 }
 0x22e   :  { %v796_v10 = vpop.eup %795  ;;  %v498_v49 = vadd.f32 1.0, %v794_v43  ;;  %v523_v58 = vmul.f32 %v507_v51, %v459_v29 }
 0x22f   :  { %v672_v24 = vpack.c.bf16 %v516_v42, %v515_v40  ;;  %v505_v23 = vadd.f32 1.0, %v796_v10 }
 0x230   :  { %v514_v34 = vmul.f32 %v498_v49, %v450_v48 }
 0x231   :  { %696 = vst [vmem:[%s1153_s5 + $0x18] sm:$0xff] %v672_v24   ;;  %v798_v11 = vpop.eup %797  ;;  %v521_v59 = vmul.f32 %v505_v23, %v457_v1 }
 0x232   :  { %v800_v28 = vpop.eup %799  ;;  %v667_v53 = vpack.c.bf16 %v514_v34, %v513_v50  ;;  %v508_v44 = vadd.f32 1.0, %v798_v11 }
 0x233   :  { %v506_v17 = vadd.f32 1.0, %v800_v28 }
 0x234   :  { %695 = vst [vmem:[%s1153_s5 + $0x10] sm:$0xff] %v667_v53   ;;  %v524_v35 = vmul.f32 %v508_v44, %v460_v56 }
 0x235   :  { %v522_v61 = vmul.f32 %v506_v17, %v458_v57 }
 0x236   :  { %v692_v37 = vpack.c.bf16 %v524_v35, %v523_v58 }
 0x237   :  { %v687_v62 = vpack.c.bf16 %v522_v61, %v521_v59 }
 0x238   :  { %700 = vst [vmem:[%s1153_s5 + $0x38] sm:$0xff] %v692_v37  }
 0x239   :  { %699 = vst [vmem:[%s1153_s5 + $0x30] sm:$0xff] %v687_v62  }

</bundles_post_ra>
